<compile_context>
chip_gen: v7x
topology: tpu7x:2x2x1
jax: 0.10.0
libtpu: 0.0.40
codegen_flags: <defaults>
</compile_context>

<pallas_src>
import functools

import numpy as np

import jax
import jax.numpy as jnp
from jax.experimental import pallas as pl
from jax.experimental.pallas import tpu as pltpu


# ----------------------------- helpers ------------------------------------------------

def _pick_block_m(M, target=128):
    """Largest M-block <= target that divides M and is a multiple of 8 (else full M)."""
    if M <= target:
        return M
    for bm in range(target, 7, -8):
        if M % bm == 0:
            return bm
    return M


def _im2col_nhwc(x, kh, kw, sh, sw, ph, pw):
    """x: (B, H, W, C) -> patches (B*OH*OW, KH*KW*C); feature order (kh, kw, c).

    No transposes: patches are stacked on a new axis just before the (lane) channel dim,
    so the channel dim stays minor throughout.
    """
    B, H, W, C = x.shape
    xp = jnp.pad(x, ((0, 0), (ph, ph), (pw, pw), (0, 0)))
    OH = (H + 2 * ph - kh) // sh + 1
    OW = (W + 2 * pw - kw) // sw + 1
    cols = []
    for i in range(kh):
        for j in range(kw):
            cols.append(xp[:, i:i + sh * (OH - 1) + 1:sh,
                            j:j + sw * (OW - 1) + 1:sw, :])
    p = jnp.stack(cols, axis=3)                       # (B, OH, OW, KH*KW, C)
    return p.reshape(B * OH * OW, kh * kw * C), OH, OW


# ----------------------------- conv matmul kernel --------------------------------------

def _matmul_bias_relu_kernel(x_ref, w_ref, b_ref, o_ref):
    y = jnp.dot(x_ref[...], w_ref[...], preferred_element_type=jnp.float32)
    o_ref[...] = jnp.maximum(y + b_ref[...], 0.0).astype(o_ref.dtype)


def matmul_bias_relu(x, w, b):
    """relu(x @ w + b) with an M-parallel grid (x: (M,K), w: (K,N), b: (N,))."""
    M, K = x.shape
    K2, N = w.shape
    assert K == K2, (K, K2)
    bm = _pick_block_m(M)
    return pl.pallas_call(
        _matmul_bias_relu_kernel,
        out_shape=jax.ShapeDtypeStruct((M, N), jnp.float32),
        grid=(M // bm,),
        in_specs=[
            pl.BlockSpec((bm, K), lambda i: (i, 0)),
            pl.BlockSpec((K, N), lambda i: (0, 0)),
            pl.BlockSpec((1, N), lambda i: (0, 0)),
        ],
        out_specs=pl.BlockSpec((bm, N), lambda i: (i, 0)),
        compiler_params=pltpu.CompilerParams(
            dimension_semantics=("parallel",),
            vmem_limit_bytes=32 * 1024 * 1024),
    )(x, w, b.reshape(1, N))


# ----------------------------- fused head kernel ---------------------------------------

def _head_kernel(x_img_ref, w_img_ref, b_img_ref,
                 x_small_ref, w_small_ref, b_small_ref,
                 w1_img_ref, w1_small_ref, b1_ref,
                 w2_ref, b2_ref,
                 out_ref, acc_ref):
    k = pl.program_id(0)

    @pl.when(k == 0)
    def _init():
        acc_ref[...] = jnp.zeros_like(acc_ref)

    # K-tiled fc_img: bf16 weight tile x bf16 activations, f32 accumulate on MXU.
    acc_ref[...] += jnp.dot(x_img_ref[...].astype(jnp.bfloat16), w_img_ref[...],
                            preferred_element_type=jnp.float32)

    @pl.when(k == pl.num_programs(0) - 1)
    def _finish():
        img = jnp.maximum(acc_ref[...] + b_img_ref[...], 0.0)                  # (B, 512)
        # goal/ray/action packed as one block-diagonal matmul -> (B, 192) = [g|r|a]
        small = jnp.maximum(
            jnp.dot(x_small_ref[...], w_small_ref[...],
                    preferred_element_type=jnp.float32) + b_small_ref[...], 0.0)
        # concat([img, small]) @ W1  ==  img @ W1[:512] + small @ W1[512:]
        h = jnp.dot(img.astype(jnp.bfloat16), w1_img_ref[...],
                    preferred_element_type=jnp.float32)
        h = h + jnp.dot(small.astype(jnp.bfloat16), w1_small_ref[...],
                        preferred_element_type=jnp.float32)
        h = jnp.maximum(h + b1_ref[...], 0.0)                                   # (B, 512)
        out = jnp.tanh(jnp.dot(h, w2_ref[...], preferred_element_type=jnp.float32)
                       + b2_ref[...])                                           # (B, 128)
        out_ref[...] = out.astype(out_ref.dtype)


def fused_head(x_img, x_small, pk, tk=1024):
    """One pallas_call for the whole post-conv head.  Returns (B, 128) (padded mean)."""
    B, K = x_img.shape
    if K % tk != 0:
        tk = K
    n_small = x_small.shape[1]
    return pl.pallas_call(
        _head_kernel,
        out_shape=jax.ShapeDtypeStruct((B, 128), jnp.float32),
        grid=(K // tk,),
        in_specs=[
            pl.BlockSpec((B, tk), lambda k: (0, k)),          # x_img K-tile
            pl.BlockSpec((tk, 512), lambda k: (k, 0)),        # fc_img weight tile (bf16)
            pl.BlockSpec((1, 512), lambda k: (0, 0)),         # fc_img bias
            pl.BlockSpec((B, n_small), lambda k: (0, 0)),     # [goal|ray|action] input
            pl.BlockSpec((n_small, 192), lambda k: (0, 0)),   # block-diag small-fc weight
            pl.BlockSpec((1, 192), lambda k: (0, 0)),         # small-fc bias
            pl.BlockSpec((512, 512), lambda k: (0, 0)),       # igr1 weight, img rows (bf16)
            pl.BlockSpec((192, 512), lambda k: (0, 0)),       # igr1 weight, small rows (bf16)
            pl.BlockSpec((1, 512), lambda k: (0, 0)),         # igr1 bias
            pl.BlockSpec((512, 128), lambda k: (0, 0)),       # igr2 weight (padded to 128)
            pl.BlockSpec((1, 128), lambda k: (0, 0)),         # igr2 bias (padded to 128)
        ],
        out_specs=pl.BlockSpec((B, 128), lambda k: (0, 0)),
        scratch_shapes=[pltpu.VMEM((B, 512), jnp.float32)],   # fc_img f32 accumulator
        compiler_params=pltpu.CompilerParams(
            dimension_semantics=("arbitrary",),
            vmem_limit_bytes=32 * 1024 * 1024),
    )(x_img, pk["fc_img_w"], pk["fc_img_b"],
      x_small, pk["w_small"], pk["b_small"],
      pk["w1_img"], pk["w1_small"], pk["b1"],
      pk["w2"], pk["b2"])


# ----------------------------- params (torch layout) + one-time packing ----------------

def init_params(key, HIST, action_dim, log_std=0.0):
    """Parameters stored in PyTorch layouts: conv (OC,C,KH,KW), linear (out,in)."""
    ks = jax.random.split(key, 18)

    def u(k, shape, fan_in):
        bound = 1.0 / float(np.sqrt(fan_in))
        return jax.random.uniform(k, shape, jnp.float32, -bound, bound)

    p = {
        "conv1_w": u(ks[0], (32, HIST, 10, 14), HIST * 10 * 14),
        "conv1_b": u(ks[1], (32,), HIST * 10 * 14),
        "conv2_w": u(ks[2], (64, 32, 4, 4), 32 * 16),
        "conv2_b": u(ks[3], (64,), 32 * 16),
        "conv3_w": u(ks[4], (64, 64, 3, 3), 64 * 9),
        "conv3_b": u(ks[5], (64,), 64 * 9),
        "fc_img_w": u(ks[6], (512, 8 * 10 * 64), 8 * 10 * 64),
        "fc_img_b": u(ks[7], (512,), 8 * 10 * 64),
        "fc_goal_w": u(ks[8], (96, HIST * 3), HIST * 3),
        "fc_goal_b": u(ks[9], (96,), HIST * 3),
        "fc_ray_w": u(ks[10], (32, HIST * 1), HIST),
        "fc_ray_b": u(ks[11], (32,), HIST),
        "fc_action_w": u(ks[12], (64, HIST * 2), HIST * 2),
        "fc_action_b": u(ks[13], (64,), HIST * 2),
        "igr1_w": u(ks[14], (512, 704), 704),
        "igr1_b": u(ks[15], (512,), 704),
        "igr2_w": u(ks[16], (action_dim, 512), 512),
        "igr2_b": jnp.zeros((action_dim,), jnp.float32),     # bias.data.mul_(0.0)
        "action_log_std": jnp.full((1, action_dim), log_std, jnp.float32),
    }
    return p


def pack_params(p):
    """One-time permutation / packing / bf16 cast into kernel-friendly layouts."""
    A = p["igr2_w"].shape[0]
    assert A <= 128

    def conv_pack(w):                                   # (OC,C,KH,KW) -> (KH*KW*C, OC)
        OC, C, KH, KW = w.shape
        return jnp.transpose(w, (2, 3, 1, 0)).reshape(KH * KW * C, OC)

    # fc_img: torch flattens conv3 output as (C=64, H=8, W=10); the Pallas conv path
    # produces (H, W, C) order, so permute the weight columns once here.
    w_img = p["fc_img_w"].reshape(512, 64, 8, 10)       # (out, c, h, w)
    w_img = jnp.transpose(w_img, (2, 3, 1, 0)).reshape(8 * 10 * 64, 512)

    hg = p["fc_goal_w"].shape[1]                        # HIST*3
    hr = p["fc_ray_w"].shape[1]                         # HIST*1
    ha = p["fc_action_w"].shape[1]                      # HIST*2
    w_small = jnp.zeros((hg + hr + ha, 192), jnp.float32)
    w_small = w_small.at[0:hg, 0:96].set(p["fc_goal_w"].T)
    w_small = w_small.at[hg:hg + hr, 96:128].set(p["fc_ray_w"].T)
    w_small = w_small.at[hg + hr:, 128:192].set(p["fc_action_w"].T)
    b_small = jnp.concatenate([p["fc_goal_b"], p["fc_ray_b"], p["fc_action_b"]])

    w1 = p["igr1_w"].T                                  # (704, 512); rows: [img|g|r|a]
    w2 = jnp.zeros((512, 128), jnp.float32).at[:, :A].set(p["igr2_w"].T)
    b2 = jnp.zeros((128,), jnp.float32).at[:A].set(p["igr2_b"])

    return {
        "conv1_w": conv_pack(p["conv1_w"]), "conv1_b": p["conv1_b"],
        "conv2_w": conv_pack(p["conv2_w"]), "conv2_b": p["conv2_b"],
        "conv3_w": conv_pack(p["conv3_w"]), "conv3_b": p["conv3_b"],
        "fc_img_w": w_img.astype(jnp.bfloat16),         # HBM-bandwidth-bound layer -> bf16
        "fc_img_b": p["fc_img_b"].reshape(1, 512),
        "w_small": w_small, "b_small": b_small.reshape(1, 192),
        "w1_img": w1[:512].astype(jnp.bfloat16),
        "w1_small": w1[512:].astype(jnp.bfloat16),
        "b1": p["igr1_b"].reshape(1, 512),
        "w2": w2, "b2": b2.reshape(1, 128),
        "action_log_std": p["action_log_std"],
    }


# ----------------------------- forward pass --------------------------------------------

def policy_forward(packed, depth_img, goal, ray, hist_action):
    B = depth_img.shape[0]
    x = jnp.transpose(depth_img, (0, 2, 3, 1))          # single NCHW->NHWC of the input

    p1, oh, ow = _im2col_nhwc(x, 10, 14, 8, 8, 1, 4)
    h = matmul_bias_relu(p1, packed["conv1_w"], packed["conv1_b"]).reshape(B, oh, ow, 32)

    p2, oh, ow = _im2col_nhwc(h, 4, 4, 2, 2, 1, 1)
    h = matmul_bias_relu(p2, packed["conv2_w"], packed["conv2_b"]).reshape(B, oh, ow, 64)

    p3, oh, ow = _im2col_nhwc(h, 3, 3, 1, 1, 1, 1)
    h = matmul_bias_relu(p3, packed["conv3_w"], packed["conv3_b"])
    x_img = h.reshape(B, oh * ow * 64)                  # (B, 5120) in (h, w, c) order

    x_small = jnp.concatenate(
        [goal.reshape(B, -1), ray.reshape(B, -1), hist_action.reshape(B, -1)], axis=1)

    out_padded = fused_head(x_img, x_small, packed)     # (B, 128), lane-dense store
    A = packed["action_log_std"].shape[1]
    action_mean = out_padded[:, :A]
    action_log_std = jnp.broadcast_to(packed["action_log_std"], action_mean.shape)
    action_std = jnp.exp(action_log_std)
    return action_mean, action_log_std, action_std


# ----------------------------- plain-JAX reference (torch math) ------------------------

def reference_forward(params, depth_img, goal, ray, hist_action):
    def conv(x, w, b, stride, padding):
        y = jax.lax.conv_general_dilated(
            x, w, window_strides=stride,
            padding=[(padding[0], padding[0]), (padding[1], padding[1])],
            dimension_numbers=("NCHW", "OIHW", "NCHW"))
        return jax.nn.relu(y + b[None, :, None, None])

    x = conv(depth_img, params["conv1_w"], params["conv1_b"], (8, 8), (1, 4))
    x = conv(x, params["conv2_w"], params["conv2_b"], (2, 2), (1, 1))
    x = conv(x, params["conv3_w"], params["conv3_b"], (1, 1), (1, 1))
    B = x.shape[0]
    x = x.reshape(B, -1)
    img = jax.nn.relu(x @ params["fc_img_w"].T + params["fc_img_b"])
    g = jax.nn.relu(goal.reshape(B, -1) @ params["fc_goal_w"].T + params["fc_goal_b"])
    r = jax.nn.relu(ray.reshape(B, -1) @ params["fc_ray_w"].T + params["fc_ray_b"])
    a = jax.nn.relu(hist_action.reshape(B, -1) @ params["fc_action_w"].T
                    + params["fc_action_b"])
    cat = jnp.concatenate([img, g, r, a], axis=1)
    h = jax.nn.relu(cat @ params["igr1_w"].T + params["igr1_b"])
    mean = jnp.tanh(h @ params["igr2_w"].T + params["igr2_b"])
    log_std = jnp.broadcast_to(params["action_log_std"], mean.shape)
    return mean, log_std, jnp.exp(log_std)


# ----------------------------- main -----------------------------------------------------

if __name__ == "__main__":
    # Geometry forced by fc_img = Linear(8*10*64, 512): depth image must be 128x160.
    HIST = 4
    action_dim = 2
    B = 2

    key = jax.random.PRNGKey(0)
    k1, k2, k3, k4, kp = jax.random.split(key, 5)
    depth_img = jax.random.normal(k1, (B, HIST, 128, 160), jnp.float32)
    goal = jax.random.normal(k2, (B, HIST, 3), jnp.float32)
    ray = jax.random.normal(k3, (B, HIST, 1), jnp.float32)
    hist_action = jax.random.normal(k4, (B, HIST, 2), jnp.float32)

    params = init_params(kp, HIST, action_dim, log_std=0.0)
    packed = pack_params(params)

    fwd = jax.jit(policy_forward)
    action_mean, action_log_std, action_std = fwd(packed, depth_img, goal, ray, hist_action)
    jax.block_until_ready((action_mean, action_log_std, action_std))

    # Correctness check against a plain-JAX transliteration of the PyTorch forward
    # (loose tolerance covers the bf16 weight compression in the fused head).
    ref_mean, ref_log_std, ref_std = jax.jit(reference_forward)(
        params, depth_img, goal, ray, hist_action)
    np.testing.assert_allclose(np.asarray(action_mean), np.asarray(ref_mean),
                               atol=1e-1, rtol=0)
    np.testing.assert_allclose(np.asarray(action_std), np.asarray(ref_std),
                               atol=1e-6, rtol=0)

    assert action_mean.shape == (B, action_dim)
    assert action_log_std.shape == (B, action_dim)
    assert action_std.shape == (B, action_dim)
    print("KERNEL_OK")
</pallas_src>

<mosaic_0001>
module attributes {stable_mosaic.version = 11 : i64} {
  func.func @_matmul_bias_relu_kernel(%arg0: i32, %arg1: memref<128x560xf32, #tpu.memory_space<vmem>>, %arg2: memref<560x32xf32, #tpu.memory_space<vmem>>, %arg3: memref<1x32xf32, #tpu.memory_space<vmem>>, %arg4: memref<128x32xf32, #tpu.memory_space<vmem>>) attributes {dimension_semantics = [#tpu.dimension_semantics<parallel>], iteration_bounds = array<i64: 5>, scalar_prefetch = 0 : i64, scratch_operands = 0 : i64, tpu.core_type = #tpu.core_type<tc>, window_params = [{transform_indices = @transform_0, window_bounds = array<i64: 128, 560>}, {pipeline_mode = #tpu.pipeline_mode<synchronous>, transform_indices = @transform_1, window_bounds = array<i64: 560, 32>}, {pipeline_mode = #tpu.pipeline_mode<synchronous>, transform_indices = @transform_2, window_bounds = array<i64: 1, 32>}, {transform_indices = @transform_3, window_bounds = array<i64: 128, 32>}]} {
    %c0 = arith.constant 0 : index
    %c0_0 = arith.constant 0 : index
    %0 = vector.load %arg1[%c0, %c0_0] : memref<128x560xf32, #tpu.memory_space<vmem>>, vector<128x560xf32>
    %c0_1 = arith.constant 0 : index
    %c0_2 = arith.constant 0 : index
    %1 = vector.load %arg2[%c0_1, %c0_2] : memref<560x32xf32, #tpu.memory_space<vmem>>, vector<560x32xf32>
    %cst = arith.constant dense<0.000000e+00> : vector<128x32xf32>
    %2 = tpu.matmul %0, %1, %cst {dimension_numbers = #tpu.dot_dimension_numbers<[1], [0], [0], [1], [0, 0, 1, 1], [], []>} : vector<128x560xf32>, vector<560x32xf32>, vector<128x32xf32> -> vector<128x32xf32>
    %c0_3 = arith.constant 0 : index
    %c0_4 = arith.constant 0 : index
    %3 = vector.load %arg3[%c0_3, %c0_4] : memref<1x32xf32, #tpu.memory_space<vmem>>, vector<1x32xf32>
    %4 = vector.broadcast %3 : vector<1x32xf32> to vector<128x32xf32>
    %5 = arith.addf %2, %4 : vector<128x32xf32>
    %cst_5 = arith.constant 0.000000e+00 : f32
    %6 = vector.broadcast %cst_5 : f32 to vector<128x32xf32>
    %7 = arith.maximumf %5, %6 : vector<128x32xf32>
    %c0_6 = arith.constant 0 : index
    %c0_7 = arith.constant 0 : index
    %8 = vector.load %arg4[%c0_6, %c0_7] : memref<128x32xf32, #tpu.memory_space<vmem>>, vector<128x32xf32>
    tpu.vector_store %arg4[%c0_6, %c0_7], %7 {strides = array<i32>} : memref<128x32xf32, #tpu.memory_space<vmem>>, vector<128x32xf32>,
    return
  }
  func.func @transform_0(%arg0: i32) -> (i32, i32) {
    %c0_i32 = arith.constant 0 : i32
    %c0_i32_0 = arith.constant 0 : i32
    return %arg0, %c0_i32 : i32, i32
  }
  func.func @transform_1(%arg0: i32) -> (i32, i32) {
    %c0_i32 = arith.constant 0 : i32
    %c0_i32_0 = arith.constant 0 : i32
    %c0_i32_1 = arith.constant 0 : i32
    return %c0_i32, %c0_i32_0 : i32, i32
  }
  func.func @transform_2(%arg0: i32) -> (i32, i32) {
    %c0_i32 = arith.constant 0 : i32
    %c0_i32_0 = arith.constant 0 : i32
    %c0_i32_1 = arith.constant 0 : i32
    return %c0_i32, %c0_i32_0 : i32, i32
  }
  func.func @transform_3(%arg0: i32) -> (i32, i32) {
    %c0_i32 = arith.constant 0 : i32
    %c0_i32_0 = arith.constant 0 : i32
    return %arg0, %c0_i32 : i32, i32
  }
}

module attributes {stable_mosaic.version = 11 : i64} {
  func.func @_matmul_bias_relu_kernel(%arg0: i32, %arg1: memref<80x512xf32, #tpu.memory_space<vmem>>, %arg2: memref<512x64xf32, #tpu.memory_space<vmem>>, %arg3: memref<1x64xf32, #tpu.memory_space<vmem>>, %arg4: memref<80x64xf32, #tpu.memory_space<vmem>>) attributes {dimension_semantics = [#tpu.dimension_semantics<parallel>], iteration_bounds = array<i64: 2>, scalar_prefetch = 0 : i64, scratch_operands = 0 : i64, tpu.core_type = #tpu.core_type<tc>, window_params = [{transform_indices = @transform_0, window_bounds = array<i64: 80, 512>}, {pipeline_mode = #tpu.pipeline_mode<synchronous>, transform_indices = @transform_1, window_bounds = array<i64: 512, 64>}, {pipeline_mode = #tpu.pipeline_mode<synchronous>, transform_indices = @transform_2, window_bounds = array<i64: 1, 64>}, {transform_indices = @transform_3, window_bounds = array<i64: 80, 64>}]} {
    %c0 = arith.constant 0 : index
    %c0_0 = arith.constant 0 : index
    %0 = vector.load %arg1[%c0, %c0_0] : memref<80x512xf32, #tpu.memory_space<vmem>>, vector<80x512xf32>
    %c0_1 = arith.constant 0 : index
    %c0_2 = arith.constant 0 : index
    %1 = vector.load %arg2[%c0_1, %c0_2] : memref<512x64xf32, #tpu.memory_space<vmem>>, vector<512x64xf32>
    %cst = arith.constant dense<0.000000e+00> : vector<80x64xf32>
    %2 = tpu.matmul %0, %1, %cst {dimension_numbers = #tpu.dot_dimension_numbers<[1], [0], [0], [1], [0, 0, 1, 1], [], []>} : vector<80x512xf32>, vector<512x64xf32>, vector<80x64xf32> -> vector<80x64xf32>
    %c0_3 = arith.constant 0 : index
    %c0_4 = arith.constant 0 : index
    %3 = vector.load %arg3[%c0_3, %c0_4] : memref<1x64xf32, #tpu.memory_space<vmem>>, vector<1x64xf32>
    %4 = vector.broadcast %3 : vector<1x64xf32> to vector<80x64xf32>
    %5 = arith.addf %2, %4 : vector<80x64xf32>
    %cst_5 = arith.constant 0.000000e+00 : f32
    %6 = vector.broadcast %cst_5 : f32 to vector<80x64xf32>
    %7 = arith.maximumf %5, %6 : vector<80x64xf32>
    %c0_6 = arith.constant 0 : index
    %c0_7 = arith.constant 0 : index
    %8 = vector.load %arg4[%c0_6, %c0_7] : memref<80x64xf32, #tpu.memory_space<vmem>>, vector<80x64xf32>
    tpu.vector_store %arg4[%c0_6, %c0_7], %7 {strides = array<i32>} : memref<80x64xf32, #tpu.memory_space<vmem>>, vector<80x64xf32>,
    return
  }
  func.func @transform_0(%arg0: i32) -> (i32, i32) {
    %c0_i32 = arith.constant 0 : i32
    %c0_i32_0 = arith.constant 0 : i32
    return %arg0, %c0_i32 : i32, i32
  }
  func.func @transform_1(%arg0: i32) -> (i32, i32) {
    %c0_i32 = arith.constant 0 : i32
    %c0_i32_0 = arith.constant 0 : i32
    %c0_i32_1 = arith.constant 0 : i32
    return %c0_i32, %c0_i32_0 : i32, i32
  }
  func.func @transform_2(%arg0: i32) -> (i32, i32) {
    %c0_i32 = arith.constant 0 : i32
    %c0_i32_0 = arith.constant 0 : i32
    %c0_i32_1 = arith.constant 0 : i32
    return %c0_i32, %c0_i32_0 : i32, i32
  }
  func.func @transform_3(%arg0: i32) -> (i32, i32) {
    %c0_i32 = arith.constant 0 : i32
    %c0_i32_0 = arith.constant 0 : i32
    return %arg0, %c0_i32 : i32, i32
  }
}

module attributes {stable_mosaic.version = 11 : i64} {
  func.func @_matmul_bias_relu_kernel(%arg0: i32, %arg1: memref<80x576xf32, #tpu.memory_space<vmem>>, %arg2: memref<576x64xf32, #tpu.memory_space<vmem>>, %arg3: memref<1x64xf32, #tpu.memory_space<vmem>>, %arg4: memref<80x64xf32, #tpu.memory_space<vmem>>) attributes {dimension_semantics = [#tpu.dimension_semantics<parallel>], iteration_bounds = array<i64: 2>, scalar_prefetch = 0 : i64, scratch_operands = 0 : i64, tpu.core_type = #tpu.core_type<tc>, window_params = [{transform_indices = @transform_0, window_bounds = array<i64: 80, 576>}, {pipeline_mode = #tpu.pipeline_mode<synchronous>, transform_indices = @transform_1, window_bounds = array<i64: 576, 64>}, {pipeline_mode = #tpu.pipeline_mode<synchronous>, transform_indices = @transform_2, window_bounds = array<i64: 1, 64>}, {transform_indices = @transform_3, window_bounds = array<i64: 80, 64>}]} {
    %c0 = arith.constant 0 : index
    %c0_0 = arith.constant 0 : index
    %0 = vector.load %arg1[%c0, %c0_0] : memref<80x576xf32, #tpu.memory_space<vmem>>, vector<80x576xf32>
    %c0_1 = arith.constant 0 : index
    %c0_2 = arith.constant 0 : index
    %1 = vector.load %arg2[%c0_1, %c0_2] : memref<576x64xf32, #tpu.memory_space<vmem>>, vector<576x64xf32>
    %cst = arith.constant dense<0.000000e+00> : vector<80x64xf32>
    %2 = tpu.matmul %0, %1, %cst {dimension_numbers = #tpu.dot_dimension_numbers<[1], [0], [0], [1], [0, 0, 1, 1], [], []>} : vector<80x576xf32>, vector<576x64xf32>, vector<80x64xf32> -> vector<80x64xf32>
    %c0_3 = arith.constant 0 : index
    %c0_4 = arith.constant 0 : index
    %3 = vector.load %arg3[%c0_3, %c0_4] : memref<1x64xf32, #tpu.memory_space<vmem>>, vector<1x64xf32>
    %4 = vector.broadcast %3 : vector<1x64xf32> to vector<80x64xf32>
    %5 = arith.addf %2, %4 : vector<80x64xf32>
    %cst_5 = arith.constant 0.000000e+00 : f32
    %6 = vector.broadcast %cst_5 : f32 to vector<80x64xf32>
    %7 = arith.maximumf %5, %6 : vector<80x64xf32>
    %c0_6 = arith.constant 0 : index
    %c0_7 = arith.constant 0 : index
    %8 = vector.load %arg4[%c0_6, %c0_7] : memref<80x64xf32, #tpu.memory_space<vmem>>, vector<80x64xf32>
    tpu.vector_store %arg4[%c0_6, %c0_7], %7 {strides = array<i32>} : memref<80x64xf32, #tpu.memory_space<vmem>>, vector<80x64xf32>,
    return
  }
  func.func @transform_0(%arg0: i32) -> (i32, i32) {
    %c0_i32 = arith.constant 0 : i32
    %c0_i32_0 = arith.constant 0 : i32
    return %arg0, %c0_i32 : i32, i32
  }
  func.func @transform_1(%arg0: i32) -> (i32, i32) {
    %c0_i32 = arith.constant 0 : i32
    %c0_i32_0 = arith.constant 0 : i32
    %c0_i32_1 = arith.constant 0 : i32
    return %c0_i32, %c0_i32_0 : i32, i32
  }
  func.func @transform_2(%arg0: i32) -> (i32, i32) {
    %c0_i32 = arith.constant 0 : i32
    %c0_i32_0 = arith.constant 0 : i32
    %c0_i32_1 = arith.constant 0 : i32
    return %c0_i32, %c0_i32_0 : i32, i32
  }
  func.func @transform_3(%arg0: i32) -> (i32, i32) {
    %c0_i32 = arith.constant 0 : i32
    %c0_i32_0 = arith.constant 0 : i32
    return %arg0, %c0_i32 : i32, i32
  }
}

module attributes {stable_mosaic.version = 11 : i64} {
  func.func @_head_kernel(%arg0: i32, %arg1: memref<2x1024xf32, #tpu.memory_space<vmem>>, %arg2: memref<1024x512xbf16, #tpu.memory_space<vmem>>, %arg3: memref<1x512xf32, #tpu.memory_space<vmem>>, %arg4: memref<2x24xf32, #tpu.memory_space<vmem>>, %arg5: memref<24x192xf32, #tpu.memory_space<vmem>>, %arg6: memref<1x192xf32, #tpu.memory_space<vmem>>, %arg7: memref<512x512xbf16, #tpu.memory_space<vmem>>, %arg8: memref<192x512xbf16, #tpu.memory_space<vmem>>, %arg9: memref<1x512xf32, #tpu.memory_space<vmem>>, %arg10: memref<512x128xf32, #tpu.memory_space<vmem>>, %arg11: memref<1x128xf32, #tpu.memory_space<vmem>>, %arg12: memref<2x128xf32, #tpu.memory_space<vmem>>, %arg13: memref<2x512xf32, #tpu.memory_space<vmem>>) attributes {dimension_semantics = [#tpu.dimension_semantics<arbitrary>], iteration_bounds = array<i64: 5>, scalar_prefetch = 0 : i64, scratch_operands = 1 : i64, tpu.core_type = #tpu.core_type<tc>, window_params = [{transform_indices = @transform_0, window_bounds = array<i64: 2, 1024>}, {transform_indices = @transform_1, window_bounds = array<i64: 1024, 512>}, {pipeline_mode = #tpu.pipeline_mode<synchronous>, transform_indices = @transform_2, window_bounds = array<i64: 1, 512>}, {pipeline_mode = #tpu.pipeline_mode<synchronous>, transform_indices = @transform_3, window_bounds = array<i64: 2, 24>}, {pipeline_mode = #tpu.pipeline_mode<synchronous>, transform_indices = @transform_4, window_bounds = array<i64: 24, 192>}, {pipeline_mode = #tpu.pipeline_mode<synchronous>, transform_indices = @transform_5, window_bounds = array<i64: 1, 192>}, {pipeline_mode = #tpu.pipeline_mode<synchronous>, transform_indices = @transform_6, window_bounds = array<i64: 512, 512>}, {pipeline_mode = #tpu.pipeline_mode<synchronous>, transform_indices = @transform_7, window_bounds = array<i64: 192, 512>}, {pipeline_mode = #tpu.pipeline_mode<synchronous>, transform_indices = @transform_8, window_bounds = array<i64: 1, 512>}, {pipeline_mode = #tpu.pipeline_mode<synchronous>, transform_indices = @transform_9, window_bounds = array<i64: 512, 128>}, {pipeline_mode = #tpu.pipeline_mode<synchronous>, transform_indices = @transform_10, window_bounds = array<i64: 1, 128>}, {pipeline_mode = #tpu.pipeline_mode<synchronous>, transform_indices = @transform_11, window_bounds = array<i64: 2, 128>}]} {
    %c0_i32 = arith.constant 0 : i32
    %0 = arith.cmpi eq, %arg0, %c0_i32 : i32
    %1 = arith.extui %0 : i1 to i32
    %c0_i32_0 = arith.constant 0 : i32
    %2 = arith.cmpi ne, %1, %c0_i32_0 : i32
    scf.if %2 {
      %cst_9 = arith.constant 0.000000e+00 : f32
      %13 = vector.broadcast %cst_9 : f32 to vector<2x512xf32>
      %c0_10 = arith.constant 0 : index
      %c0_11 = arith.constant 0 : index
      %14 = vector.load %arg13[%c0_10, %c0_11] : memref<2x512xf32, #tpu.memory_space<vmem>>, vector<2x512xf32>
      tpu.vector_store %arg13[%c0_10, %c0_11], %13 {strides = array<i32>} : memref<2x512xf32, #tpu.memory_space<vmem>>, vector<2x512xf32>,
    } else {
    }
    %c0 = arith.constant 0 : index
    %c0_1 = arith.constant 0 : index
    %3 = vector.load %arg13[%c0, %c0_1] : memref<2x512xf32, #tpu.memory_space<vmem>>, vector<2x512xf32>
    %c0_2 = arith.constant 0 : index
    %c0_3 = arith.constant 0 : index
    %4 = vector.load %arg1[%c0_2, %c0_3] : memref<2x1024xf32, #tpu.memory_space<vmem>>, vector<2x1024xf32>
    %5 = arith.truncf %4 : vector<2x1024xf32> to vector<2x1024xbf16>
    %c0_4 = arith.constant 0 : index
    %c0_5 = arith.constant 0 : index
    %6 = vector.load %arg2[%c0_4, %c0_5] : memref<1024x512xbf16, #tpu.memory_space<vmem>>, vector<1024x512xbf16>
    %cst = arith.constant dense<0.000000e+00> : vector<2x512xf32>
    %7 = tpu.matmul %5, %6, %cst {dimension_numbers = #tpu.dot_dimension_numbers<[1], [0], [0], [1], [0, 0, 1, 1], [], []>} : vector<2x1024xbf16>, vector<1024x512xbf16>, vector<2x512xf32> -> vector<2x512xf32>
    %8 = arith.addf %3, %7 : vector<2x512xf32>
    %c0_6 = arith.constant 0 : index
    %c0_7 = arith.constant 0 : index
    %9 = vector.load %arg13[%c0_6, %c0_7] : memref<2x512xf32, #tpu.memory_space<vmem>>, vector<2x512xf32>
    tpu.vector_store %arg13[%c0_6, %c0_7], %8 {strides = array<i32>} : memref<2x512xf32, #tpu.memory_space<vmem>>, vector<2x512xf32>,
    %c4_i32 = arith.constant 4 : i32
    %10 = arith.cmpi eq, %arg0, %c4_i32 : i32
    %11 = arith.extui %10 : i1 to i32
    %c0_i32_8 = arith.constant 0 : i32
    %12 = arith.cmpi ne, %11, %c0_i32_8 : i32
    scf.if %12 {
      %c0_9 = arith.constant 0 : index
      %c0_10 = arith.constant 0 : index
      %13 = vector.load %arg13[%c0_9, %c0_10] : memref<2x512xf32, #tpu.memory_space<vmem>>, vector<2x512xf32>
      %c0_11 = arith.constant 0 : index
      %c0_12 = arith.constant 0 : index
      %14 = vector.load %arg3[%c0_11, %c0_12] : memref<1x512xf32, #tpu.memory_space<vmem>>, vector<1x512xf32>
      %15 = vector.broadcast %14 : vector<1x512xf32> to vector<2x512xf32>
      %16 = arith.addf %13, %15 : vector<2x512xf32>
      %cst_13 = arith.constant 0.000000e+00 : f32
      %17 = vector.broadcast %cst_13 : f32 to vector<2x512xf32>
      %18 = arith.maximumf %16, %17 : vector<2x512xf32>
      %c0_14 = arith.constant 0 : index
      %c0_15 = arith.constant 0 : index
      %19 = vector.load %arg4[%c0_14, %c0_15] : memref<2x24xf32, #tpu.memory_space<vmem>>, vector<2x24xf32>
      %c0_16 = arith.constant 0 : index
      %c0_17 = arith.constant 0 : index
      %20 = vector.load %arg5[%c0_16, %c0_17] : memref<24x192xf32, #tpu.memory_space<vmem>>, vector<24x192xf32>
      %cst_18 = arith.constant dense<0.000000e+00> : vector<2x192xf32>
      %21 = tpu.matmul %19, %20, %cst_18 {dimension_numbers = #tpu.dot_dimension_numbers<[1], [0], [0], [1], [0, 0, 1, 1], [], []>} : vector<2x24xf32>, vector<24x192xf32>, vector<2x192xf32> -> vector<2x192xf32>
      %c0_19 = arith.constant 0 : index
      %c0_20 = arith.constant 0 : index
      %22 = vector.load %arg6[%c0_19, %c0_20] : memref<1x192xf32, #tpu.memory_space<vmem>>, vector<1x192xf32>
      %23 = vector.broadcast %22 : vector<1x192xf32> to vector<2x192xf32>
      %24 = arith.addf %21, %23 : vector<2x192xf32>
      %cst_21 = arith.constant 0.000000e+00 : f32
      %25 = vector.broadcast %cst_21 : f32 to vector<2x192xf32>
      %26 = arith.maximumf %24, %25 : vector<2x192xf32>
      %27 = arith.truncf %18 : vector<2x512xf32> to vector<2x512xbf16>
      %c0_22 = arith.constant 0 : index
      %c0_23 = arith.constant 0 : index
      %28 = vector.load %arg7[%c0_22, %c0_23] : memref<512x512xbf16, #tpu.memory_space<vmem>>, vector<512x512xbf16>
      %cst_24 = arith.constant dense<0.000000e+00> : vector<2x512xf32>
      %29 = tpu.matmul %27, %28, %cst_24 {dimension_numbers = #tpu.dot_dimension_numbers<[1], [0], [0], [1], [0, 0, 1, 1], [], []>} : vector<2x512xbf16>, vector<512x512xbf16>, vector<2x512xf32> -> vector<2x512xf32>
      %30 = arith.truncf %26 : vector<2x192xf32> to vector<2x192xbf16>
      %c0_25 = arith.constant 0 : index
      %c0_26 = arith.constant 0 : index
      %31 = vector.load %arg8[%c0_25, %c0_26] : memref<192x512xbf16, #tpu.memory_space<vmem>>, vector<192x512xbf16>
      %cst_27 = arith.constant dense<0.000000e+00> : vector<2x512xf32>
      %32 = tpu.matmul %30, %31, %cst_27 {dimension_numbers = #tpu.dot_dimension_numbers<[1], [0], [0], [1], [0, 0, 1, 1], [], []>} : vector<2x192xbf16>, vector<192x512xbf16>, vector<2x512xf32> -> vector<2x512xf32>
      %33 = arith.addf %29, %32 : vector<2x512xf32>
      %c0_28 = arith.constant 0 : index
      %c0_29 = arith.constant 0 : index
      %34 = vector.load %arg9[%c0_28, %c0_29] : memref<1x512xf32, #tpu.memory_space<vmem>>, vector<1x512xf32>
      %35 = vector.broadcast %34 : vector<1x512xf32> to vector<2x512xf32>
      %36 = arith.addf %33, %35 : vector<2x512xf32>
      %cst_30 = arith.constant 0.000000e+00 : f32
      %37 = vector.broadcast %cst_30 : f32 to vector<2x512xf32>
      %38 = arith.maximumf %36, %37 : vector<2x512xf32>
      %c0_31 = arith.constant 0 : index
      %c0_32 = arith.constant 0 : index
      %39 = vector.load %arg10[%c0_31, %c0_32] : memref<512x128xf32, #tpu.memory_space<vmem>>, vector<512x128xf32>
      %cst_33 = arith.constant dense<0.000000e+00> : vector<2x128xf32>
      %40 = tpu.matmul %38, %39, %cst_33 {dimension_numbers = #tpu.dot_dimension_numbers<[1], [0], [0], [1], [0, 0, 1, 1], [], []>} : vector<2x512xf32>, vector<512x128xf32>, vector<2x128xf32> -> vector<2x128xf32>
      %c0_34 = arith.constant 0 : index
      %c0_35 = arith.constant 0 : index
      %41 = vector.load %arg11[%c0_34, %c0_35] : memref<1x128xf32, #tpu.memory_space<vmem>>, vector<1x128xf32>
      %42 = vector.broadcast %41 : vector<1x128xf32> to vector<2x128xf32>
      %43 = arith.addf %40, %42 : vector<2x128xf32>
      %44 = math.tanh %43 : vector<2x128xf32>
      %c0_36 = arith.constant 0 : index
      %c0_37 = arith.constant 0 : index
      %45 = vector.load %arg12[%c0_36, %c0_37] : memref<2x128xf32, #tpu.memory_space<vmem>>, vector<2x128xf32>
      tpu.vector_store %arg12[%c0_36, %c0_37], %44 {strides = array<i32>} : memref<2x128xf32, #tpu.memory_space<vmem>>, vector<2x128xf32>,
    } else {
    }
    return
  }
  func.func @transform_0(%arg0: i32) -> (i32, i32) {
    %c0_i32 = arith.constant 0 : i32
    %c0_i32_0 = arith.constant 0 : i32
    return %c0_i32, %arg0 : i32, i32
  }
  func.func @transform_1(%arg0: i32) -> (i32, i32) {
    %c0_i32 = arith.constant 0 : i32
    %c0_i32_0 = arith.constant 0 : i32
    return %arg0, %c0_i32 : i32, i32
  }
  func.func @transform_2(%arg0: i32) -> (i32, i32) {
    %c0_i32 = arith.constant 0 : i32
    %c0_i32_0 = arith.constant 0 : i32
    %c0_i32_1 = arith.constant 0 : i32
    return %c0_i32, %c0_i32_0 : i32, i32
  }
  func.func @transform_3(%arg0: i32) -> (i32, i32) {
    %c0_i32 = arith.constant 0 : i32
    %c0_i32_0 = arith.constant 0 : i32
    %c0_i32_1 = arith.constant 0 : i32
    return %c0_i32, %c0_i32_0 : i32, i32
  }
  func.func @transform_4(%arg0: i32) -> (i32, i32) {
    %c0_i32 = arith.constant 0 : i32
    %c0_i32_0 = arith.constant 0 : i32
    %c0_i32_1 = arith.constant 0 : i32
    return %c0_i32, %c0_i32_0 : i32, i32
  }
  func.func @transform_5(%arg0: i32) -> (i32, i32) {
    %c0_i32 = arith.constant 0 : i32
    %c0_i32_0 = arith.constant 0 : i32
    %c0_i32_1 = arith.constant 0 : i32
    return %c0_i32, %c0_i32_0 : i32, i32
  }
  func.func @transform_6(%arg0: i32) -> (i32, i32) {
    %c0_i32 = arith.constant 0 : i32
    %c0_i32_0 = arith.constant 0 : i32
    %c0_i32_1 = arith.constant 0 : i32
    return %c0_i32, %c0_i32_0 : i32, i32
  }
  func.func @transform_7(%arg0: i32) -> (i32, i32) {
    %c0_i32 = arith.constant 0 : i32
    %c0_i32_0 = arith.constant 0 : i32
    %c0_i32_1 = arith.constant 0 : i32
    return %c0_i32, %c0_i32_0 : i32, i32
  }
  func.func @transform_8(%arg0: i32) -> (i32, i32) {
    %c0_i32 = arith.constant 0 : i32
    %c0_i32_0 = arith.constant 0 : i32
    %c0_i32_1 = arith.constant 0 : i32
    return %c0_i32, %c0_i32_0 : i32, i32
  }
  func.func @transform_9(%arg0: i32) -> (i32, i32) {
    %c0_i32 = arith.constant 0 : i32
    %c0_i32_0 = arith.constant 0 : i32
    %c0_i32_1 = arith.constant 0 : i32
    return %c0_i32, %c0_i32_0 : i32, i32
  }
  func.func @transform_10(%arg0: i32) -> (i32, i32) {
    %c0_i32 = arith.constant 0 : i32
    %c0_i32_0 = arith.constant 0 : i32
    %c0_i32_1 = arith.constant 0 : i32
    return %c0_i32, %c0_i32_0 : i32, i32
  }
  func.func @transform_11(%arg0: i32) -> (i32, i32) {
    %c0_i32 = arith.constant 0 : i32
    %c0_i32_0 = arith.constant 0 : i32
    %c0_i32_1 = arith.constant 0 : i32
    return %c0_i32, %c0_i32_0 : i32, i32
  }
}

</mosaic_0001>

<bundles_post_ra>
// kernel: policy_forward.4
= control target key start
LH: loop header
LB: loop body
LE: loop exit
PB: predicated region body
PF: predicated region fallthrough
CT: control target
= control target key end

     0   :  { %s1272_s12 = smov 0   ;;  %s1698_s0 = inlined_call_operand.vmem [shape: f32[640,560], index: 0, kind: input, shape index: {}]   ;;  %s1699_s1 = inlined_call_operand.vmem [shape: f32[560,32], index: 1, kind: input, shape index: {}]   ;;  %s1700_s2 = inlined_call_operand.vmem [shape: f32[1,32], index: 2, kind: input, shape index: {}]   ;;  %s1701_s3 = inlined_call_operand.vmem [shape: f32[640,32], index: 3, kind: output, shape index: {}]  }
   0x1 LB: > { %s907_s13 = sadd.s32 4294967295, %s1250_s12   ;;  %p911_p0 = scmp.ge.s32.totalorder %s1250_s12, 1  ;;  %s1250_s12 = sphi %s1272_s12, %s13_s12  }
   0x2   : > { %p139_p1 = scmp.lt.s32.totalorder %s1250_s12, 6 }
   0x4   : > { %p140_p2 = pnand %p911_p0, %p139_p1 }
   0x5   : > { %v273_v0 = vld [vmem:[%s1699_s1 + $0x80] sm:$0xff] (!%p140_p2)  ;;  %v274_v1 = vld [vmem:[%s1699_s1 + $0x88] sm:$0xff] (!%p140_p2)  ;;  %v275_v11 = vld [vmem:[%s1699_s1 + $0x90] sm:$0xff] (!%p140_p2)  ;;  %s1316_s11 = sshll.u32 (!%p140_p2), %s907_s13, 4  ;;  %vm334_vm0 = vcmask (!%p140_p2), 392192   ;;  %vm834_vm1 = vcmask (!%p140_p2), 261120  }
   0x6   : > { %143 = sbr.rel (%p140_p2) target bundleno = 336 (0x150), region = 32  ;;  %v305_v2 = vld [vmem:[%s1699_s1 + $0x180] sm:$0xff] (!%p140_p2)  ;;  %v1153_v3 = vpack.c.bf16 (!%p140_p2), %v274_v1, %v273_v0  ;;  %v306_v4 = vld [vmem:[%s1699_s1 + $0x188] sm:$0xff] (!%p140_p2)  ;;  %v276_v13 = vld [vmem:[%s1699_s1 + $0x98] sm:$0xff] (!%p140_p2)  ;;  %p165_p3 = scmp.lt.s32.totalorder (!%p140_p2), %s1316_s11, 79 }
   0x7   : > { %v257_v5 = vld [vmem:[%s1699_s1] sm:$0xff] (!%p140_p2)  ;;  %v258_v6 = vld [vmem:[%s1699_s1 + $0x8] sm:$0xff] (!%p140_p2)  ;;  %v1185_v7 = vpack.c.bf16 (!%p140_p2), %v306_v4, %v305_v2  ;;  %v307_v14 = vld [vmem:[%s1699_s1 + $0x190] sm:$0xff] (!%p140_p2)  ;;  %v1157_v16 = vpack.c.bf16 (!%p140_p2), %v276_v13, %v275_v11 }
   0x8   : > { %v1155_v8 = vpack.c.bf16 (!%p140_p2), %v258_v6, %v257_v5  ;;  %v289_v9 = vld [vmem:[%s1699_s1 + $0x100] sm:$0xff] (!%p140_p2)  ;;  %v290_v10 = vld [vmem:[%s1699_s1 + $0x108] sm:$0xff] (!%p140_p2)  ;;  %1154 = vmatprep.subr.bf16.mxu0 (!%p140_p2), %v1153_v3  ;;  %v308_v15 = vld [vmem:[%s1699_s1 + $0x198] sm:$0xff] (!%p140_p2) }
   0x9   : > { %v1187_v12 = vpack.c.bf16 (!%p140_p2), %v290_v10, %v289_v9  ;;  %1186 = vmatprep.subr.bf16.mxu1 (!%p140_p2), %v1185_v7  ;;  %v1189_v17 = vpack.c.bf16 (!%p140_p2), %v308_v15, %v307_v14  ;;  %v259_v18 = vld [vmem:[%s1699_s1 + $0x10] sm:$0xff] (!%p140_p2)  ;;  %v260_v19 = vld [vmem:[%s1699_s1 + $0x18] sm:$0xff] (!%p140_p2)  ;;  %v277_v23 = vld [vmem:[%s1699_s1 + $0xa0] sm:$0xff] (!%p140_p2) }
   0xa   : > { %1156 = vmatpush3.bf16.msra.mxu0 (!%p140_p2), %v1155_v8  ;;  %v291_v20 = vld [vmem:[%s1699_s1 + $0x110] sm:$0xff] (!%p140_p2)  ;;  %v1159_v21 = vpack.c.bf16 (!%p140_p2), %v260_v19, %v259_v18  ;;  %v292_v22 = vld [vmem:[%s1699_s1 + $0x118] sm:$0xff] (!%p140_p2)  ;;  %v278_v24 = vld [vmem:[%s1699_s1 + $0xa8] sm:$0xff] (!%p140_p2) }
   0xb   : > { %1188 = vmatpush3.bf16.msra.mxu1 (!%p140_p2), %v1187_v12  ;;  %1158 = vmatprep.subr.bf16.mxu0 (!%p140_p2), %v1157_v16  ;;  %v1191_v25 = vpack.c.bf16 (!%p140_p2), %v292_v22, %v291_v20  ;;  %v1161_v26 = vpack.c.bf16 (!%p140_p2), %v278_v24, %v277_v23  ;;  %v309_v27 = vld [vmem:[%s1699_s1 + $0x1a0] sm:$0xff] (!%p140_p2)  ;;  %v310_v28 = vld [vmem:[%s1699_s1 + $0x1a8] sm:$0xff] (!%p140_p2)  ;;  %v279_v35 = vld [vmem:[%s1699_s1 + $0xb0] sm:$0xff] (!%p140_p2) }
   0xc   : > { %1190 = vmatprep.subr.bf16.mxu1 (!%p140_p2), %v1189_v17  ;;  %v261_v29 = vld [vmem:[%s1699_s1 + $0x20] sm:$0xff] (!%p140_p2)  ;;  %v1193_v30 = vpack.c.bf16 (!%p140_p2), %v310_v28, %v309_v27  ;;  %v262_v31 = vld [vmem:[%s1699_s1 + $0x28] sm:$0xff] (!%p140_p2)  ;;  %v280_v36 = vld [vmem:[%s1699_s1 + $0xb8] sm:$0xff] (!%p140_p2) }
   0xd   : > { %v293_v32 = vld [vmem:[%s1699_s1 + $0x120] sm:$0xff]  ;;  %v294_v33 = vld [vmem:[%s1699_s1 + $0x128] sm:$0xff]  ;;  %v1163_v34 = vpack.c.bf16 %v262_v31, %v261_v29  ;;  %v311_v37 = vld [vmem:[%s1699_s1 + $0x1b0] sm:$0xff]  ;;  %v1165_v39 = vpack.c.bf16 %v280_v36, %v279_v35  ;;  %s1703_s11 = smov (!%p165_p3, %s1316_s11), 79 }
   0xe   : > { %1160 = vmatpush3.bf16.msra.mxu0 %v1159_v21  ;;  %v1195_v38 = vpack.c.bf16 %v294_v33, %v293_v32  ;;  %v312_v40 = vld [vmem:[%s1699_s1 + $0x1b8] sm:$0xff]  ;;  %v263_v41 = vld [vmem:[%s1699_s1 + $0x30] sm:$0xff]  ;;  %v281_v46 = vld [vmem:[%s1699_s1 + $0xc0] sm:$0xff]  ;;  %s1235_s23 = smul.u32 40, %s1703_s11 }
   0xf   : > { %1192 = vmatpush3.bf16.msra.mxu1 %v1191_v25  ;;  %1162 = vmatprep.subr.bf16.mxu0 %v1161_v26  ;;  %v264_v42 = vld [vmem:[%s1699_s1 + $0x38] sm:$0xff]  ;;  %v1197_v43 = vpack.c.bf16 %v312_v40, %v311_v37  ;;  %v295_v44 = vld [vmem:[%s1699_s1 + $0x130] sm:$0xff]  ;;  %v282_v47 = vld [vmem:[%s1699_s1 + $0xc8] sm:$0xff] }
  0x10   : > { %1194 = vmatprep.subr.bf16.mxu1 %v1193_v30  ;;  %v296_v45 = vld [vmem:[%s1699_s1 + $0x138] sm:$0xff]  ;;  %v313_v48 = vld [vmem:[%s1699_s1 + $0x1c0] sm:$0xff]  ;;  %v314_v49 = vld [vmem:[%s1699_s1 + $0x1c8] sm:$0xff]  ;;  %v1167_v50 = vpack.c.bf16 %v264_v42, %v263_v41  ;;  %v1169_v52 = vpack.c.bf16 %v282_v47, %v281_v46  ;;  %s1442_s18 = scalar_lea.vmem %s1698_s0, %s1235_s23 }
  0x11   : > { %v1199_v51 = vpack.c.bf16 %v296_v45, %v295_v44  ;;  %v265_v53 = vld [vmem:[%s1699_s1 + $0x40] sm:$0xff]  ;;  %v266_v54 = vld [vmem:[%s1699_s1 + $0x48] sm:$0xff]  ;;  %v1201_v56 = vpack.c.bf16 %v314_v49, %v313_v48  ;;  %v283_v58 = vld [vmem:[%s1699_s1 + $0xd0] sm:$0xff] }
  0x12   : > { %1164 = vmatpush3.bf16.msra.mxu0 %v1163_v34  ;;  %v297_v55 = vld [vmem:[%s1699_s1 + $0x140] sm:$0xff]  ;;  %v298_v57 = vld [vmem:[%s1699_s1 + $0x148] sm:$0xff]  ;;  %v284_v59 = vld [vmem:[%s1699_s1 + $0xd8] sm:$0xff]  ;;  %v1171_v62 = vpack.c.bf16 %v266_v54, %v265_v53 }
  0x13   : > { %1196 = vmatpush3.bf16.msra.mxu1 %v1195_v38  ;;  %1166 = vmatprep.subr.bf16.mxu0 %v1165_v39  ;;  %v315_v60 = vld [vmem:[%s1699_s1 + $0x1d0] sm:$0xff]  ;;  %v316_v61 = vld [vmem:[%s1699_s1 + $0x1d8] sm:$0xff]  ;;  %v1203_v63 = vpack.c.bf16 %v298_v57, %v297_v55  ;;  %v1173_v0 = vpack.c.bf16 %v284_v59, %v283_v58  ;;  %v285_v6 = vld [vmem:[%s1699_s1 + $0xe0] sm:$0xff] }
  0x14   : > { %1198 = vmatprep.subr.bf16.mxu1 %v1197_v43  ;;  %v267_v1 = vld [vmem:[%s1699_s1 + $0x50] sm:$0xff]  ;;  %v268_v2 = vld [vmem:[%s1699_s1 + $0x58] sm:$0xff]  ;;  %v1205_v4 = vpack.c.bf16 %v316_v61, %v315_v60  ;;  %v286_v7 = vld [vmem:[%s1699_s1 + $0xe8] sm:$0xff] }
  0x15   : > { %v299_v3 = vld [vmem:[%s1699_s1 + $0x150] sm:$0xff]  ;;  %v300_v5 = vld [vmem:[%s1699_s1 + $0x158] sm:$0xff]  ;;  %v317_v8 = vld [vmem:[%s1699_s1 + $0x1e0] sm:$0xff]  ;;  %v1175_v10 = vpack.c.bf16 %v268_v2, %v267_v1  ;;  %v1177_v14 = vpack.c.bf16 %v286_v7, %v285_v6 }
  0x16   : > { %1168 = vmatpush3.bf16.msra.mxu0 %v1167_v50  ;;  %v318_v9 = vld [vmem:[%s1699_s1 + $0x1e8] sm:$0xff]  ;;  %v269_v11 = vld [vmem:[%s1699_s1 + $0x60] sm:$0xff]  ;;  %v1207_v13 = vpack.c.bf16 %v300_v5, %v299_v3  ;;  %v180_v17 = vld [vmem:[%s1442_s18 + $0x18] sm:$0xff] }
  0x17   : > { %1200 = vmatpush3.bf16.msra.mxu1 %v1199_v51  ;;  %1170 = vmatprep.subr.bf16.mxu0 %v1169_v52  ;;  %v270_v12 = vld [vmem:[%s1699_s1 + $0x68] sm:$0xff]  ;;  %v301_v15 = vld [vmem:[%s1699_s1 + $0x160] sm:$0xff]  ;;  %v1209_v18 = vpack.c.bf16 %v318_v9, %v317_v8  ;;  %v287_v20 = vld [vmem:[%s1699_s1 + $0xf0] sm:$0xff] }
  0x18   : > { %1202 = vmatprep.subr.bf16.mxu1 %v1201_v56  ;;  %v178_v16 = vld [vmem:[%s1442_s18 + $0x8] sm:$0xff]  ;;  %v288_v21 = vld [vmem:[%s1699_s1 + $0xf8] sm:$0xff]  ;;  %v319_v22 = vld [vmem:[%s1699_s1 + $0x1f0] sm:$0xff]  ;;  %592 = vmatprep.mubr.f32.mxu1 %v180_v17  ;;  %v1179_v24 = vpack.c.bf16 %v270_v12, %v269_v11 }
  0x19   : > { %v302_v19 = vld [vmem:[%s1699_s1 + $0x168] sm:$0xff]  ;;  %447 = vmatprep.mubr.f32.mxu0 %v178_v16  ;;  %v320_v23 = vld [vmem:[%s1699_s1 + $0x1f8] sm:$0xff]  ;;  %v1181_v26 = vpack.c.bf16 %v288_v21, %v287_v20  ;;  %v271_v27 = vld [vmem:[%s1699_s1 + $0x70] sm:$0xff] }
  0x1a   : > { %1172 = vmatpush3.bf16.msra.mxu0 %v1171_v62  ;;  %v1211_v25 = vpack.c.bf16 %v302_v19, %v301_v15  ;;  %v272_v28 = vld [vmem:[%s1699_s1 + $0x78] sm:$0xff]  ;;  %v303_v29 = vld [vmem:[%s1699_s1 + $0x170] sm:$0xff]  ;;  %v1213_v30 = vpack.c.bf16 %v320_v23, %v319_v22  ;;  %v321_v32 = vld [vmem:[%s1699_s1 + $0x200] sm:$0xff] }
  0x1b   : > { %1204 = vmatpush3.bf16.msra.mxu1 %v1203_v63  ;;  %1174 = vmatprep.subr.bf16.mxu0 %v1173_v0  ;;  %v304_v31 = vld [vmem:[%s1699_s1 + $0x178] sm:$0xff]  ;;  %v322_v33 = vld [vmem:[%s1699_s1 + $0x208] sm:$0xff]  ;;  %v1183_v34 = vpack.c.bf16 %v272_v28, %v271_v27  ;;  %v323_v37 = vld [vmem:[%s1699_s1 + $0x210] sm:$0xff] }
  0x1c   : > { %1206 = vmatprep.subr.bf16.mxu1 %v1205_v4  ;;  %v1215_v35 = vpack.c.bf16 %v304_v31, %v303_v29  ;;  %v1217_v36 = vpack.c.bf16 %v322_v33, %v321_v32  ;;  %v324_v38 = vld [vmem:[%s1699_s1 + $0x218] sm:$0xff]  ;;  %v177_v39 = vld [vmem:[%s1442_s18] sm:$0xff]  ;;  %v179_v40 = vld [vmem:[%s1442_s18 + $0x10] sm:$0xff] }
  0x1d   : > { %v183_v41 = vld [vmem:[%s1442_s18 + $0x30] sm:$0xff]  ;;  %v1221_v42 = vpack.c.bf16 %v324_v38, %v323_v37  ;;  %v185_v43 = vld [vmem:[%s1442_s18 + $0x40] sm:$0xff]  ;;  %v182_v44 = vld [vmem:[%s1442_s18 + $0x28] sm:$0xff] }
  0x1e   : > { %1176 = vmatpush3.bf16.msra.mxu0 %v1175_v10  ;;  %v184_v45 = vld [vmem:[%s1442_s18 + $0x38] sm:$0xff]  ;;  %v190_v47 = vld [vmem:[%s1442_s18 + $0x68] sm:$0xff]  ;;  %v325_v48 = vld [vmem:[%s1699_s1 + $0x220] sm:$0xff] }
  0x1f   : > { %1208 = vmatpush3.bf16.msra.mxu1 %v1207_v13  ;;  %1178 = vmatprep.subr.bf16.mxu0 %v1177_v14  ;;  %v188_v46 = vld [vmem:[%s1442_s18 + $0x58] sm:$0xff]  ;;  %v326_v49 = vld [vmem:[%s1699_s1 + $0x228] sm:$0xff]  ;;  %v187_v51 = vld [vmem:[%s1442_s18 + $0x50] sm:$0xff] }
  0x20   : > { %1210 = vmatprep.subr.bf16.mxu1 %v1209_v18  ;;  %v1225_v50 = vpack.c.bf16 %v326_v49, %v325_v48  ;;  %v189_v52 = vld [vmem:[%s1442_s18 + $0x60] sm:$0xff]  ;;  %v195_v54 = vld [vmem:[%s1442_s18 + $0x90] sm:$0xff]  ;;  %v192_v55 = vld [vmem:[%s1442_s18 + $0x78] sm:$0xff] }
  0x21   : > { %v193_v53 = vld [vmem:[%s1442_s18 + $0x80] sm:$0xff]  ;;  %v194_v56 = vld [vmem:[%s1442_s18 + $0x88] sm:$0xff]  ;;  %v200_v58 = vld [vmem:[%s1442_s18 + $0xb8] sm:$0xff] }
  0x22   : > { %1180 = vmatpush3.bf16.msra.mxu0 %v1179_v24  ;;  %v198_v57 = vld [vmem:[%s1442_s18 + $0xa8] sm:$0xff]  ;;  %v197_v59 = vld [vmem:[%s1442_s18 + $0xa0] sm:$0xff]  ;;  %v199_v60 = vld [vmem:[%s1442_s18 + $0xb0] sm:$0xff] }
  0x23   : > { %1212 = vmatpush3.bf16.msra.mxu1 %v1211_v25  ;;  %1182 = vmatprep.subr.bf16.mxu0 %v1181_v26  ;;  %v203_v61 = vld [vmem:[%s1442_s18 + $0xd0] sm:$0xff]  ;;  %v205_v62 = vld [vmem:[%s1442_s18 + $0xe0] sm:$0xff]  ;;  %v202_v63 = vld [vmem:[%s1442_s18 + $0xc8] sm:$0xff] }
  0x24   : > { %1214 = vmatprep.subr.bf16.mxu1 %v1213_v30  ;;  %v204_v0 = vld [vmem:[%s1442_s18 + $0xd8] sm:$0xff]  ;;  %v210_v2 = vld [vmem:[%s1442_s18 + $0x108] sm:$0xff]  ;;  %v207_v3 = vld [vmem:[%s1442_s18 + $0xf0] sm:$0xff] }
  0x25   : > { %v208_v1 = vld [vmem:[%s1442_s18 + $0xf8] sm:$0xff]  ;;  %v209_v4 = vld [vmem:[%s1442_s18 + $0x100] sm:$0xff]  ;;  %v215_v6 = vld [vmem:[%s1442_s18 + $0x130] sm:$0xff] }
  0x26   : > { %1184 = vmatpush3.bf16.msra.mxu0 %v1183_v34  ;;  %v213_v5 = vld [vmem:[%s1442_s18 + $0x120] sm:$0xff]  ;;  %v212_v7 = vld [vmem:[%s1442_s18 + $0x118] sm:$0xff]  ;;  %v214_v8 = vld [vmem:[%s1442_s18 + $0x128] sm:$0xff] }
  0x27   : > { %1216 = vmatpush3.bf16.msra.mxu1 %v1215_v35  ;;  %1218 = vmatprep.subr.bf16.mxu0 %v1217_v36  ;;  %v218_v9 = vld [vmem:[%s1442_s18 + $0x148] sm:$0xff]  ;;  %v220_v10 = vld [vmem:[%s1442_s18 + $0x158] sm:$0xff]  ;;  %v217_v11 = vld [vmem:[%s1442_s18 + $0x140] sm:$0xff] }
  0x28   : > { %1229 = vmatprep.subr.bf16.mxu1 %v1217_v36  ;;  %v219_v12 = vld [vmem:[%s1442_s18 + $0x150] sm:$0xff]  ;;  %v225_v14 = vld [vmem:[%s1442_s18 + $0x180] sm:$0xff]  ;;  %v222_v15 = vld [vmem:[%s1442_s18 + $0x168] sm:$0xff] }
  0x29   : > { %448 = vmatmul.mubr.f32.vlgmr.msra.gmra.mrb[0].mxu0 %v177_v39  ;;  %v223_v13 = vld [vmem:[%s1442_s18 + $0x170] sm:$0xff]  ;;  %v224_v16 = vld [vmem:[%s1442_s18 + $0x178] sm:$0xff]  ;;  %v230_v18 = vld [vmem:[%s1442_s18 + $0x1a8] sm:$0xff] }
  0x2a   : > { %593 = vmatmul.mubr.f32.vlgmr.msra.gmra.mrb[0].mxu1 %v179_v40  ;;  %1220 = vmatpush3.bf16.msra.mxu0 %v1217_v36  ;;  %v228_v17 = vld [vmem:[%s1442_s18 + $0x198] sm:$0xff]  ;;  %v227_v19 = vld [vmem:[%s1442_s18 + $0x190] sm:$0xff]  ;;  %v229_v20 = vld [vmem:[%s1442_s18 + $0x1a0] sm:$0xff] }
  0x2b   : > { %1232 = vmatpush3.bf16.msra.mxu1 %v1217_v36  ;;  %452 = vmatprep.mubr.f32.mxu0 %v183_v41  ;;  %v233_v21 = vld [vmem:[%s1442_s18 + $0x1c0] sm:$0xff]  ;;  %v235_v22 = vld [vmem:[%s1442_s18 + $0x1d0] sm:$0xff]  ;;  %v232_v23 = vld [vmem:[%s1442_s18 + $0x1b8] sm:$0xff] }
  0x2c   : > { %597 = vmatprep.mubr.f32.mxu1 %v185_v43  ;;  %1222 = vmatprep.subr.bf16.mxu0 %v1221_v42  ;;  %v234_v24 = vld [vmem:[%s1442_s18 + $0x1c8] sm:$0xff]  ;;  %v240_v26 = vld [vmem:[%s1442_s18 + $0x1f8] sm:$0xff]  ;;  %v237_v27 = vld [vmem:[%s1442_s18 + $0x1e0] sm:$0xff] }
  0x2d   : > { %453 = vmatmul.mubr.f32.gmra.mrb[2].mxu0 %v182_v44  ;;  %1230 = vmatprep.subr.bf16.mxu1 %v1221_v42  ;;  %v238_v25 = vld [vmem:[%s1442_s18 + $0x1e8] sm:$0xff]  ;;  %v239_v28 = vld [vmem:[%s1442_s18 + $0x1f0] sm:$0xff]  ;;  %v245_v30 = vld [vmem:[%s1442_s18 + $0x220] sm:$0xff] }
  0x2e   : > { %598 = vmatmul.mubr.f32.gmra.mrb[2].mxu1 %v184_v45  ;;  %457 = vmatprep.mubr.f32.mxu0 %v188_v46  ;;  %v243_v29 = vld [vmem:[%s1442_s18 + $0x210] sm:$0xff]  ;;  %v242_v31 = vld [vmem:[%s1442_s18 + $0x208] sm:$0xff]  ;;  %v244_v32 = vld [vmem:[%s1442_s18 + $0x218] sm:$0xff] }
  0x2f   : > { %602 = vmatprep.mubr.f32.mxu1 %v190_v47  ;;  %1224 = vmatpush3.bf16.msra.mxu0 %v1221_v42  ;;  %v248_v33 = vld [vmem:[%s1442_s18 + $0x238] sm:$0xff]  ;;  %v250_v34 = vld [vmem:[%s1442_s18 + $0x248] sm:$0xff]  ;;  %v247_v35 = vld [vmem:[%s1442_s18 + $0x230] sm:$0xff] }
  0x30   : > { %1233 = vmatpush3.bf16.msra.mxu1 %v1221_v42  ;;  %1226 = vmatprep.subr.bf16.mxu0 %v1225_v50  ;;  %v249_v36 = vld [vmem:[%s1442_s18 + $0x240] sm:$0xff]  ;;  %v255_v38 = vld [vmem:[%s1442_s18 + $0x270] sm:$0xff]  ;;  %v252_v39 = vld [vmem:[%s1442_s18 + $0x258] sm:$0xff] }
  0x31   : > { %458 = vmatmul.mubr.f32.gmra.mrb[4].mxu0 %v187_v51  ;;  %1231 = vmatprep.subr.bf16.mxu1 %v1225_v50  ;;  %v253_v37 = vld [vmem:[%s1442_s18 + $0x260] sm:$0xff]  ;;  %v254_v40 = vld [vmem:[%s1442_s18 + $0x268] sm:$0xff]  ;;  %v191_v45 = vld [vmem:[%s1442_s18 + $0x70] sm:$0xff] }
  0x32   : > { %603 = vmatmul.mubr.f32.gmra.mrb[4].mxu1 %v189_v52  ;;  %462 = vmatprep.mubr.f32.mxu0 %v193_v53  ;;  %v181_v41 = vld [vmem:[%s1442_s18 + $0x20] sm:$0xff]  ;;  %v186_v43 = vld [vmem:[%s1442_s18 + $0x48] sm:$0xff]  ;;  %v231_v46 = vld [vmem:[%s1442_s18 + $0x1b0] sm:$0xff] }
  0x33   : > { %607 = vmatprep.mubr.f32.mxu1 %v195_v54  ;;  %1228 = vmatpush3.bf16.msra.mxu0 %v1225_v50  ;;  %v221_v42 = vld [vmem:[%s1442_s18 + $0x160] sm:$0xff]  ;;  %v226_v44 = vld [vmem:[%s1442_s18 + $0x188] sm:$0xff]  ;;  %v196_v47 = vld [vmem:[%s1442_s18 + $0x98] sm:$0xff] }
  0x34   : > { %1234 = vmatpush3.bf16.msra.mxu1 %v1225_v50  ;;  %v236_v48 = vld [vmem:[%s1442_s18 + $0x1d8] sm:$0xff]  ;;  %v201_v49 = vld [vmem:[%s1442_s18 + $0xc0] sm:$0xff]  ;;  %v206_v51 = vld [vmem:[%s1442_s18 + $0xe8] sm:$0xff] }
  0x35   : > { %463 = vmatmul.mubr.f32.gmra.mrb[6].mxu0 %v192_v55  ;;  %v241_v50 = vld [vmem:[%s1442_s18 + $0x200] sm:$0xff]  ;;  %v246_v52 = vld [vmem:[%s1442_s18 + $0x228] sm:$0xff]  ;;  %v211_v53 = vld [vmem:[%s1442_s18 + $0x110] sm:$0xff] }
  0x36   : > { %608 = vmatmul.mubr.f32.gmra.mrb[6].mxu1 %v194_v56  ;;  %467 = vmatprep.mubr.f32.mxu0 %v198_v57  ;;  %v251_v54 = vld [vmem:[%s1442_s18 + $0x250] sm:$0xff]  ;;  %v216_v55 = vld [vmem:[%s1442_s18 + $0x138] sm:$0xff] }
  0x37   : > { %612 = vmatprep.mubr.f32.mxu1 %v200_v58  ;;  %v256_v56 = vld [vmem:[%s1442_s18 + $0x278] sm:$0xff]  ;;  %s915_s18 = sshll.u32 %s1703_s11, 3 }
  0x38   : > { %s1650_s14 = scalar_lea.vmem %s1701_s3, %s915_s18 }
  0x39   : > { %468 = vmatmul.mubr.f32.gmra.mrb[8].mxu0 %v197_v59  ;;  %v1603_v59 = vld [vmem:[%s1700_s2] ss:$0 sm:$0xff] }
  0x3a   : > { %613 = vmatmul.mubr.f32.gmra.mrb[8].mxu1 %v199_v60  ;;  %472 = vmatprep.mubr.f32.mxu0 %v203_v61 }
  0x3b   : > { %617 = vmatprep.mubr.f32.mxu1 %v205_v62 }
  0x3d   : > { %473 = vmatmul.mubr.f32.gmra.mrb[10].mxu0 %v202_v63 }
  0x3e   : > { %618 = vmatmul.mubr.f32.gmra.mrb[10].mxu1 %v204_v0  ;;  %477 = vmatprep.mubr.f32.mxu0 %v208_v1 }
  0x3f   : > { %622 = vmatprep.mubr.f32.mxu1 %v210_v2 }
  0x41   : > { %478 = vmatmul.mubr.f32.gmra.mrb[12].mxu0 %v207_v3 }
  0x42   : > { %623 = vmatmul.mubr.f32.gmra.mrb[12].mxu1 %v209_v4  ;;  %482 = vmatprep.mubr.f32.mxu0 %v213_v5 }
  0x43   : > { %627 = vmatprep.mubr.f32.mxu1 %v215_v6 }
  0x45   : > { %483 = vmatmul.mubr.f32.gmra.mrb[14].mxu0 %v212_v7 }
  0x46   : > { %628 = vmatmul.mubr.f32.gmra.mrb[14].mxu1 %v214_v8  ;;  %487 = vmatprep.mubr.f32.mxu0 %v218_v9 }
  0x47   : > { %632 = vmatprep.mubr.f32.mxu1 %v220_v10 }
  0x49   : > { %488 = vmatmul.mubr.f32.gmra.mrb[16].mxu0 %v217_v11 }
  0x4a   : > { %633 = vmatmul.mubr.f32.gmra.mrb[16].mxu1 %v219_v12  ;;  %492 = vmatprep.mubr.f32.mxu0 %v223_v13 }
  0x4b   : > { %637 = vmatprep.mubr.f32.mxu1 %v225_v14 }
  0x4d   : > { %493 = vmatmul.mubr.f32.gmra.mrb[18].mxu0 %v222_v15 }
  0x4e   : > { %638 = vmatmul.mubr.f32.gmra.mrb[18].mxu1 %v224_v16  ;;  %497 = vmatprep.mubr.f32.mxu0 %v228_v17 }
  0x4f   : > { %642 = vmatprep.mubr.f32.mxu1 %v230_v18 }
  0x51   : > { %498 = vmatmul.mubr.f32.gmra.mrb[20].mxu0 %v227_v19 }
  0x52   : > { %643 = vmatmul.mubr.f32.gmra.mrb[20].mxu1 %v229_v20  ;;  %502 = vmatprep.mubr.f32.mxu0 %v233_v21 }
  0x53   : > { %647 = vmatprep.mubr.f32.mxu1 %v235_v22 }
  0x55   : > { %503 = vmatmul.mubr.f32.gmra.mrb[22].mxu0 %v232_v23 }
  0x56   : > { %648 = vmatmul.mubr.f32.gmra.mrb[22].mxu1 %v234_v24  ;;  %507 = vmatprep.mubr.f32.mxu0 %v238_v25 }
  0x57   : > { %652 = vmatprep.mubr.f32.mxu1 %v240_v26 }
  0x59   : > { %508 = vmatmul.mubr.f32.gmra.mrb[24].mxu0 %v237_v27 }
  0x5a   : > { %653 = vmatmul.mubr.f32.gmra.mrb[24].mxu1 %v239_v28  ;;  %512 = vmatprep.mubr.f32.mxu0 %v243_v29 }
  0x5b   : > { %657 = vmatprep.mubr.f32.mxu1 %v245_v30 }
  0x5d   : > { %513 = vmatmul.mubr.f32.gmra.mrb[26].mxu0 %v242_v31 }
  0x5e   : > { %658 = vmatmul.mubr.f32.gmra.mrb[26].mxu1 %v244_v32  ;;  %517 = vmatprep.mubr.f32.mxu0 %v248_v33 }
  0x5f   : > { %662 = vmatprep.mubr.f32.mxu1 %v250_v34 }
  0x61   : > { %518 = vmatmul.mubr.f32.gmra.mrb[28].mxu0 %v247_v35 }
  0x62   : > { %663 = vmatmul.mubr.f32.gmra.mrb[28].mxu1 %v249_v36  ;;  %522 = vmatprep.mubr.f32.mxu0 %v253_v37 }
  0x63   : > { %667 = vmatprep.mubr.f32.mxu1 %v255_v38 }
  0x65   : > { %523 = vmatmul.mubr.f32.gmra.mrb[30].mxu0 %v252_v39 }
  0x66   : > { %668 = vmatmul.mubr.f32.gmra.mrb[30].mxu1 %v254_v40  ;;  %1129 = vmatprep.mubr.msk.f32.mxu0 %vm334_vm0, %v181_v41 }
  0x67   : > { %1141 = vmatprep.mubr.msk.f32.mxu1 %vm334_vm0, %v221_v42 }
  0x69   : > { %1130 = vmatmul.mubr.msk.f32.vlgmr.msra.gmra.mrb[32].mxu0 %vm334_vm0, %v186_v43 }
  0x6a   : > { %1142 = vmatmul.mubr.msk.f32.vlgmr.msra.gmra.mrb[32].mxu1 %vm334_vm0, %v226_v44  ;;  %1132 = vmatprep.mubr.msk.f32.mxu0 %vm334_vm0, %v191_v45 }
  0x6b   : > { %1144 = vmatprep.mubr.msk.f32.mxu1 %vm334_vm0, %v231_v46 }
  0x6d   : > { %1133 = vmatmul.mubr.msk.f32.gmra.mrb[34].mxu0 %vm334_vm0, %v196_v47 }
  0x6e   : > { %1145 = vmatmul.mubr.msk.f32.gmra.mrb[34].mxu1 %vm334_vm0, %v236_v48  ;;  %1135 = vmatprep.mubr.msk.f32.mxu0 %vm334_vm0, %v201_v49 }
  0x6f   : > { %1147 = vmatprep.mubr.msk.f32.mxu1 %vm334_vm0, %v241_v50 }
  0x71   : > { %1136 = vmatmul.mubr.msk.f32.gmra.mrb[36].mxu0 %vm334_vm0, %v206_v51 }
  0x72   : > { %1148 = vmatmul.mubr.msk.f32.gmra.mrb[36].mxu1 %vm334_vm0, %v246_v52  ;;  %1138 = vmatprep.mubr.msk.f32.mxu0 %vm334_vm0, %v211_v53 }
  0x73   : > { %1150 = vmatprep.mubr.msk.f32.mxu1 %vm334_vm0, %v251_v54 }
  0x75   : > { %1139 = vmatmul.mubr.msk.f32.gmra.mrb[38].mxu0 %vm334_vm0, %v216_v55 }
  0x76   : > { %1151 = vmatmul.mubr.msk.f32.gmra.mrb[38].mxu1 %vm334_vm0, %v256_v56 }
  0xfc   : > { %v967_v57 = vpop.f32.mrb[0].mxu0 }
  0xfd   : > { %v1047_v58 = vpop.f32.mrb[0].mxu1  ;;  %v968_v60 = vpop.f32.mrb[1].mxu0 }
  0xfe   : > { %v969_v61 = vadd.f32 %v968_v60, %v967_v57  ;;  %v1048_v62 = vpop.f32.mrb[1].mxu1 }
  0xff   : > { %v1049_v63 = vadd.f32 %v1048_v62, %v1047_v58 }
 0x100   : > { %v450_v0 = vadd.f32 %v969_v61, %v1603_v59  ;;  %v970_v1 = vpop.f32.mrb[2].mxu0 }
 0x101   : > { %v1050_v2 = vpop.f32.mrb[2].mxu1  ;;  %v971_v3 = vpop.f32.mrb[3].mxu0 }
 0x102   : > { %v972_v4 = vadd.f32 %v971_v3, %v970_v1  ;;  %v1051_v5 = vpop.f32.mrb[3].mxu1  ;;  %v1606_v6 = vadd.f32 %v1049_v63, %v450_v0 }
 0x103   : > { %v1052_v7 = vadd.f32 %v1051_v5, %v1050_v2 }
 0x104   : > { %v455_v8 = vadd.f32 %v972_v4, %v1603_v59  ;;  %v973_v9 = vpop.f32.mrb[4].mxu0 }
 0x105   : > { %v1053_v10 = vpop.f32.mrb[4].mxu1  ;;  %v974_v11 = vpop.f32.mrb[5].mxu0 }
 0x106   : > { %v975_v12 = vadd.f32 %v974_v11, %v973_v9  ;;  %v1054_v13 = vpop.f32.mrb[5].mxu1  ;;  %v1609_v14 = vadd.f32 %v1052_v7, %v455_v8 }
 0x107   : > { %v1055_v15 = vadd.f32 %v1054_v13, %v1053_v10 }
 0x108   : > { %v460_v16 = vadd.f32 %v975_v12, %v1603_v59  ;;  %v976_v17 = vpop.f32.mrb[6].mxu0 }
 0x109   : > { %v1056_v18 = vpop.f32.mrb[6].mxu1  ;;  %v977_v19 = vpop.f32.mrb[7].mxu0 }
 0x10a   : > { %v978_v20 = vadd.f32 %v977_v19, %v976_v17  ;;  %v1057_v21 = vpop.f32.mrb[7].mxu1  ;;  %v1612_v22 = vadd.f32 %v1055_v15, %v460_v16 }
 0x10b   : > { %v1058_v23 = vadd.f32 %v1057_v21, %v1056_v18 }
 0x10c   : > { %v465_v24 = vadd.f32 %v978_v20, %v1603_v59  ;;  %v979_v25 = vpop.f32.mrb[8].mxu0 }
 0x10d   : > { %v1059_v26 = vpop.f32.mrb[8].mxu1  ;;  %v980_v27 = vpop.f32.mrb[9].mxu0 }
 0x10e   : > { %v981_v28 = vadd.f32 %v980_v27, %v979_v25  ;;  %v1060_v29 = vpop.f32.mrb[9].mxu1  ;;  %v1615_v30 = vadd.f32 %v1058_v23, %v465_v24 }
 0x10f   : > { %v1061_v31 = vadd.f32 %v1060_v29, %v1059_v26 }
 0x110   : > { %v470_v32 = vadd.f32 %v981_v28, %v1603_v59  ;;  %v982_v33 = vpop.f32.mrb[10].mxu0 }
 0x111   : > { %v1062_v34 = vpop.f32.mrb[10].mxu1  ;;  %v983_v35 = vpop.f32.mrb[11].mxu0 }
 0x112   : > { %v984_v36 = vadd.f32 %v983_v35, %v982_v33  ;;  %v1063_v37 = vpop.f32.mrb[11].mxu1  ;;  %v1618_v38 = vadd.f32 %v1061_v31, %v470_v32 }
 0x113   : > { %v1064_v39 = vadd.f32 %v1063_v37, %v1062_v34 }
 0x114   : > { %v475_v40 = vadd.f32 %v984_v36, %v1603_v59  ;;  %v985_v41 = vpop.f32.mrb[12].mxu0 }
 0x115   : > { %v1065_v42 = vpop.f32.mrb[12].mxu1  ;;  %v986_v43 = vpop.f32.mrb[13].mxu0 }
 0x116   : > { %v987_v44 = vadd.f32 %v986_v43, %v985_v41  ;;  %v1066_v45 = vpop.f32.mrb[13].mxu1  ;;  %v1621_v46 = vadd.f32 %v1064_v39, %v475_v40 }
 0x117   : > { %v1067_v47 = vadd.f32 %v1066_v45, %v1065_v42 }
 0x118   : > { %v480_v48 = vadd.f32 %v987_v44, %v1603_v59  ;;  %v988_v49 = vpop.f32.mrb[14].mxu0 }
 0x119   : > { %v1068_v50 = vpop.f32.mrb[14].mxu1  ;;  %v989_v51 = vpop.f32.mrb[15].mxu0 }
 0x11a   : > { %v990_v52 = vadd.f32 %v989_v51, %v988_v49  ;;  %v1069_v53 = vpop.f32.mrb[15].mxu1  ;;  %v1624_v54 = vadd.f32 %v1067_v47, %v480_v48 }
 0x11b   : > { %v1070_v55 = vadd.f32 %v1069_v53, %v1068_v50 }
 0x11c   : > { %v485_v56 = vadd.f32 %v990_v52, %v1603_v59  ;;  %v991_v57 = vpop.f32.mrb[16].mxu0 }
 0x11d   : > { %v1071_v58 = vpop.f32.mrb[16].mxu1  ;;  %v992_v60 = vpop.f32.mrb[17].mxu0 }
 0x11e   : > { %v993_v61 = vadd.f32 %v992_v60, %v991_v57  ;;  %v1072_v62 = vpop.f32.mrb[17].mxu1  ;;  %v1627_v63 = vadd.f32 %v1070_v55, %v485_v56 }
 0x11f   : > { %v1073_v0 = vadd.f32 %v1072_v62, %v1071_v58 }
 0x120   : > { %v490_v1 = vadd.f32 %v993_v61, %v1603_v59  ;;  %v994_v2 = vpop.f32.mrb[18].mxu0 }
 0x121   : > { %v1074_v3 = vpop.f32.mrb[18].mxu1  ;;  %v995_v4 = vpop.f32.mrb[19].mxu0 }
 0x122   : > { %v996_v5 = vadd.f32 %v995_v4, %v994_v2  ;;  %v1075_v7 = vpop.f32.mrb[19].mxu1  ;;  %v1630_v8 = vadd.f32 %v1073_v0, %v490_v1 }
 0x123   : > { %v1076_v9 = vadd.f32 %v1075_v7, %v1074_v3 }
 0x124   : > { %v495_v10 = vadd.f32 %v996_v5, %v1603_v59  ;;  %v997_v11 = vpop.f32.mrb[20].mxu0 }
 0x125   : > { %v1077_v12 = vpop.f32.mrb[20].mxu1  ;;  %v998_v13 = vpop.f32.mrb[21].mxu0 }
 0x126   : > { %v999_v15 = vadd.f32 %v998_v13, %v997_v11  ;;  %v1078_v16 = vpop.f32.mrb[21].mxu1  ;;  %v640_v17 = vadd.f32 %v1076_v9, %v495_v10 }
 0x127   : > { %v1079_v18 = vadd.f32 %v1078_v16, %v1077_v12 }
 0x128   : > { %v500_v19 = vadd.f32 %v999_v15, %v1603_v59  ;;  %v1000_v20 = vpop.f32.mrb[22].mxu0 }
 0x129   : > { %v1080_v21 = vpop.f32.mrb[22].mxu1  ;;  %v1001_v23 = vpop.f32.mrb[23].mxu0 }
 0x12a   : > { %v1002_v24 = vadd.f32 %v1001_v23, %v1000_v20  ;;  %v1081_v25 = vpop.f32.mrb[23].mxu1  ;;  %v1634_v26 = vadd.f32 %v1079_v18, %v500_v19 }
 0x12b   : > { %v1082_v27 = vadd.f32 %v1081_v25, %v1080_v21 }
 0x12c   : > { %v505_v28 = vadd.f32 %v1002_v24, %v1603_v59  ;;  %v1003_v29 = vpop.f32.mrb[24].mxu0 }
 0x12d   : > { %v1083_v31 = vpop.f32.mrb[24].mxu1  ;;  %v1004_v32 = vpop.f32.mrb[25].mxu0 }
 0x12e   : > { %v1005_v33 = vadd.f32 %v1004_v32, %v1003_v29  ;;  %v1084_v34 = vpop.f32.mrb[25].mxu1  ;;  %v650_v35 = vadd.f32 %v1082_v27, %v505_v28 }
 0x12f   : > { %v1085_v36 = vadd.f32 %v1084_v34, %v1083_v31 }
 0x130   : > { %v510_v37 = vadd.f32 %v1005_v33, %v1603_v59  ;;  %v1006_v39 = vpop.f32.mrb[26].mxu0 }
 0x131   : > { %v1086_v40 = vpop.f32.mrb[26].mxu1  ;;  %v1007_v41 = vpop.f32.mrb[27].mxu0 }
 0x132   : > { %v1008_v42 = vadd.f32 %v1007_v41, %v1006_v39  ;;  %v1087_v43 = vpop.f32.mrb[27].mxu1  ;;  %v1638_v44 = vadd.f32 %v1085_v36, %v510_v37 }
 0x133   : > { %v1088_v45 = vadd.f32 %v1087_v43, %v1086_v40 }
 0x134   : > { %v515_v47 = vadd.f32 %v1008_v42, %v1603_v59  ;;  %v1009_v48 = vpop.f32.mrb[28].mxu0 }
 0x135   : > { %v1089_v49 = vpop.f32.mrb[28].mxu1  ;;  %v1010_v50 = vpop.f32.mrb[29].mxu0 }
 0x136   : > { %v1011_v51 = vadd.f32 %v1010_v50, %v1009_v48  ;;  %v1090_v52 = vpop.f32.mrb[29].mxu1  ;;  %v660_v53 = vadd.f32 %v1088_v45, %v515_v47 }
 0x137   : > { %v1091_v55 = vadd.f32 %v1090_v52, %v1089_v49 }
 0x138   : > { %v520_v56 = vadd.f32 %v1011_v51, %v1603_v59  ;;  %v1012_v57 = vpop.f32.mrb[30].mxu0 }
 0x139   : > { %v1092_v58 = vpop.f32.mrb[30].mxu1  ;;  %v1013_v60 = vpop.f32.mrb[31].mxu0 }
 0x13a   : > { %v1014_v61 = vadd.f32 %v1013_v60, %v1012_v57  ;;  %v1093_v62 = vpop.f32.mrb[31].mxu1  ;;  %v1642_v0 = vadd.f32 %v1091_v55, %v520_v56 }
 0x13b   : > { %v1094_v1 = vadd.f32 %v1093_v62, %v1092_v58 }
 0x13c   : > { %v525_v2 = vadd.f32 %v1014_v61, %v1603_v59  ;;  %v1131_v3 = vpop.f32.mrb[32].mxu0 }
 0x13d   : > { %v745_v4 = vadd.f32 %v1131_v3, %v1609_v14  ;;  %v1143_v5 = vpop.f32.mrb[32].mxu1  ;;  %v739_v7 = vpop.f32.mrb[33].mxu0 }
 0x13e   : > { %v785_v9 = vadd.f32 %v1143_v5, %v640_v17  ;;  %v740_v10 = vadd.f32 %v739_v7, %v1606_v6  ;;  %v779_v11 = vpop.f32.mrb[33].mxu1  ;;  %v670_v12 = vadd.f32 %v1094_v1, %v525_v2 }
 0x13f   : > { %v819_v59 = vmax.f32 %v745_v4, 0.0  ;;  %v780_v14 = vadd.f32 %v779_v11, %v1630_v8 }
 0x140   : > { %v827_v13 = vmax.f32 %v785_v9, 0.0  ;;  %v818_v15 = vmax.f32 %v740_v10, 0.0  ;;  %v1134_v16 = vpop.f32.mrb[34].mxu0 }
 0x141   : > { %836 = vst.msk [vmem:[%s1650_s14 + $0x8] sm:$0xff] %vm834_vm1, %v819_v59  ;;  %v826_v18 = vmax.f32 %v780_v14, 0.0  ;;  %v755_v19 = vadd.f32 %v1134_v16, %v1615_v30  ;;  %v1146_v20 = vpop.f32.mrb[34].mxu1  ;;  %v749_v21 = vpop.f32.mrb[35].mxu0 }
 0x142   : > { %844 = vst.msk [vmem:[%s1650_s14 + $0x48] sm:$0xff] %vm834_vm1, %v827_v13  ;;  %835 = vst.msk [vmem:[%s1650_s14] sm:$0xff] %vm834_vm1, %v818_v15  ;;  %v795_v6 = vadd.f32 %v1146_v20, %v650_v35  ;;  %v750_v8 = vadd.f32 %v749_v21, %v1612_v22  ;;  %v789_v17 = vpop.f32.mrb[35].mxu1 }
 0x143   : > { %843 = vst.msk [vmem:[%s1650_s14 + $0x40] sm:$0xff] %vm834_vm1, %v826_v18  ;;  %v821_v23 = vmax.f32 %v755_v19, 0.0  ;;  %v790_v24 = vadd.f32 %v789_v17, %v1634_v26 }
 0x144   : > { %v829_v25 = vmax.f32 %v795_v6, 0.0  ;;  %v820_v30 = vmax.f32 %v750_v8, 0.0  ;;  %v1137_v27 = vpop.f32.mrb[36].mxu0 }
 0x145   : > { %838 = vst.msk [vmem:[%s1650_s14 + $0x18] sm:$0xff] %vm834_vm1, %v821_v23  ;;  %v828_v28 = vmax.f32 %v790_v24, 0.0  ;;  %v765_v29 = vadd.f32 %v1137_v27, %v1621_v46  ;;  %v1149_v31 = vpop.f32.mrb[36].mxu1  ;;  %v759_v32 = vpop.f32.mrb[37].mxu0 }
 0x146   : > { %846 = vst.msk [vmem:[%s1650_s14 + $0x58] sm:$0xff] %vm834_vm1, %v829_v25  ;;  %837 = vst.msk [vmem:[%s1650_s14 + $0x10] sm:$0xff] %vm834_vm1, %v820_v30  ;;  %v805_v22 = vadd.f32 %v1149_v31, %v660_v53  ;;  %v760_v26 = vadd.f32 %v759_v32, %v1618_v38  ;;  %v799_v33 = vpop.f32.mrb[37].mxu1 }
 0x147   : > { %845 = vst.msk [vmem:[%s1650_s14 + $0x50] sm:$0xff] %vm834_vm1, %v828_v28  ;;  %v823_v34 = vmax.f32 %v765_v29, 0.0  ;;  %v800_v35 = vadd.f32 %v799_v33, %v1638_v44 }
 0x148   : > { %v831_v36 = vmax.f32 %v805_v22, 0.0  ;;  %v822_v46 = vmax.f32 %v760_v26, 0.0  ;;  %v1140_v37 = vpop.f32.mrb[38].mxu0 }
 0x149   : > { %840 = vst.msk [vmem:[%s1650_s14 + $0x28] sm:$0xff] %vm834_vm1, %v823_v34  ;;  %v830_v39 = vmax.f32 %v800_v35, 0.0  ;;  %v775_v40 = vadd.f32 %v1140_v37, %v1627_v63  ;;  %v1152_v41 = vpop.f32.mrb[38].mxu1  ;;  %v769_v38 = vpop.f32.mrb[39].mxu0 }
 0x14a   : > { %848 = vst.msk [vmem:[%s1650_s14 + $0x68] sm:$0xff] %vm834_vm1, %v831_v36  ;;  %839 = vst.msk [vmem:[%s1650_s14 + $0x20] sm:$0xff] %vm834_vm1, %v822_v46  ;;  %v815_v42 = vadd.f32 %v1152_v41, %v670_v12  ;;  %v770_v43 = vadd.f32 %v769_v38, %v1624_v54  ;;  %v809_v44 = vpop.f32.mrb[39].mxu1 }
 0x14b   : > { %847 = vst.msk [vmem:[%s1650_s14 + $0x60] sm:$0xff] %vm834_vm1, %v830_v39  ;;  %v825_v45 = vmax.f32 %v775_v40, 0.0  ;;  %v810_v47 = vadd.f32 %v809_v44, %v1642_v0 }
 0x14c   : > { %v833_v48 = vmax.f32 %v815_v42, 0.0  ;;  %v824_v49 = vmax.f32 %v770_v43, 0.0 }
 0x14d   : > { %842 = vst.msk [vmem:[%s1650_s14 + $0x38] sm:$0xff] %vm834_vm1, %v825_v45  ;;  %v832_v63 = vmax.f32 %v810_v47, 0.0 }
 0x14e   : > { %850 = vst.msk [vmem:[%s1650_s14 + $0x78] sm:$0xff] %vm834_vm1, %v833_v48  ;;  %841 = vst.msk [vmem:[%s1650_s14 + $0x30] sm:$0xff] %vm834_vm1, %v824_v49 }
 0x14f   : > { %849 = vst.msk [vmem:[%s1650_s14 + $0x70] sm:$0xff] %vm834_vm1, %v832_v63 }
 0x150 PF: > { %s13_s12 = sadd.s32 1, %s1250_s12  }
 0x151   : > { %p10_p4 = scmp.ge.s32.totalorder %s13_s12, 7  }
 0x153   :  { %12 = sbr.rel (!%p10_p4) target bundleno = 1 (0x1), region = 62 }

// kernel: policy_forward.5
= control target key start
LH: loop header
LB: loop body
LE: loop exit
PB: predicated region body
PF: predicated region fallthrough
CT: control target
= control target key end

     0   :  { %s831_s12 = smov 0   ;;  %s1129_s0 = inlined_call_operand.vmem [shape: f32[160,512], index: 0, kind: input, shape index: {}]   ;;  %s1130_s1 = inlined_call_operand.vmem [shape: f32[512,64], index: 1, kind: input, shape index: {}]   ;;  %s1131_s2 = inlined_call_operand.vmem [shape: f32[1,64], index: 2, kind: input, shape index: {}]   ;;  %s1132_s3 = inlined_call_operand.vmem [shape: f32[160,64], index: 3, kind: output, shape index: {}]  }
   0x1 LB: > { %s595_s13 = sadd.s32 4294967295, %s809_s12   ;;  %p599_p0 = scmp.ge.s32.totalorder %s809_s12, 1  ;;  %s809_s12 = sphi %s831_s12, %s13_s12  }
   0x2   : > { %p139_p1 = scmp.lt.s32.totalorder %s809_s12, 3 }
   0x4   : > { %p140_p2 = pnand %p599_p0, %p139_p1 }
   0x5   : > { %v233_v0 = vld [vmem:[%s1130_s1 + $0x80] sm:$0xff] (!%p140_p2)  ;;  %v234_v1 = vld [vmem:[%s1130_s1 + $0x88] sm:$0xff] (!%p140_p2)  ;;  %v235_v11 = vld [vmem:[%s1130_s1 + $0x90] sm:$0xff] (!%p140_p2)  ;;  %s875_s11 = smul.u32 (!%p140_p2), 10, %s595_s13  ;;  %vm528_vm0 = vcmask (!%p140_p2), 523264  }
   0x6   : > { %143 = sbr.rel (%p140_p2) target bundleno = 298 (0x12a), region = 32  ;;  %v217_v2 = vld [vmem:[%s1130_s1] sm:$0xff] (!%p140_p2)  ;;  %v731_v3 = vpack.c.bf16 (!%p140_p2), %v234_v1, %v233_v0  ;;  %v218_v4 = vld [vmem:[%s1130_s1 + $0x8] sm:$0xff] (!%p140_p2)  ;;  %v236_v13 = vld [vmem:[%s1130_s1 + $0x98] sm:$0xff] (!%p140_p2) }
   0x7   : > { %v265_v5 = vld [vmem:[%s1130_s1 + $0x180] sm:$0xff] (!%p140_p2)  ;;  %v266_v6 = vld [vmem:[%s1130_s1 + $0x188] sm:$0xff] (!%p140_p2)  ;;  %v733_v7 = vpack.c.bf16 (!%p140_p2), %v218_v4, %v217_v2  ;;  %v219_v14 = vld [vmem:[%s1130_s1 + $0x10] sm:$0xff] (!%p140_p2)  ;;  %v735_v16 = vpack.c.bf16 (!%p140_p2), %v236_v13, %v235_v11  ;;  %p165_p3 = scmp.lt.s32.totalorder (!%p140_p2), %s875_s11, 19 }
   0x8   : > { %v763_v8 = vpack.c.bf16 (!%p140_p2), %v266_v6, %v265_v5  ;;  %v249_v9 = vld [vmem:[%s1130_s1 + $0x100] sm:$0xff] (!%p140_p2)  ;;  %v250_v10 = vld [vmem:[%s1130_s1 + $0x108] sm:$0xff] (!%p140_p2)  ;;  %732 = vmatprep.subr.bf16.mxu0 (!%p140_p2), %v731_v3  ;;  %v220_v15 = vld [vmem:[%s1130_s1 + $0x18] sm:$0xff] (!%p140_p2) }
   0x9   : > { %v765_v12 = vpack.c.bf16 (!%p140_p2), %v250_v10, %v249_v9  ;;  %734 = vmatpush3.bf16.msra.mxu0 (!%p140_p2), %v733_v7  ;;  %v737_v17 = vpack.c.bf16 (!%p140_p2), %v220_v15, %v219_v14  ;;  %v267_v18 = vld [vmem:[%s1130_s1 + $0x190] sm:$0xff] (!%p140_p2)  ;;  %v268_v19 = vld [vmem:[%s1130_s1 + $0x198] sm:$0xff] (!%p140_p2)  ;;  %v237_v23 = vld [vmem:[%s1130_s1 + $0xa0] sm:$0xff] (!%p140_p2) }
   0xa   : > { %764 = vmatprep.subr.bf16.mxu1 (!%p140_p2), %v763_v8  ;;  %v251_v20 = vld [vmem:[%s1130_s1 + $0x110] sm:$0xff] (!%p140_p2)  ;;  %v767_v21 = vpack.c.bf16 (!%p140_p2), %v268_v19, %v267_v18  ;;  %v252_v22 = vld [vmem:[%s1130_s1 + $0x118] sm:$0xff] (!%p140_p2)  ;;  %v238_v24 = vld [vmem:[%s1130_s1 + $0xa8] sm:$0xff] (!%p140_p2)  ;;  %736 = vmatprep.subr.bf16.mxu0 (!%p140_p2), %v735_v16 }
   0xb   : > { %766 = vmatpush3.bf16.msra.mxu1 (!%p140_p2), %v765_v12  ;;  %v769_v25 = vpack.c.bf16 (!%p140_p2), %v252_v22, %v251_v20  ;;  %v739_v26 = vpack.c.bf16 (!%p140_p2), %v238_v24, %v237_v23  ;;  %v221_v27 = vld [vmem:[%s1130_s1 + $0x20] sm:$0xff] (!%p140_p2)  ;;  %v222_v28 = vld [vmem:[%s1130_s1 + $0x28] sm:$0xff] (!%p140_p2)  ;;  %v239_v35 = vld [vmem:[%s1130_s1 + $0xb0] sm:$0xff] (!%p140_p2) }
   0xc   : > { %v269_v29 = vld [vmem:[%s1130_s1 + $0x1a0] sm:$0xff] (!%p140_p2)  ;;  %768 = vmatprep.subr.bf16.mxu1 (!%p140_p2), %v767_v21  ;;  %v270_v30 = vld [vmem:[%s1130_s1 + $0x1a8] sm:$0xff] (!%p140_p2)  ;;  %v741_v33 = vpack.c.bf16 (!%p140_p2), %v222_v28, %v221_v27  ;;  %v240_v36 = vld [vmem:[%s1130_s1 + $0xb8] sm:$0xff] (!%p140_p2) }
   0xd   : > { %v253_v31 = vld [vmem:[%s1130_s1 + $0x120] sm:$0xff]  ;;  %v254_v32 = vld [vmem:[%s1130_s1 + $0x128] sm:$0xff]  ;;  %738 = vmatpush3.bf16.msra.mxu0 %v737_v17  ;;  %v771_v34 = vpack.c.bf16 %v270_v30, %v269_v29  ;;  %v223_v37 = vld [vmem:[%s1130_s1 + $0x30] sm:$0xff]  ;;  %v743_v39 = vpack.c.bf16 %v240_v36, %v239_v35  ;;  %s1134_s11 = smov (!%p165_p3, %s875_s11), 19 }
   0xe   : > { %740 = vmatprep.subr.bf16.mxu0 %v739_v26  ;;  %v773_v38 = vpack.c.bf16 %v254_v32, %v253_v31  ;;  %v224_v40 = vld [vmem:[%s1130_s1 + $0x38] sm:$0xff]  ;;  %v271_v41 = vld [vmem:[%s1130_s1 + $0x1b0] sm:$0xff]  ;;  %v241_v46 = vld [vmem:[%s1130_s1 + $0xc0] sm:$0xff]  ;;  %s606_s27 = sshll.u32 %s1134_s11, 5  ;;  %s602_s24 = sshll.u32 %s1134_s11, 3 }
   0xf   : > { %770 = vmatpush3.bf16.msra.mxu1 %v769_v25  ;;  %v272_v42 = vld [vmem:[%s1130_s1 + $0x1b8] sm:$0xff]  ;;  %v255_v44 = vld [vmem:[%s1130_s1 + $0x130] sm:$0xff]  ;;  %v242_v47 = vld [vmem:[%s1130_s1 + $0xc8] sm:$0xff]  ;;  %v745_v48 = vpack.c.bf16 %v224_v40, %v223_v37  ;;  %s1001_s18 = scalar_lea.vmem %s1129_s0, %s606_s27  ;;  %s1095_s26 = scalar_lea.vmem %s1132_s3, %s602_s24 }
  0x10   : > { %772 = vmatprep.subr.bf16.mxu1 %v771_v34  ;;  %v775_v43 = vpack.c.bf16 %v272_v42, %v271_v41  ;;  %v256_v45 = vld [vmem:[%s1130_s1 + $0x138] sm:$0xff]  ;;  %v273_v49 = vld [vmem:[%s1130_s1 + $0x1c0] sm:$0xff]  ;;  %v274_v50 = vld [vmem:[%s1130_s1 + $0x1c8] sm:$0xff]  ;;  %v747_v52 = vpack.c.bf16 %v242_v47, %v241_v46 }
  0x11   : > { %742 = vmatpush3.bf16.msra.mxu0 %v741_v33  ;;  %v777_v51 = vpack.c.bf16 %v256_v45, %v255_v44  ;;  %v225_v53 = vld [vmem:[%s1130_s1 + $0x40] sm:$0xff]  ;;  %v226_v54 = vld [vmem:[%s1130_s1 + $0x48] sm:$0xff]  ;;  %v779_v56 = vpack.c.bf16 %v274_v50, %v273_v49  ;;  %v243_v58 = vld [vmem:[%s1130_s1 + $0xd0] sm:$0xff] }
  0x12   : > { %744 = vmatprep.subr.bf16.mxu0 %v743_v39  ;;  %v257_v55 = vld [vmem:[%s1130_s1 + $0x140] sm:$0xff]  ;;  %v258_v57 = vld [vmem:[%s1130_s1 + $0x148] sm:$0xff]  ;;  %v244_v59 = vld [vmem:[%s1130_s1 + $0xd8] sm:$0xff]  ;;  %v749_v62 = vpack.c.bf16 %v226_v54, %v225_v53 }
  0x13   : > { %774 = vmatpush3.bf16.msra.mxu1 %v773_v38  ;;  %v275_v60 = vld [vmem:[%s1130_s1 + $0x1d0] sm:$0xff]  ;;  %v276_v61 = vld [vmem:[%s1130_s1 + $0x1d8] sm:$0xff]  ;;  %v781_v63 = vpack.c.bf16 %v258_v57, %v257_v55  ;;  %v751_v0 = vpack.c.bf16 %v244_v59, %v243_v58  ;;  %v245_v6 = vld [vmem:[%s1130_s1 + $0xe0] sm:$0xff] }
  0x14   : > { %776 = vmatprep.subr.bf16.mxu1 %v775_v43  ;;  %v227_v1 = vld [vmem:[%s1130_s1 + $0x50] sm:$0xff]  ;;  %v228_v2 = vld [vmem:[%s1130_s1 + $0x58] sm:$0xff]  ;;  %v783_v4 = vpack.c.bf16 %v276_v61, %v275_v60  ;;  %v246_v7 = vld [vmem:[%s1130_s1 + $0xe8] sm:$0xff] }
  0x15   : > { %746 = vmatpush3.bf16.msra.mxu0 %v745_v48  ;;  %v259_v3 = vld [vmem:[%s1130_s1 + $0x150] sm:$0xff]  ;;  %v260_v5 = vld [vmem:[%s1130_s1 + $0x158] sm:$0xff]  ;;  %v277_v8 = vld [vmem:[%s1130_s1 + $0x1e0] sm:$0xff]  ;;  %v753_v10 = vpack.c.bf16 %v228_v2, %v227_v1  ;;  %v755_v14 = vpack.c.bf16 %v246_v7, %v245_v6 }
  0x16   : > { %748 = vmatprep.subr.bf16.mxu0 %v747_v52  ;;  %v278_v9 = vld [vmem:[%s1130_s1 + $0x1e8] sm:$0xff]  ;;  %v229_v11 = vld [vmem:[%s1130_s1 + $0x60] sm:$0xff]  ;;  %v785_v13 = vpack.c.bf16 %v260_v5, %v259_v3  ;;  %v247_v19 = vld [vmem:[%s1130_s1 + $0xf0] sm:$0xff] }
  0x17   : > { %778 = vmatpush3.bf16.msra.mxu1 %v777_v51  ;;  %v230_v12 = vld [vmem:[%s1130_s1 + $0x68] sm:$0xff]  ;;  %v261_v15 = vld [vmem:[%s1130_s1 + $0x160] sm:$0xff]  ;;  %v787_v18 = vpack.c.bf16 %v278_v9, %v277_v8  ;;  %v248_v20 = vld [vmem:[%s1130_s1 + $0xf8] sm:$0xff] }
  0x18   : > { %780 = vmatprep.subr.bf16.mxu1 %v779_v56  ;;  %v262_v16 = vld [vmem:[%s1130_s1 + $0x168] sm:$0xff]  ;;  %v180_v21 = vld [vmem:[%s1001_s18 + $0x18] sm:$0xff]  ;;  %v279_v22 = vld [vmem:[%s1130_s1 + $0x1f0] sm:$0xff]  ;;  %v757_v24 = vpack.c.bf16 %v230_v12, %v229_v11  ;;  %v759_v26 = vpack.c.bf16 %v248_v20, %v247_v19 }
  0x19   : > { %750 = vmatpush3.bf16.msra.mxu0 %v749_v62  ;;  %v178_v17 = vld [vmem:[%s1001_s18 + $0x8] sm:$0xff]  ;;  %v280_v23 = vld [vmem:[%s1130_s1 + $0x1f8] sm:$0xff]  ;;  %467 = vmatprep.mubr.f32.mxu1 %v180_v21  ;;  %v789_v25 = vpack.c.bf16 %v262_v16, %v261_v15  ;;  %v231_v27 = vld [vmem:[%s1130_s1 + $0x70] sm:$0xff] }
  0x1a   : > { %752 = vmatprep.subr.bf16.mxu0 %v751_v0  ;;  %352 = vmatprep.mubr.f32.mxu0 %v178_v17  ;;  %v232_v28 = vld [vmem:[%s1130_s1 + $0x78] sm:$0xff]  ;;  %v791_v29 = vpack.c.bf16 %v280_v23, %v279_v22  ;;  %v263_v30 = vld [vmem:[%s1130_s1 + $0x170] sm:$0xff]  ;;  %v177_v34 = vld [vmem:[%s1001_s18] sm:$0xff] }
  0x1b   : > { %782 = vmatpush3.bf16.msra.mxu1 %v781_v63  ;;  %v264_v31 = vld [vmem:[%s1130_s1 + $0x178] sm:$0xff]  ;;  %v761_v32 = vpack.c.bf16 %v232_v28, %v231_v27  ;;  %v179_v35 = vld [vmem:[%s1001_s18 + $0x10] sm:$0xff]  ;;  %v182_v36 = vld [vmem:[%s1001_s18 + $0x28] sm:$0xff] }
  0x1c   : > { %784 = vmatprep.subr.bf16.mxu1 %v783_v4  ;;  %v793_v33 = vpack.c.bf16 %v264_v31, %v263_v30  ;;  %v184_v37 = vld [vmem:[%s1001_s18 + $0x38] sm:$0xff]  ;;  %v181_v38 = vld [vmem:[%s1001_s18 + $0x20] sm:$0xff]  ;;  %v183_v39 = vld [vmem:[%s1001_s18 + $0x30] sm:$0xff] }
  0x1d   : > { %754 = vmatpush3.bf16.msra.mxu0 %v753_v10  ;;  %v186_v40 = vld [vmem:[%s1001_s18 + $0x48] sm:$0xff]  ;;  %v188_v41 = vld [vmem:[%s1001_s18 + $0x58] sm:$0xff]  ;;  %v185_v42 = vld [vmem:[%s1001_s18 + $0x40] sm:$0xff] }
  0x1e   : > { %756 = vmatprep.subr.bf16.mxu0 %v755_v14  ;;  %v187_v43 = vld [vmem:[%s1001_s18 + $0x50] sm:$0xff]  ;;  %v190_v44 = vld [vmem:[%s1001_s18 + $0x68] sm:$0xff]  ;;  %v192_v45 = vld [vmem:[%s1001_s18 + $0x78] sm:$0xff] }
  0x1f   : > { %786 = vmatpush3.bf16.msra.mxu1 %v785_v13  ;;  %v189_v46 = vld [vmem:[%s1001_s18 + $0x60] sm:$0xff]  ;;  %v191_v47 = vld [vmem:[%s1001_s18 + $0x70] sm:$0xff]  ;;  %v194_v48 = vld [vmem:[%s1001_s18 + $0x88] sm:$0xff] }
  0x20   : > { %788 = vmatprep.subr.bf16.mxu1 %v787_v18  ;;  %v196_v49 = vld [vmem:[%s1001_s18 + $0x98] sm:$0xff]  ;;  %v193_v50 = vld [vmem:[%s1001_s18 + $0x80] sm:$0xff]  ;;  %v195_v51 = vld [vmem:[%s1001_s18 + $0x90] sm:$0xff] }
  0x21   : > { %758 = vmatpush3.bf16.msra.mxu0 %v757_v24  ;;  %v198_v52 = vld [vmem:[%s1001_s18 + $0xa8] sm:$0xff]  ;;  %v200_v53 = vld [vmem:[%s1001_s18 + $0xb8] sm:$0xff]  ;;  %v197_v54 = vld [vmem:[%s1001_s18 + $0xa0] sm:$0xff] }
  0x22   : > { %760 = vmatprep.subr.bf16.mxu0 %v759_v26  ;;  %v199_v55 = vld [vmem:[%s1001_s18 + $0xb0] sm:$0xff]  ;;  %v202_v56 = vld [vmem:[%s1001_s18 + $0xc8] sm:$0xff]  ;;  %v204_v57 = vld [vmem:[%s1001_s18 + $0xd8] sm:$0xff] }
  0x23   : > { %790 = vmatpush3.bf16.msra.mxu1 %v789_v25  ;;  %v201_v58 = vld [vmem:[%s1001_s18 + $0xc0] sm:$0xff]  ;;  %v203_v59 = vld [vmem:[%s1001_s18 + $0xd0] sm:$0xff]  ;;  %v206_v60 = vld [vmem:[%s1001_s18 + $0xe8] sm:$0xff] }
  0x24   : > { %792 = vmatprep.subr.bf16.mxu1 %v791_v29  ;;  %v208_v61 = vld [vmem:[%s1001_s18 + $0xf8] sm:$0xff]  ;;  %v205_v62 = vld [vmem:[%s1001_s18 + $0xe0] sm:$0xff]  ;;  %v207_v63 = vld [vmem:[%s1001_s18 + $0xf0] sm:$0xff] }
  0x25   : > { %762 = vmatpush3.bf16.msra.mxu0 %v761_v32  ;;  %v210_v0 = vld [vmem:[%s1001_s18 + $0x108] sm:$0xff]  ;;  %v212_v1 = vld [vmem:[%s1001_s18 + $0x118] sm:$0xff]  ;;  %v209_v2 = vld [vmem:[%s1001_s18 + $0x100] sm:$0xff] }
  0x26   : > { %v211_v3 = vld [vmem:[%s1001_s18 + $0x110] sm:$0xff]  ;;  %v214_v4 = vld [vmem:[%s1001_s18 + $0x128] sm:$0xff]  ;;  %v216_v5 = vld [vmem:[%s1001_s18 + $0x138] sm:$0xff] }
  0x27   : > { %794 = vmatpush3.bf16.msra.mxu1 %v793_v33  ;;  %v213_v6 = vld [vmem:[%s1001_s18 + $0x120] sm:$0xff]  ;;  %v215_v7 = vld [vmem:[%s1001_s18 + $0x130] sm:$0xff] }
  0x28   : > { %353 = vmatmul.mubr.f32.vlgmr.msra.gmra.mrb[0].mxu0 %v177_v34  ;;  %v1088_v9 = vld [vmem:[%s1131_s2] ss:$0 sm:$0xff] }
  0x29   : > { %357 = vmatprep.mubr.f32.mxu0 %v182_v36 }
  0x2a   : > { %468 = vmatmul.mubr.f32.vlgmr.msra.gmra.mrb[0].mxu1 %v179_v35 }
  0x2b   : > { %472 = vmatprep.mubr.f32.mxu1 %v184_v37 }
  0x2c   : > { %358 = vmatmul.mubr.f32.gmra.mrb[2].mxu0 %v181_v38 }
  0x2d   : > { %362 = vmatprep.mubr.f32.mxu0 %v186_v40 }
  0x2e   : > { %473 = vmatmul.mubr.f32.gmra.mrb[2].mxu1 %v183_v39 }
  0x2f   : > { %477 = vmatprep.mubr.f32.mxu1 %v188_v41 }
  0x30   : > { %363 = vmatmul.mubr.f32.gmra.mrb[4].mxu0 %v185_v42 }
  0x31   : > { %367 = vmatprep.mubr.f32.mxu0 %v190_v44 }
  0x32   : > { %478 = vmatmul.mubr.f32.gmra.mrb[4].mxu1 %v187_v43 }
  0x33   : > { %482 = vmatprep.mubr.f32.mxu1 %v192_v45 }
  0x34   : > { %368 = vmatmul.mubr.f32.gmra.mrb[6].mxu0 %v189_v46 }
  0x35   : > { %372 = vmatprep.mubr.f32.mxu0 %v194_v48 }
  0x36   : > { %483 = vmatmul.mubr.f32.gmra.mrb[6].mxu1 %v191_v47 }
  0x37   : > { %487 = vmatprep.mubr.f32.mxu1 %v196_v49 }
  0x38   : > { %373 = vmatmul.mubr.f32.gmra.mrb[8].mxu0 %v193_v50 }
  0x39   : > { %377 = vmatprep.mubr.f32.mxu0 %v198_v52 }
  0x3a   : > { %488 = vmatmul.mubr.f32.gmra.mrb[8].mxu1 %v195_v51 }
  0x3b   : > { %492 = vmatprep.mubr.f32.mxu1 %v200_v53 }
  0x3c   : > { %378 = vmatmul.mubr.f32.gmra.mrb[10].mxu0 %v197_v54 }
  0x3d   : > { %382 = vmatprep.mubr.f32.mxu0 %v202_v56 }
  0x3e   : > { %493 = vmatmul.mubr.f32.gmra.mrb[10].mxu1 %v199_v55 }
  0x3f   : > { %497 = vmatprep.mubr.f32.mxu1 %v204_v57 }
  0x40   : > { %383 = vmatmul.mubr.f32.gmra.mrb[12].mxu0 %v201_v58 }
  0x41   : > { %387 = vmatprep.mubr.f32.mxu0 %v206_v60 }
  0x42   : > { %498 = vmatmul.mubr.f32.gmra.mrb[12].mxu1 %v203_v59 }
  0x43   : > { %502 = vmatprep.mubr.f32.mxu1 %v208_v61 }
  0x44   : > { %388 = vmatmul.mubr.f32.gmra.mrb[14].mxu0 %v205_v62 }
  0x45   : > { %392 = vmatprep.mubr.f32.mxu0 %v210_v0 }
  0x46   : > { %503 = vmatmul.mubr.f32.gmra.mrb[14].mxu1 %v207_v63 }
  0x47   : > { %507 = vmatprep.mubr.f32.mxu1 %v212_v1 }
  0x48   : > { %393 = vmatmul.mubr.f32.gmra.mrb[16].mxu0 %v209_v2 }
  0x49   : > { %397 = vmatprep.mubr.f32.mxu0 %v214_v4 }
  0x4a   : > { %508 = vmatmul.mubr.f32.gmra.mrb[16].mxu1 %v211_v3 }
  0x4b   : > { %512 = vmatprep.mubr.f32.mxu1 %v216_v5 }
  0x4c   : > { %398 = vmatmul.mubr.f32.gmra.mrb[18].mxu0 %v213_v6 }
  0x4e   : > { %513 = vmatmul.mubr.f32.gmra.mrb[18].mxu1 %v215_v7 }
  0xfb   : > { %v639_v8 = vpop.f32.mrb[0].mxu0 }
  0xfc   : > { %v640_v10 = vpop.f32.mrb[1].mxu0 }
  0xfd   : > { %v701_v11 = vpop.f32.mrb[0].mxu1  ;;  %v641_v12 = vadd.f32 %v640_v10, %v639_v8 }
  0xfe   : > { %v702_v13 = vpop.f32.mrb[1].mxu1 }
  0xff   : > { %v703_v14 = vadd.f32 %v702_v13, %v701_v11  ;;  %v355_v15 = vadd.f32 %v641_v12, %v1088_v9  ;;  %v642_v16 = vpop.f32.mrb[2].mxu0 }
 0x100   : > { %v643_v17 = vpop.f32.mrb[3].mxu0 }
 0x101   : > { %v704_v18 = vpop.f32.mrb[2].mxu1  ;;  %v470_v19 = vadd.f32 %v703_v14, %v355_v15  ;;  %v644_v20 = vadd.f32 %v643_v17, %v642_v16 }
 0x102   : > { %v705_v21 = vpop.f32.mrb[3].mxu1 }
 0x103   : > { %v706_v22 = vadd.f32 %v705_v21, %v704_v18  ;;  %v518_v23 = vmax.f32 %v470_v19, 0.0  ;;  %v360_v24 = vadd.f32 %v644_v20, %v1088_v9  ;;  %v645_v25 = vpop.f32.mrb[4].mxu0 }
 0x104   : > { %v646_v26 = vpop.f32.mrb[5].mxu0 }
 0x105   : > { %v707_v27 = vpop.f32.mrb[4].mxu1  ;;  %529 = vst.msk [vmem:[%s1095_s26] sm:$0xff] %vm528_vm0, %v518_v23  ;;  %v475_v28 = vadd.f32 %v706_v22, %v360_v24  ;;  %v647_v29 = vadd.f32 %v646_v26, %v645_v25 }
 0x106   : > { %v708_v30 = vpop.f32.mrb[5].mxu1 }
 0x107   : > { %v709_v31 = vadd.f32 %v708_v30, %v707_v27  ;;  %v519_v32 = vmax.f32 %v475_v28, 0.0  ;;  %v365_v33 = vadd.f32 %v647_v29, %v1088_v9  ;;  %v648_v34 = vpop.f32.mrb[6].mxu0 }
 0x108   : > { %v649_v35 = vpop.f32.mrb[7].mxu0 }
 0x109   : > { %v710_v36 = vpop.f32.mrb[6].mxu1  ;;  %530 = vst.msk [vmem:[%s1095_s26 + $0x8] sm:$0xff] %vm528_vm0, %v519_v32  ;;  %v480_v37 = vadd.f32 %v709_v31, %v365_v33  ;;  %v650_v38 = vadd.f32 %v649_v35, %v648_v34 }
 0x10a   : > { %v711_v39 = vpop.f32.mrb[7].mxu1 }
 0x10b   : > { %v712_v40 = vadd.f32 %v711_v39, %v710_v36  ;;  %v520_v41 = vmax.f32 %v480_v37, 0.0  ;;  %v370_v42 = vadd.f32 %v650_v38, %v1088_v9  ;;  %v651_v43 = vpop.f32.mrb[8].mxu0 }
 0x10c   : > { %v652_v44 = vpop.f32.mrb[9].mxu0 }
 0x10d   : > { %v713_v45 = vpop.f32.mrb[8].mxu1  ;;  %531 = vst.msk [vmem:[%s1095_s26 + $0x10] sm:$0xff] %vm528_vm0, %v520_v41  ;;  %v485_v46 = vadd.f32 %v712_v40, %v370_v42  ;;  %v653_v47 = vadd.f32 %v652_v44, %v651_v43 }
 0x10e   : > { %v714_v48 = vpop.f32.mrb[9].mxu1 }
 0x10f   : > { %v715_v49 = vadd.f32 %v714_v48, %v713_v45  ;;  %v521_v50 = vmax.f32 %v485_v46, 0.0  ;;  %v375_v51 = vadd.f32 %v653_v47, %v1088_v9  ;;  %v654_v52 = vpop.f32.mrb[10].mxu0 }
 0x110   : > { %v655_v53 = vpop.f32.mrb[11].mxu0 }
 0x111   : > { %v716_v54 = vpop.f32.mrb[10].mxu1  ;;  %532 = vst.msk [vmem:[%s1095_s26 + $0x18] sm:$0xff] %vm528_vm0, %v521_v50  ;;  %v490_v55 = vadd.f32 %v715_v49, %v375_v51  ;;  %v656_v56 = vadd.f32 %v655_v53, %v654_v52 }
 0x112   : > { %v717_v57 = vpop.f32.mrb[11].mxu1 }
 0x113   : > { %v718_v58 = vadd.f32 %v717_v57, %v716_v54  ;;  %v522_v59 = vmax.f32 %v490_v55, 0.0  ;;  %v380_v60 = vadd.f32 %v656_v56, %v1088_v9  ;;  %v657_v61 = vpop.f32.mrb[12].mxu0 }
 0x114   : > { %v658_v62 = vpop.f32.mrb[13].mxu0 }
 0x115   : > { %v719_v63 = vpop.f32.mrb[12].mxu1  ;;  %533 = vst.msk [vmem:[%s1095_s26 + $0x20] sm:$0xff] %vm528_vm0, %v522_v59  ;;  %v495_v0 = vadd.f32 %v718_v58, %v380_v60  ;;  %v659_v1 = vadd.f32 %v658_v62, %v657_v61 }
 0x116   : > { %v720_v2 = vpop.f32.mrb[13].mxu1 }
 0x117   : > { %v721_v3 = vadd.f32 %v720_v2, %v719_v63  ;;  %v523_v4 = vmax.f32 %v495_v0, 0.0  ;;  %v385_v5 = vadd.f32 %v659_v1, %v1088_v9  ;;  %v660_v6 = vpop.f32.mrb[14].mxu0 }
 0x118   : > { %v661_v7 = vpop.f32.mrb[15].mxu0 }
 0x119   : > { %v722_v8 = vpop.f32.mrb[14].mxu1  ;;  %534 = vst.msk [vmem:[%s1095_s26 + $0x28] sm:$0xff] %vm528_vm0, %v523_v4  ;;  %v500_v10 = vadd.f32 %v721_v3, %v385_v5  ;;  %v662_v11 = vadd.f32 %v661_v7, %v660_v6 }
 0x11a   : > { %v723_v12 = vpop.f32.mrb[15].mxu1 }
 0x11b   : > { %v724_v13 = vadd.f32 %v723_v12, %v722_v8  ;;  %v524_v14 = vmax.f32 %v500_v10, 0.0  ;;  %v390_v15 = vadd.f32 %v662_v11, %v1088_v9  ;;  %v663_v16 = vpop.f32.mrb[16].mxu0 }
 0x11c   : > { %v664_v17 = vpop.f32.mrb[17].mxu0 }
 0x11d   : > { %v725_v18 = vpop.f32.mrb[16].mxu1  ;;  %535 = vst.msk [vmem:[%s1095_s26 + $0x30] sm:$0xff] %vm528_vm0, %v524_v14  ;;  %v505_v19 = vadd.f32 %v724_v13, %v390_v15  ;;  %v665_v20 = vadd.f32 %v664_v17, %v663_v16 }
 0x11e   : > { %v726_v21 = vpop.f32.mrb[17].mxu1 }
 0x11f   : > { %v727_v22 = vadd.f32 %v726_v21, %v725_v18  ;;  %v525_v23 = vmax.f32 %v505_v19, 0.0  ;;  %v395_v24 = vadd.f32 %v665_v20, %v1088_v9  ;;  %v666_v25 = vpop.f32.mrb[18].mxu0 }
 0x120   : > { %v667_v26 = vpop.f32.mrb[19].mxu0 }
 0x121   : > { %v728_v27 = vpop.f32.mrb[18].mxu1  ;;  %536 = vst.msk [vmem:[%s1095_s26 + $0x38] sm:$0xff] %vm528_vm0, %v525_v23  ;;  %v510_v28 = vadd.f32 %v727_v22, %v395_v24  ;;  %v668_v29 = vadd.f32 %v667_v26, %v666_v25 }
 0x122   : > { %v729_v30 = vpop.f32.mrb[19].mxu1 }
 0x123   : > { %v730_v31 = vadd.f32 %v729_v30, %v728_v27  ;;  %v526_v32 = vmax.f32 %v510_v28, 0.0  ;;  %v400_v33 = vadd.f32 %v668_v29, %v1088_v9 }
 0x125   : > { %537 = vst.msk [vmem:[%s1095_s26 + $0x40] sm:$0xff] %vm528_vm0, %v526_v32  ;;  %v515_v34 = vadd.f32 %v730_v31, %v400_v33 }
 0x127   : > { %v527_v35 = vmax.f32 %v515_v34, 0.0 }
 0x129   : > { %538 = vst.msk [vmem:[%s1095_s26 + $0x48] sm:$0xff] %vm528_vm0, %v527_v35 }
 0x12a PF: > { %s13_s12 = sadd.s32 1, %s809_s12  }
 0x12b   : > { %p10_p4 = scmp.ge.s32.totalorder %s13_s12, 4  }
 0x12d   :  { %12 = sbr.rel (!%p10_p4) target bundleno = 1 (0x1), region = 62 }

// kernel: policy_forward.6
= control target key start
LH: loop header
LB: loop body
LE: loop exit
PB: predicated region body
PF: predicated region fallthrough
CT: control target
= control target key end

     0   :  { %s1076_s12 = smov 0   ;;  %s1427_s0 = inlined_call_operand.vmem [shape: f32[160,576], index: 0, kind: input, shape index: {}]   ;;  %s1428_s1 = inlined_call_operand.vmem [shape: f32[576,64], index: 1, kind: input, shape index: {}]   ;;  %s1429_s2 = inlined_call_operand.vmem [shape: f32[1,64], index: 2, kind: input, shape index: {}]   ;;  %s1430_s3 = inlined_call_operand.vmem [shape: f32[160,64], index: 3, kind: output, shape index: {}]  }
   0x1 LB: > { %s758_s13 = sadd.s32 4294967295, %s1054_s12   ;;  %p762_p0 = scmp.ge.s32.totalorder %s1054_s12, 1  ;;  %s1054_s12 = sphi %s1076_s12, %s13_s12  }
   0x2   : > { %p139_p1 = scmp.lt.s32.totalorder %s1054_s12, 3 }
   0x4   : > { %p140_p2 = pnand %p762_p0, %p139_p1 }
   0x5   : > { %v243_v0 = vld [vmem:[%s1428_s1 + $0x80] sm:$0xff] (!%p140_p2)  ;;  %v244_v1 = vld [vmem:[%s1428_s1 + $0x88] sm:$0xff] (!%p140_p2)  ;;  %v245_v11 = vld [vmem:[%s1428_s1 + $0x90] sm:$0xff] (!%p140_p2)  ;;  %s1111_s5 = smul.u32 (!%p140_p2), 10, %s758_s13  ;;  %vm306_vm0 = vcmask (!%p140_p2), 523264  }
   0x6   : > { %143 = sbr.rel (%p140_p2) target bundleno = 307 (0x133), region = 32  ;;  %v275_v2 = vld [vmem:[%s1428_s1 + $0x180] sm:$0xff] (!%p140_p2)  ;;  %v951_v3 = vpack.c.bf16 (!%p140_p2), %v244_v1, %v243_v0  ;;  %v276_v4 = vld [vmem:[%s1428_s1 + $0x188] sm:$0xff] (!%p140_p2)  ;;  %v246_v13 = vld [vmem:[%s1428_s1 + $0x98] sm:$0xff] (!%p140_p2) }
   0x7   : > { %v227_v5 = vld [vmem:[%s1428_s1] sm:$0xff] (!%p140_p2)  ;;  %v228_v6 = vld [vmem:[%s1428_s1 + $0x8] sm:$0xff] (!%p140_p2)  ;;  %v983_v7 = vpack.c.bf16 (!%p140_p2), %v276_v4, %v275_v2  ;;  %v277_v14 = vld [vmem:[%s1428_s1 + $0x190] sm:$0xff] (!%p140_p2)  ;;  %v955_v16 = vpack.c.bf16 (!%p140_p2), %v246_v13, %v245_v11  ;;  %p165_p3 = scmp.lt.s32.totalorder (!%p140_p2), %s1111_s5, 19 }
   0x8   : > { %v953_v8 = vpack.c.bf16 (!%p140_p2), %v228_v6, %v227_v5  ;;  %v259_v9 = vld [vmem:[%s1428_s1 + $0x100] sm:$0xff] (!%p140_p2)  ;;  %v260_v10 = vld [vmem:[%s1428_s1 + $0x108] sm:$0xff] (!%p140_p2)  ;;  %952 = vmatprep.subr.bf16.mxu0 (!%p140_p2), %v951_v3  ;;  %v278_v15 = vld [vmem:[%s1428_s1 + $0x198] sm:$0xff] (!%p140_p2) }
   0x9   : > { %v985_v12 = vpack.c.bf16 (!%p140_p2), %v260_v10, %v259_v9  ;;  %984 = vmatprep.subr.bf16.mxu1 (!%p140_p2), %v983_v7  ;;  %v987_v17 = vpack.c.bf16 (!%p140_p2), %v278_v15, %v277_v14  ;;  %v229_v18 = vld [vmem:[%s1428_s1 + $0x10] sm:$0xff] (!%p140_p2)  ;;  %v230_v19 = vld [vmem:[%s1428_s1 + $0x18] sm:$0xff] (!%p140_p2)  ;;  %v247_v23 = vld [vmem:[%s1428_s1 + $0xa0] sm:$0xff] (!%p140_p2) }
   0xa   : > { %954 = vmatpush3.bf16.msra.mxu0 (!%p140_p2), %v953_v8  ;;  %v261_v20 = vld [vmem:[%s1428_s1 + $0x110] sm:$0xff] (!%p140_p2)  ;;  %v957_v21 = vpack.c.bf16 (!%p140_p2), %v230_v19, %v229_v18  ;;  %v262_v22 = vld [vmem:[%s1428_s1 + $0x118] sm:$0xff] (!%p140_p2)  ;;  %v248_v24 = vld [vmem:[%s1428_s1 + $0xa8] sm:$0xff] (!%p140_p2) }
   0xb   : > { %986 = vmatpush3.bf16.msra.mxu1 (!%p140_p2), %v985_v12  ;;  %956 = vmatprep.subr.bf16.mxu0 (!%p140_p2), %v955_v16  ;;  %v989_v25 = vpack.c.bf16 (!%p140_p2), %v262_v22, %v261_v20  ;;  %v959_v26 = vpack.c.bf16 (!%p140_p2), %v248_v24, %v247_v23  ;;  %v279_v27 = vld [vmem:[%s1428_s1 + $0x1a0] sm:$0xff] (!%p140_p2)  ;;  %v280_v28 = vld [vmem:[%s1428_s1 + $0x1a8] sm:$0xff] (!%p140_p2)  ;;  %v249_v35 = vld [vmem:[%s1428_s1 + $0xb0] sm:$0xff] (!%p140_p2) }
   0xc   : > { %988 = vmatprep.subr.bf16.mxu1 (!%p140_p2), %v987_v17  ;;  %v231_v29 = vld [vmem:[%s1428_s1 + $0x20] sm:$0xff] (!%p140_p2)  ;;  %v991_v30 = vpack.c.bf16 (!%p140_p2), %v280_v28, %v279_v27  ;;  %v232_v31 = vld [vmem:[%s1428_s1 + $0x28] sm:$0xff] (!%p140_p2)  ;;  %v250_v36 = vld [vmem:[%s1428_s1 + $0xb8] sm:$0xff] (!%p140_p2) }
   0xd   : > { %v263_v32 = vld [vmem:[%s1428_s1 + $0x120] sm:$0xff]  ;;  %v264_v33 = vld [vmem:[%s1428_s1 + $0x128] sm:$0xff]  ;;  %v961_v34 = vpack.c.bf16 %v232_v31, %v231_v29  ;;  %v281_v37 = vld [vmem:[%s1428_s1 + $0x1b0] sm:$0xff]  ;;  %v963_v39 = vpack.c.bf16 %v250_v36, %v249_v35  ;;  %s1432_s5 = smov (!%p165_p3, %s1111_s5), 19 }
   0xe   : > { %958 = vmatpush3.bf16.msra.mxu0 %v957_v21  ;;  %v993_v38 = vpack.c.bf16 %v264_v33, %v263_v32  ;;  %v282_v40 = vld [vmem:[%s1428_s1 + $0x1b8] sm:$0xff]  ;;  %v233_v41 = vld [vmem:[%s1428_s1 + $0x30] sm:$0xff]  ;;  %v251_v46 = vld [vmem:[%s1428_s1 + $0xc0] sm:$0xff]  ;;  %s1039_s23 = smul.u32 40, %s1432_s5 }
   0xf   : > { %990 = vmatpush3.bf16.msra.mxu1 %v989_v25  ;;  %960 = vmatprep.subr.bf16.mxu0 %v959_v26  ;;  %v234_v42 = vld [vmem:[%s1428_s1 + $0x38] sm:$0xff]  ;;  %v995_v43 = vpack.c.bf16 %v282_v40, %v281_v37  ;;  %v265_v44 = vld [vmem:[%s1428_s1 + $0x130] sm:$0xff]  ;;  %v252_v47 = vld [vmem:[%s1428_s1 + $0xc8] sm:$0xff] }
  0x10   : > { %992 = vmatprep.subr.bf16.mxu1 %v991_v30  ;;  %v266_v45 = vld [vmem:[%s1428_s1 + $0x138] sm:$0xff]  ;;  %v283_v48 = vld [vmem:[%s1428_s1 + $0x1c0] sm:$0xff]  ;;  %v284_v49 = vld [vmem:[%s1428_s1 + $0x1c8] sm:$0xff]  ;;  %v965_v50 = vpack.c.bf16 %v234_v42, %v233_v41  ;;  %v967_v52 = vpack.c.bf16 %v252_v47, %v251_v46  ;;  %s1246_s17 = scalar_lea.vmem %s1427_s0, %s1039_s23 }
  0x11   : > { %v997_v51 = vpack.c.bf16 %v266_v45, %v265_v44  ;;  %v235_v53 = vld [vmem:[%s1428_s1 + $0x40] sm:$0xff]  ;;  %v236_v54 = vld [vmem:[%s1428_s1 + $0x48] sm:$0xff]  ;;  %v999_v56 = vpack.c.bf16 %v284_v49, %v283_v48  ;;  %v253_v58 = vld [vmem:[%s1428_s1 + $0xd0] sm:$0xff] }
  0x12   : > { %962 = vmatpush3.bf16.msra.mxu0 %v961_v34  ;;  %v267_v55 = vld [vmem:[%s1428_s1 + $0x140] sm:$0xff]  ;;  %v268_v57 = vld [vmem:[%s1428_s1 + $0x148] sm:$0xff]  ;;  %v254_v59 = vld [vmem:[%s1428_s1 + $0xd8] sm:$0xff]  ;;  %v969_v62 = vpack.c.bf16 %v236_v54, %v235_v53 }
  0x13   : > { %994 = vmatpush3.bf16.msra.mxu1 %v993_v38  ;;  %964 = vmatprep.subr.bf16.mxu0 %v963_v39  ;;  %v285_v60 = vld [vmem:[%s1428_s1 + $0x1d0] sm:$0xff]  ;;  %v286_v61 = vld [vmem:[%s1428_s1 + $0x1d8] sm:$0xff]  ;;  %v1001_v63 = vpack.c.bf16 %v268_v57, %v267_v55  ;;  %v971_v0 = vpack.c.bf16 %v254_v59, %v253_v58  ;;  %v255_v6 = vld [vmem:[%s1428_s1 + $0xe0] sm:$0xff] }
  0x14   : > { %996 = vmatprep.subr.bf16.mxu1 %v995_v43  ;;  %v237_v1 = vld [vmem:[%s1428_s1 + $0x50] sm:$0xff]  ;;  %v238_v2 = vld [vmem:[%s1428_s1 + $0x58] sm:$0xff]  ;;  %v1003_v4 = vpack.c.bf16 %v286_v61, %v285_v60  ;;  %v256_v7 = vld [vmem:[%s1428_s1 + $0xe8] sm:$0xff] }
  0x15   : > { %v269_v3 = vld [vmem:[%s1428_s1 + $0x150] sm:$0xff]  ;;  %v270_v5 = vld [vmem:[%s1428_s1 + $0x158] sm:$0xff]  ;;  %v287_v8 = vld [vmem:[%s1428_s1 + $0x1e0] sm:$0xff]  ;;  %v973_v10 = vpack.c.bf16 %v238_v2, %v237_v1  ;;  %v975_v14 = vpack.c.bf16 %v256_v7, %v255_v6 }
  0x16   : > { %966 = vmatpush3.bf16.msra.mxu0 %v965_v50  ;;  %v288_v9 = vld [vmem:[%s1428_s1 + $0x1e8] sm:$0xff]  ;;  %v239_v11 = vld [vmem:[%s1428_s1 + $0x60] sm:$0xff]  ;;  %v1005_v13 = vpack.c.bf16 %v270_v5, %v269_v3  ;;  %v180_v17 = vld [vmem:[%s1246_s17 + $0x18] sm:$0xff] }
  0x17   : > { %998 = vmatpush3.bf16.msra.mxu1 %v997_v51  ;;  %968 = vmatprep.subr.bf16.mxu0 %v967_v52  ;;  %v240_v12 = vld [vmem:[%s1428_s1 + $0x68] sm:$0xff]  ;;  %v271_v15 = vld [vmem:[%s1428_s1 + $0x160] sm:$0xff]  ;;  %v1007_v18 = vpack.c.bf16 %v288_v9, %v287_v8  ;;  %v257_v20 = vld [vmem:[%s1428_s1 + $0xf0] sm:$0xff] }
  0x18   : > { %1000 = vmatprep.subr.bf16.mxu1 %v999_v56  ;;  %v178_v16 = vld [vmem:[%s1246_s17 + $0x8] sm:$0xff]  ;;  %v258_v21 = vld [vmem:[%s1428_s1 + $0xf8] sm:$0xff]  ;;  %v289_v22 = vld [vmem:[%s1428_s1 + $0x1f0] sm:$0xff]  ;;  %516 = vmatprep.mubr.f32.mxu1 %v180_v17  ;;  %v977_v24 = vpack.c.bf16 %v240_v12, %v239_v11 }
  0x19   : > { %v272_v19 = vld [vmem:[%s1428_s1 + $0x168] sm:$0xff]  ;;  %401 = vmatprep.mubr.f32.mxu0 %v178_v16  ;;  %v290_v23 = vld [vmem:[%s1428_s1 + $0x1f8] sm:$0xff]  ;;  %v979_v26 = vpack.c.bf16 %v258_v21, %v257_v20  ;;  %v241_v27 = vld [vmem:[%s1428_s1 + $0x70] sm:$0xff] }
  0x1a   : > { %970 = vmatpush3.bf16.msra.mxu0 %v969_v62  ;;  %v1009_v25 = vpack.c.bf16 %v272_v19, %v271_v15  ;;  %v242_v28 = vld [vmem:[%s1428_s1 + $0x78] sm:$0xff]  ;;  %v273_v29 = vld [vmem:[%s1428_s1 + $0x170] sm:$0xff]  ;;  %v1011_v30 = vpack.c.bf16 %v290_v23, %v289_v22  ;;  %v291_v32 = vld [vmem:[%s1428_s1 + $0x200] sm:$0xff] }
  0x1b   : > { %1002 = vmatpush3.bf16.msra.mxu1 %v1001_v63  ;;  %972 = vmatprep.subr.bf16.mxu0 %v971_v0  ;;  %v274_v31 = vld [vmem:[%s1428_s1 + $0x178] sm:$0xff]  ;;  %v292_v33 = vld [vmem:[%s1428_s1 + $0x208] sm:$0xff]  ;;  %v981_v34 = vpack.c.bf16 %v242_v28, %v241_v27  ;;  %v293_v37 = vld [vmem:[%s1428_s1 + $0x210] sm:$0xff] }
  0x1c   : > { %1004 = vmatprep.subr.bf16.mxu1 %v1003_v4  ;;  %v1013_v35 = vpack.c.bf16 %v274_v31, %v273_v29  ;;  %v1015_v36 = vpack.c.bf16 %v292_v33, %v291_v32  ;;  %v294_v38 = vld [vmem:[%s1428_s1 + $0x218] sm:$0xff]  ;;  %v177_v39 = vld [vmem:[%s1246_s17] sm:$0xff]  ;;  %v179_v40 = vld [vmem:[%s1246_s17 + $0x10] sm:$0xff] }
  0x1d   : > { %v183_v41 = vld [vmem:[%s1246_s17 + $0x30] sm:$0xff]  ;;  %v185_v42 = vld [vmem:[%s1246_s17 + $0x40] sm:$0xff]  ;;  %v1019_v43 = vpack.c.bf16 %v294_v38, %v293_v37  ;;  %v296_v45 = vld [vmem:[%s1428_s1 + $0x228] sm:$0xff] }
  0x1e   : > { %974 = vmatpush3.bf16.msra.mxu0 %v973_v10  ;;  %v295_v44 = vld [vmem:[%s1428_s1 + $0x220] sm:$0xff]  ;;  %v182_v46 = vld [vmem:[%s1246_s17 + $0x28] sm:$0xff]  ;;  %v184_v47 = vld [vmem:[%s1246_s17 + $0x38] sm:$0xff] }
  0x1f   : > { %1006 = vmatpush3.bf16.msra.mxu1 %v1005_v13  ;;  %976 = vmatprep.subr.bf16.mxu0 %v975_v14  ;;  %v188_v48 = vld [vmem:[%s1246_s17 + $0x58] sm:$0xff]  ;;  %v190_v49 = vld [vmem:[%s1246_s17 + $0x68] sm:$0xff]  ;;  %v1023_v50 = vpack.c.bf16 %v296_v45, %v295_v44  ;;  %v297_v51 = vld [vmem:[%s1428_s1 + $0x230] sm:$0xff] }
  0x20   : > { %1008 = vmatprep.subr.bf16.mxu1 %v1007_v18  ;;  %v298_v52 = vld [vmem:[%s1428_s1 + $0x238] sm:$0xff]  ;;  %v187_v53 = vld [vmem:[%s1246_s17 + $0x50] sm:$0xff]  ;;  %v189_v54 = vld [vmem:[%s1246_s17 + $0x60] sm:$0xff] }
  0x21   : > { %v193_v55 = vld [vmem:[%s1246_s17 + $0x80] sm:$0xff]  ;;  %v195_v56 = vld [vmem:[%s1246_s17 + $0x90] sm:$0xff]  ;;  %v1027_v57 = vpack.c.bf16 %v298_v52, %v297_v51  ;;  %v192_v58 = vld [vmem:[%s1246_s17 + $0x78] sm:$0xff] }
  0x22   : > { %978 = vmatpush3.bf16.msra.mxu0 %v977_v24  ;;  %v194_v59 = vld [vmem:[%s1246_s17 + $0x88] sm:$0xff]  ;;  %v200_v61 = vld [vmem:[%s1246_s17 + $0xb8] sm:$0xff]  ;;  %v197_v62 = vld [vmem:[%s1246_s17 + $0xa0] sm:$0xff] }
  0x23   : > { %1010 = vmatpush3.bf16.msra.mxu1 %v1009_v25  ;;  %980 = vmatprep.subr.bf16.mxu0 %v979_v26  ;;  %v198_v60 = vld [vmem:[%s1246_s17 + $0xa8] sm:$0xff]  ;;  %v199_v63 = vld [vmem:[%s1246_s17 + $0xb0] sm:$0xff]  ;;  %v205_v1 = vld [vmem:[%s1246_s17 + $0xe0] sm:$0xff] }
  0x24   : > { %1012 = vmatprep.subr.bf16.mxu1 %v1011_v30  ;;  %v203_v0 = vld [vmem:[%s1246_s17 + $0xd0] sm:$0xff]  ;;  %v202_v2 = vld [vmem:[%s1246_s17 + $0xc8] sm:$0xff]  ;;  %v204_v3 = vld [vmem:[%s1246_s17 + $0xd8] sm:$0xff] }
  0x25   : > { %v208_v4 = vld [vmem:[%s1246_s17 + $0xf8] sm:$0xff]  ;;  %v210_v5 = vld [vmem:[%s1246_s17 + $0x108] sm:$0xff]  ;;  %v207_v6 = vld [vmem:[%s1246_s17 + $0xf0] sm:$0xff] }
  0x26   : > { %982 = vmatpush3.bf16.msra.mxu0 %v981_v34  ;;  %v209_v7 = vld [vmem:[%s1246_s17 + $0x100] sm:$0xff]  ;;  %v215_v9 = vld [vmem:[%s1246_s17 + $0x130] sm:$0xff]  ;;  %v212_v10 = vld [vmem:[%s1246_s17 + $0x118] sm:$0xff] }
  0x27   : > { %1014 = vmatpush3.bf16.msra.mxu1 %v1013_v35  ;;  %1016 = vmatprep.subr.bf16.mxu0 %v1015_v36  ;;  %v213_v8 = vld [vmem:[%s1246_s17 + $0x120] sm:$0xff]  ;;  %v214_v11 = vld [vmem:[%s1246_s17 + $0x128] sm:$0xff]  ;;  %v220_v13 = vld [vmem:[%s1246_s17 + $0x158] sm:$0xff] }
  0x28   : > { %1031 = vmatprep.subr.bf16.mxu1 %v1015_v36  ;;  %v218_v12 = vld [vmem:[%s1246_s17 + $0x148] sm:$0xff]  ;;  %v217_v14 = vld [vmem:[%s1246_s17 + $0x140] sm:$0xff]  ;;  %v219_v15 = vld [vmem:[%s1246_s17 + $0x150] sm:$0xff] }
  0x29   : > { %402 = vmatmul.mubr.f32.vlgmr.msra.gmra.mrb[0].mxu0 %v177_v39  ;;  %v223_v16 = vld [vmem:[%s1246_s17 + $0x170] sm:$0xff]  ;;  %v225_v17 = vld [vmem:[%s1246_s17 + $0x180] sm:$0xff]  ;;  %v222_v18 = vld [vmem:[%s1246_s17 + $0x168] sm:$0xff] }
  0x2a   : > { %517 = vmatmul.mubr.f32.vlgmr.msra.gmra.mrb[0].mxu1 %v179_v40  ;;  %1018 = vmatpush3.bf16.msra.mxu0 %v1015_v36  ;;  %v224_v19 = vld [vmem:[%s1246_s17 + $0x178] sm:$0xff]  ;;  %v181_v20 = vld [vmem:[%s1246_s17 + $0x20] sm:$0xff]  ;;  %v211_v21 = vld [vmem:[%s1246_s17 + $0x110] sm:$0xff] }
  0x2b   : > { %406 = vmatprep.mubr.f32.mxu0 %v183_v41  ;;  %521 = vmatprep.mubr.f32.mxu1 %v185_v42  ;;  %v186_v22 = vld [vmem:[%s1246_s17 + $0x48] sm:$0xff]  ;;  %v216_v23 = vld [vmem:[%s1246_s17 + $0x138] sm:$0xff]  ;;  %v191_v24 = vld [vmem:[%s1246_s17 + $0x70] sm:$0xff] }
  0x2c   : > { %1035 = vmatpush3.bf16.msra.mxu1 %v1015_v36  ;;  %1020 = vmatprep.subr.bf16.mxu0 %v1019_v43  ;;  %v221_v25 = vld [vmem:[%s1246_s17 + $0x160] sm:$0xff]  ;;  %v196_v26 = vld [vmem:[%s1246_s17 + $0x98] sm:$0xff]  ;;  %v226_v27 = vld [vmem:[%s1246_s17 + $0x188] sm:$0xff] }
  0x2d   : > { %407 = vmatmul.mubr.f32.gmra.mrb[2].mxu0 %v182_v46  ;;  %1032 = vmatprep.subr.bf16.mxu1 %v1019_v43  ;;  %v201_v28 = vld [vmem:[%s1246_s17 + $0xc0] sm:$0xff]  ;;  %v206_v29 = vld [vmem:[%s1246_s17 + $0xe8] sm:$0xff]  ;;  %s764_s17 = sshll.u32 %s1432_s5, 3 }
  0x2e   : > { %522 = vmatmul.mubr.f32.gmra.mrb[2].mxu1 %v184_v47  ;;  %411 = vmatprep.mubr.f32.mxu0 %v188_v48  ;;  %v1377_v31 = vld [vmem:[%s1429_s2] ss:$0 sm:$0xff]  ;;  %s1399_s18 = scalar_lea.vmem %s1430_s3, %s764_s17 }
  0x2f   : > { %526 = vmatprep.mubr.f32.mxu1 %v190_v49  ;;  %1022 = vmatpush3.bf16.msra.mxu0 %v1019_v43 }
  0x30   : > { %1036 = vmatpush3.bf16.msra.mxu1 %v1019_v43  ;;  %1024 = vmatprep.subr.bf16.mxu0 %v1023_v50 }
  0x31   : > { %412 = vmatmul.mubr.f32.gmra.mrb[4].mxu0 %v187_v53  ;;  %1033 = vmatprep.subr.bf16.mxu1 %v1023_v50 }
  0x32   : > { %527 = vmatmul.mubr.f32.gmra.mrb[4].mxu1 %v189_v54  ;;  %416 = vmatprep.mubr.f32.mxu0 %v193_v55 }
  0x33   : > { %531 = vmatprep.mubr.f32.mxu1 %v195_v56  ;;  %1026 = vmatpush3.bf16.msra.mxu0 %v1023_v50 }
  0x34   : > { %1037 = vmatpush3.bf16.msra.mxu1 %v1023_v50  ;;  %1028 = vmatprep.subr.bf16.mxu0 %v1027_v57 }
  0x35   : > { %417 = vmatmul.mubr.f32.gmra.mrb[6].mxu0 %v192_v58  ;;  %1034 = vmatprep.subr.bf16.mxu1 %v1027_v57 }
  0x36   : > { %532 = vmatmul.mubr.f32.gmra.mrb[6].mxu1 %v194_v59  ;;  %421 = vmatprep.mubr.f32.mxu0 %v198_v60 }
  0x37   : > { %536 = vmatprep.mubr.f32.mxu1 %v200_v61  ;;  %1030 = vmatpush3.bf16.msra.mxu0 %v1027_v57 }
  0x38   : > { %1038 = vmatpush3.bf16.msra.mxu1 %v1027_v57 }
  0x39   : > { %422 = vmatmul.mubr.f32.gmra.mrb[8].mxu0 %v197_v62 }
  0x3a   : > { %537 = vmatmul.mubr.f32.gmra.mrb[8].mxu1 %v199_v63  ;;  %426 = vmatprep.mubr.f32.mxu0 %v203_v0 }
  0x3b   : > { %541 = vmatprep.mubr.f32.mxu1 %v205_v1 }
  0x3d   : > { %427 = vmatmul.mubr.f32.gmra.mrb[10].mxu0 %v202_v2 }
  0x3e   : > { %542 = vmatmul.mubr.f32.gmra.mrb[10].mxu1 %v204_v3  ;;  %431 = vmatprep.mubr.f32.mxu0 %v208_v4 }
  0x3f   : > { %546 = vmatprep.mubr.f32.mxu1 %v210_v5 }
  0x41   : > { %432 = vmatmul.mubr.f32.gmra.mrb[12].mxu0 %v207_v6 }
  0x42   : > { %547 = vmatmul.mubr.f32.gmra.mrb[12].mxu1 %v209_v7  ;;  %436 = vmatprep.mubr.f32.mxu0 %v213_v8 }
  0x43   : > { %551 = vmatprep.mubr.f32.mxu1 %v215_v9 }
  0x45   : > { %437 = vmatmul.mubr.f32.gmra.mrb[14].mxu0 %v212_v10 }
  0x46   : > { %552 = vmatmul.mubr.f32.gmra.mrb[14].mxu1 %v214_v11  ;;  %441 = vmatprep.mubr.f32.mxu0 %v218_v12 }
  0x47   : > { %556 = vmatprep.mubr.f32.mxu1 %v220_v13 }
  0x49   : > { %442 = vmatmul.mubr.f32.gmra.mrb[16].mxu0 %v217_v14 }
  0x4a   : > { %557 = vmatmul.mubr.f32.gmra.mrb[16].mxu1 %v219_v15  ;;  %446 = vmatprep.mubr.f32.mxu0 %v223_v16 }
  0x4b   : > { %561 = vmatprep.mubr.f32.mxu1 %v225_v17 }
  0x4d   : > { %447 = vmatmul.mubr.f32.gmra.mrb[18].mxu0 %v222_v18 }
  0x4e   : > { %562 = vmatmul.mubr.f32.gmra.mrb[18].mxu1 %v224_v19  ;;  %936 = vmatprep.mubr.msk.f32.mxu0 %vm306_vm0, %v181_v20 }
  0x4f   : > { %945 = vmatprep.mubr.msk.f32.mxu1 %vm306_vm0, %v211_v21 }
  0x51   : > { %937 = vmatmul.mubr.msk.f32.vlgmr.msra.gmra.mrb[20].mxu0 %vm306_vm0, %v186_v22 }
  0x52   : > { %946 = vmatmul.mubr.msk.f32.vlgmr.msra.gmra.mrb[20].mxu1 %vm306_vm0, %v216_v23  ;;  %939 = vmatprep.mubr.msk.f32.mxu0 %vm306_vm0, %v191_v24 }
  0x53   : > { %948 = vmatprep.mubr.msk.f32.mxu1 %vm306_vm0, %v221_v25 }
  0x55   : > { %940 = vmatmul.mubr.msk.f32.gmra.mrb[22].mxu0 %vm306_vm0, %v196_v26 }
  0x56   : > { %949 = vmatmul.mubr.msk.f32.gmra.mrb[22].mxu1 %vm306_vm0, %v226_v27  ;;  %942 = vmatprep.mubr.msk.f32.mxu0 %vm306_vm0, %v201_v28 }
  0x59   : > { %943 = vmatmul.mubr.msk.f32.gmra.mrb[24].mxu0 %vm306_vm0, %v206_v29 }
  0xfc   : > { %v810_v30 = vpop.f32.mrb[0].mxu0 }
  0xfd   : > { %v811_v32 = vpop.f32.mrb[1].mxu0  ;;  %v872_v33 = vpop.f32.mrb[0].mxu1 }
  0xfe   : > { %v812_v34 = vadd.f32 %v811_v32, %v810_v30  ;;  %v873_v35 = vpop.f32.mrb[1].mxu1 }
  0xff   : > { %v874_v36 = vadd.f32 %v873_v35, %v872_v33 }
 0x100   : > { %v404_v37 = vadd.f32 %v812_v34, %v1377_v31  ;;  %v813_v38 = vpop.f32.mrb[2].mxu0 }
 0x101   : > { %v814_v39 = vpop.f32.mrb[3].mxu0  ;;  %v875_v40 = vpop.f32.mrb[2].mxu1 }
 0x102   : > { %v815_v41 = vadd.f32 %v814_v39, %v813_v38  ;;  %v876_v42 = vpop.f32.mrb[3].mxu1  ;;  %v1380_v43 = vadd.f32 %v874_v36, %v404_v37 }
 0x103   : > { %v877_v44 = vadd.f32 %v876_v42, %v875_v40 }
 0x104   : > { %v409_v45 = vadd.f32 %v815_v41, %v1377_v31  ;;  %v816_v46 = vpop.f32.mrb[4].mxu0 }
 0x105   : > { %v817_v47 = vpop.f32.mrb[5].mxu0  ;;  %v878_v48 = vpop.f32.mrb[4].mxu1 }
 0x106   : > { %v818_v49 = vadd.f32 %v817_v47, %v816_v46  ;;  %v879_v50 = vpop.f32.mrb[5].mxu1  ;;  %v524_v51 = vadd.f32 %v877_v44, %v409_v45 }
 0x107   : > { %v880_v52 = vadd.f32 %v879_v50, %v878_v48 }
 0x108   : > { %v414_v53 = vadd.f32 %v818_v49, %v1377_v31  ;;  %v819_v54 = vpop.f32.mrb[6].mxu0 }
 0x109   : > { %v820_v55 = vpop.f32.mrb[7].mxu0  ;;  %v881_v56 = vpop.f32.mrb[6].mxu1 }
 0x10a   : > { %v821_v57 = vadd.f32 %v820_v55, %v819_v54  ;;  %v882_v58 = vpop.f32.mrb[7].mxu1  ;;  %v1384_v59 = vadd.f32 %v880_v52, %v414_v53 }
 0x10b   : > { %v883_v60 = vadd.f32 %v882_v58, %v881_v56 }
 0x10c   : > { %v419_v61 = vadd.f32 %v821_v57, %v1377_v31  ;;  %v822_v62 = vpop.f32.mrb[8].mxu0 }
 0x10d   : > { %v823_v63 = vpop.f32.mrb[9].mxu0  ;;  %v884_v0 = vpop.f32.mrb[8].mxu1 }
 0x10e   : > { %v824_v1 = vadd.f32 %v823_v63, %v822_v62  ;;  %v885_v2 = vpop.f32.mrb[9].mxu1  ;;  %v534_v3 = vadd.f32 %v883_v60, %v419_v61 }
 0x10f   : > { %v886_v4 = vadd.f32 %v885_v2, %v884_v0 }
 0x110   : > { %v424_v5 = vadd.f32 %v824_v1, %v1377_v31  ;;  %v825_v6 = vpop.f32.mrb[10].mxu0 }
 0x111   : > { %v826_v7 = vpop.f32.mrb[11].mxu0  ;;  %v887_v8 = vpop.f32.mrb[10].mxu1 }
 0x112   : > { %v827_v9 = vadd.f32 %v826_v7, %v825_v6  ;;  %v888_v10 = vpop.f32.mrb[11].mxu1  ;;  %v1388_v11 = vadd.f32 %v886_v4, %v424_v5 }
 0x113   : > { %v889_v12 = vadd.f32 %v888_v10, %v887_v8 }
 0x114   : > { %v429_v13 = vadd.f32 %v827_v9, %v1377_v31  ;;  %v828_v14 = vpop.f32.mrb[12].mxu0 }
 0x115   : > { %v829_v15 = vpop.f32.mrb[13].mxu0  ;;  %v890_v16 = vpop.f32.mrb[12].mxu1 }
 0x116   : > { %v830_v17 = vadd.f32 %v829_v15, %v828_v14  ;;  %v891_v18 = vpop.f32.mrb[13].mxu1  ;;  %v544_v19 = vadd.f32 %v889_v12, %v429_v13 }
 0x117   : > { %v892_v20 = vadd.f32 %v891_v18, %v890_v16 }
 0x118   : > { %v434_v21 = vadd.f32 %v830_v17, %v1377_v31  ;;  %v831_v22 = vpop.f32.mrb[14].mxu0 }
 0x119   : > { %v832_v23 = vpop.f32.mrb[15].mxu0  ;;  %v893_v24 = vpop.f32.mrb[14].mxu1 }
 0x11a   : > { %v833_v25 = vadd.f32 %v832_v23, %v831_v22  ;;  %v894_v26 = vpop.f32.mrb[15].mxu1  ;;  %v549_v27 = vadd.f32 %v892_v20, %v434_v21 }
 0x11b   : > { %v895_v28 = vadd.f32 %v894_v26, %v893_v24 }
 0x11c   : > { %v439_v29 = vadd.f32 %v833_v25, %v1377_v31  ;;  %v834_v30 = vpop.f32.mrb[16].mxu0 }
 0x11d   : > { %v835_v32 = vpop.f32.mrb[17].mxu0  ;;  %v896_v33 = vpop.f32.mrb[16].mxu1 }
 0x11e   : > { %v836_v34 = vadd.f32 %v835_v32, %v834_v30  ;;  %v897_v35 = vpop.f32.mrb[17].mxu1  ;;  %v554_v36 = vadd.f32 %v895_v28, %v439_v29 }
 0x11f   : > { %v898_v37 = vadd.f32 %v897_v35, %v896_v33 }
 0x120   : > { %v444_v38 = vadd.f32 %v836_v34, %v1377_v31  ;;  %v837_v39 = vpop.f32.mrb[18].mxu0 }
 0x121   : > { %v838_v40 = vpop.f32.mrb[19].mxu0  ;;  %v899_v41 = vpop.f32.mrb[18].mxu1 }
 0x122   : > { %v839_v42 = vadd.f32 %v838_v40, %v837_v39  ;;  %v900_v44 = vpop.f32.mrb[19].mxu1  ;;  %v559_v45 = vadd.f32 %v898_v37, %v444_v38 }
 0x123   : > { %v901_v46 = vadd.f32 %v900_v44, %v899_v41 }
 0x124   : > { %v449_v47 = vadd.f32 %v839_v42, %v1377_v31  ;;  %v938_v48 = vpop.f32.mrb[20].mxu0 }
 0x125   : > { %v639_v49 = vadd.f32 %v938_v48, %v524_v51  ;;  %v947_v50 = vpop.f32.mrb[20].mxu1  ;;  %v633_v52 = vpop.f32.mrb[21].mxu0 }
 0x126   : > { %v669_v53 = vadd.f32 %v947_v50, %v554_v36  ;;  %v634_v54 = vadd.f32 %v633_v52, %v1380_v43  ;;  %v663_v55 = vpop.f32.mrb[21].mxu1  ;;  %v564_v56 = vadd.f32 %v901_v46, %v449_v47 }
 0x127   : > { %v683_v57 = vmax.f32 %v639_v49, 0.0  ;;  %v664_v31 = vadd.f32 %v663_v55, %v549_v27 }
 0x128   : > { %v689_v58 = vmax.f32 %v669_v53, 0.0  ;;  %v682_v51 = vmax.f32 %v634_v54, 0.0  ;;  %v941_v60 = vpop.f32.mrb[22].mxu0 }
 0x129   : > { %693 = vst.msk [vmem:[%s1399_s18 + $0x8] sm:$0xff] %vm306_vm0, %v683_v57  ;;  %v688_v61 = vmax.f32 %v664_v31, 0.0  ;;  %v649_v62 = vadd.f32 %v941_v60, %v534_v3  ;;  %v950_v63 = vpop.f32.mrb[22].mxu1  ;;  %v643_v0 = vpop.f32.mrb[23].mxu0 }
 0x12a   : > { %699 = vst.msk [vmem:[%s1399_s18 + $0x38] sm:$0xff] %vm306_vm0, %v689_v58  ;;  %692 = vst.msk [vmem:[%s1399_s18] sm:$0xff] %vm306_vm0, %v682_v51  ;;  %v679_v43 = vadd.f32 %v950_v63, %v564_v56  ;;  %v644_v1 = vadd.f32 %v643_v0, %v1384_v59  ;;  %v673_v2 = vpop.f32.mrb[23].mxu1 }
 0x12b   : > { %698 = vst.msk [vmem:[%s1399_s18 + $0x30] sm:$0xff] %vm306_vm0, %v688_v61  ;;  %v685_v4 = vmax.f32 %v649_v62, 0.0  ;;  %v674_v5 = vadd.f32 %v673_v2, %v559_v45 }
 0x12c   : > { %v691_v3 = vmax.f32 %v679_v43, 0.0  ;;  %v684_v6 = vmax.f32 %v644_v1, 0.0  ;;  %v944_v7 = vpop.f32.mrb[24].mxu0 }
 0x12d   : > { %695 = vst.msk [vmem:[%s1399_s18 + $0x18] sm:$0xff] %vm306_vm0, %v685_v4  ;;  %v690_v8 = vmax.f32 %v674_v5, 0.0  ;;  %v659_v9 = vadd.f32 %v944_v7, %v544_v19  ;;  %v653_v10 = vpop.f32.mrb[25].mxu0 }
 0x12e   : > { %701 = vst.msk [vmem:[%s1399_s18 + $0x48] sm:$0xff] %vm306_vm0, %v691_v3  ;;  %694 = vst.msk [vmem:[%s1399_s18 + $0x10] sm:$0xff] %vm306_vm0, %v684_v6  ;;  %v654_v59 = vadd.f32 %v653_v10, %v1388_v11 }
 0x12f   : > { %700 = vst.msk [vmem:[%s1399_s18 + $0x40] sm:$0xff] %vm306_vm0, %v690_v8  ;;  %v687_v12 = vmax.f32 %v659_v9, 0.0 }
 0x130   : > { %v686_v13 = vmax.f32 %v654_v59, 0.0 }
 0x131   : > { %697 = vst.msk [vmem:[%s1399_s18 + $0x28] sm:$0xff] %vm306_vm0, %v687_v12 }
 0x132   : > { %696 = vst.msk [vmem:[%s1399_s18 + $0x20] sm:$0xff] %vm306_vm0, %v686_v13 }
 0x133 PF: > { %s13_s12 = sadd.s32 1, %s1054_s12  }
 0x134   : > { %p10_p4 = scmp.ge.s32.totalorder %s13_s12, 4  }
 0x136   :  { %12 = sbr.rel (!%p10_p4) target bundleno = 1 (0x1), region = 62 }

// kernel: policy_forward.7
= control target key start
LH: loop header
LB: loop body
LE: loop exit
PB: predicated region body
PF: predicated region fallthrough
CT: control target
= control target key end

     0   :  { %16 = vsyncpa [#allocation4], 0  ;;  %s5509_s17 = smov 0   ;;  %s6658_s0 = inlined_call_operand.vmem [shape: f32[2,5120], index: 0, kind: input, shape index: {}]   ;;  %s6659_s1 = inlined_call_operand.vmem [shape: bf16[5120,512], index: 1, kind: input, shape index: {}]   ;;  %s6660_s2 = inlined_call_operand.vmem [shape: f32[1,512], index: 2, kind: input, shape index: {}]   ;;  %s6661_s3 = inlined_call_operand.vmem [shape: f32[2,24], index: 3, kind: input, shape index: {}]   ;;  %s6662_s4 = inlined_call_operand.vmem [shape: f32[24,192], index: 4, kind: input, shape index: {}]   ;;  %s6663_s5 = inlined_call_operand.vmem [shape: f32[1,192], index: 5, kind: input, shape index: {}]   ;;  %s6664_s6 = inlined_call_operand.vmem [shape: bf16[512,512], index: 6, kind: input, shape index: {}]   ;;  %s6665_s7 = inlined_call_operand.vmem [shape: bf16[192,512], index: 7, kind: input, shape index: {}]   ;;  %s6666_s8 = inlined_call_operand.vmem [shape: f32[1,512], index: 8, kind: input, shape index: {}]   ;;  %s6667_s9 = inlined_call_operand.vmem [shape: f32[512,128], index: 9, kind: input, shape index: {}]   ;;  %s6668_s10 = inlined_call_operand.vmem [shape: f32[1,128], index: 10, kind: input, shape index: {}]   ;;  %s6669_s11 = inlined_call_operand.hbm [shape: f32[2,128], index: 11, kind: output, shape index: {}]  }
   0x1 LB: > { %s5515_s18 = sadd.s32 4294967295, %s5443_s17   ;;  %p4126_p0 = scmp.ge.s32.totalorder %s5443_s17, 1  ;;  %s5443_s17 = sphi %s5509_s17, %s22_s17  }
   0x2   : > { %p346_p1 = scmp.lt.s32.totalorder %s5443_s17, 6 }
   0x4   : > { %p347_p2 = pnand %p4126_p0, %p346_p1 }
   0x5   : > { %s4127_s19 = sshll.u32 (!%p347_p2), %s5515_s18, 3  ;;  %s4129_s20 = sshll.u32 (!%p347_p2), %s5515_s18, 7 }
   0x6   : > { %350 = sbr.rel (%p347_p2) target bundleno = 1316 (0x524), region = 64  ;;  %p388_p3 = scmp.lt.s32.totalorder (!%p347_p2), %s4127_s19, 39 }
   0x7   : > { %p394_p4 = scmp.lt.s32.totalorder (!%p347_p2), %s4129_s20, 639  ;;  %p4132_p5 = scmp.ne.s32.totalorder (!%p347_p2), %s5515_s18, 0 }
   0xd   : > { %s6671_s19 = smov (!%p388_p3, %s4127_s19), 39  ;;  %s6673_s20 = smov (!%p394_p4, %s4129_s20), 639 }
   0xe   : > { %s4128_s21 = sshll.u32 %s6671_s19, 1  ;;  %s4574_s25 = sshll.u32 %s6673_s20, 4  ;;  %v5445_v0 = vmov (!%p4132_p5), 0.0  }
   0xf   : > { %s5524_s24 = scalar_lea.vmem %s6658_s0, %s4128_s21  ;;  %s5529_s28 = scalar_lea.vmem %s6659_s1, %s4574_s25  ;;  %405 = vst [vmem:[#allocation2] sm:$0xff] (!%p4132_p5), %v5445_v0 }
  0x10   : > { %404 = sbr.rel (%p4132_p5) target bundleno = 23 (0x17), region = 68 }
  0x17 PF: > { %v4755_v1 = vld [vmem:[%s5529_s28 + $0x4] ss:$16 sps:$4 sm:$0xff]   ;;  %v4757_v2 = vld [vmem:[%s5529_s28 + $0xc] ss:$16 sps:$4 sm:$0xff]   ;;  %v4759_v3 = vld [vmem:[%s5529_s28] ss:$16 sps:$4 sm:$0xff]   ;;  %v415_v39 = vlaneseq }
  0x18   : > { %1997 = vmatprep.subr.bf16.mxu0 %v4755_v1  ;;  %v4760_v4 = vld [vmem:[%s5529_s28 + $0x8] ss:$16 sps:$4 sm:$0xff]   ;;  %2161 = vmatprep.subr.bf16.mxu1 %v4757_v2  ;;  %v4761_v5 = vld [vmem:[%s5529_s28 + $0x24] ss:$16 sps:$4 sm:$0xff]   ;;  %v4763_v6 = vld [vmem:[%s5529_s28 + $0x2c] ss:$16 sps:$4 sm:$0xff]  }
  0x19   : > { %1998 = vmatpush1.bf16.msra.mxu0 %v4759_v3  ;;  %2162 = vmatpush1.bf16.msra.mxu1 %v4760_v4  ;;  %v4765_v7 = vld [vmem:[%s5529_s28 + $0x20] ss:$16 sps:$4 sm:$0xff]   ;;  %v4766_v8 = vld [vmem:[%s5529_s28 + $0x28] ss:$16 sps:$4 sm:$0xff]   ;;  %v4767_v9 = vld [vmem:[%s5529_s28 + $0x44] ss:$16 sps:$4 sm:$0xff]  }
  0x1a   : > { %1999 = vmatprep.subr.bf16.mxu0 %v4761_v5  ;;  %2163 = vmatprep.subr.bf16.mxu1 %v4763_v6  ;;  %v4769_v10 = vld [vmem:[%s5529_s28 + $0x4c] ss:$16 sps:$4 sm:$0xff]   ;;  %v4771_v11 = vld [vmem:[%s5529_s28 + $0x40] ss:$16 sps:$4 sm:$0xff]   ;;  %v4772_v12 = vld [vmem:[%s5529_s28 + $0x48] ss:$16 sps:$4 sm:$0xff]  }
  0x1b   : > { %v4773_v13 = vld [vmem:[%s5529_s28 + $0x64] ss:$16 sps:$4 sm:$0xff]   ;;  %v4775_v14 = vld [vmem:[%s5529_s28 + $0x6c] ss:$16 sps:$4 sm:$0xff]   ;;  %v4777_v15 = vld [vmem:[%s5529_s28 + $0x60] ss:$16 sps:$4 sm:$0xff]  }
  0x1c   : > { %v4778_v16 = vld [vmem:[%s5529_s28 + $0x68] ss:$16 sps:$4 sm:$0xff]   ;;  %v4779_v17 = vld [vmem:[%s5529_s28 + $0x84] ss:$16 sps:$4 sm:$0xff]   ;;  %v4781_v18 = vld [vmem:[%s5529_s28 + $0x8c] ss:$16 sps:$4 sm:$0xff]  }
  0x1d   : > { %2000 = vmatpush1.bf16.msra.mxu0 %v4765_v7  ;;  %2164 = vmatpush1.bf16.msra.mxu1 %v4766_v8  ;;  %v4783_v19 = vld [vmem:[%s5529_s28 + $0x80] ss:$16 sps:$4 sm:$0xff]   ;;  %v4784_v20 = vld [vmem:[%s5529_s28 + $0x88] ss:$16 sps:$4 sm:$0xff]   ;;  %v4785_v21 = vld [vmem:[%s5529_s28 + $0xa4] ss:$16 sps:$4 sm:$0xff]  }
  0x1e   : > { %2001 = vmatprep.subr.bf16.mxu0 %v4767_v9  ;;  %2165 = vmatprep.subr.bf16.mxu1 %v4769_v10  ;;  %v4787_v22 = vld [vmem:[%s5529_s28 + $0xac] ss:$16 sps:$4 sm:$0xff]   ;;  %v4789_v23 = vld [vmem:[%s5529_s28 + $0xa0] ss:$16 sps:$4 sm:$0xff]   ;;  %v4790_v24 = vld [vmem:[%s5529_s28 + $0xa8] ss:$16 sps:$4 sm:$0xff]  }
  0x1f   : > { %v4791_v25 = vld [vmem:[%s5529_s28 + $0xc4] ss:$16 sps:$4 sm:$0xff]   ;;  %v4793_v26 = vld [vmem:[%s5529_s28 + $0xcc] ss:$16 sps:$4 sm:$0xff]   ;;  %v4795_v27 = vld [vmem:[%s5529_s28 + $0xc0] ss:$16 sps:$4 sm:$0xff]  }
  0x20   : > { %v4796_v28 = vld [vmem:[%s5529_s28 + $0xc8] ss:$16 sps:$4 sm:$0xff]   ;;  %v4797_v29 = vld [vmem:[%s5529_s28 + $0xe4] ss:$16 sps:$4 sm:$0xff]   ;;  %v4799_v30 = vld [vmem:[%s5529_s28 + $0xec] ss:$16 sps:$4 sm:$0xff]  }
  0x21   : > { %2002 = vmatpush1.bf16.msra.mxu0 %v4771_v11  ;;  %2166 = vmatpush1.bf16.msra.mxu1 %v4772_v12  ;;  %v4801_v31 = vld [vmem:[%s5529_s28 + $0xe0] ss:$16 sps:$4 sm:$0xff]   ;;  %v4802_v32 = vld [vmem:[%s5529_s28 + $0xe8] ss:$16 sps:$4 sm:$0xff]   ;;  %v4803_v33 = vld [vmem:[%s5529_s28 + $0x104] ss:$16 sps:$4 sm:$0xff]  }
  0x22   : > { %2003 = vmatprep.subr.bf16.mxu0 %v4773_v13  ;;  %2167 = vmatprep.subr.bf16.mxu1 %v4775_v14  ;;  %v4805_v34 = vld [vmem:[%s5529_s28 + $0x10c] ss:$16 sps:$4 sm:$0xff]   ;;  %v4807_v35 = vld [vmem:[%s5529_s28 + $0x100] ss:$16 sps:$4 sm:$0xff]   ;;  %v4808_v36 = vld [vmem:[%s5529_s28 + $0x108] ss:$16 sps:$4 sm:$0xff]  }
  0x23   : > { %v5446_v37 = vmov 1983009808   ;;  %v4809_v40 = vld [vmem:[%s5529_s28 + $0x124] ss:$16 sps:$4 sm:$0xff]   ;;  %v4811_v41 = vld [vmem:[%s5529_s28 + $0x12c] ss:$16 sps:$4 sm:$0xff]  }
  0x24   : > { %v413_v38 = vunpack.c.l.s4 %v5446_v37  ;;  %v4813_v42 = vld [vmem:[%s5529_s28 + $0x120] ss:$16 sps:$4 sm:$0xff]   ;;  %v5571_v44 = vshrl.u32 %v415_v39, 7  ;;  %v4814_v45 = vld [vmem:[%s5529_s28 + $0x128] ss:$16 sps:$4 sm:$0xff]   ;;  %p4389_p6 = scmp.ne.s32.totalorder %s5515_s18, 4 }
  0x25   : > { %2004 = vmatpush1.bf16.msra.mxu0 %v4777_v15  ;;  %2168 = vmatpush1.bf16.msra.mxu1 %v4778_v16  ;;  %v4815_v46 = vld [vmem:[%s5529_s28 + $0x144] ss:$16 sps:$4 sm:$0xff]   ;;  %v4817_v47 = vld [vmem:[%s5529_s28 + $0x14c] ss:$16 sps:$4 sm:$0xff]   ;;  %v4819_v48 = vld [vmem:[%s5529_s28 + $0x140] ss:$16 sps:$4 sm:$0xff]  }
  0x26   : > { %2005 = vmatprep.subr.bf16.mxu0 %v4779_v17  ;;  %2169 = vmatprep.subr.bf16.mxu1 %v4781_v18  ;;  %v414_v43 = vunpack.c.0.s8 %v413_v38  ;;  %v4820_v49 = vld [vmem:[%s5529_s28 + $0x148] ss:$16 sps:$4 sm:$0xff]   ;;  %v4821_v51 = vld [vmem:[%s5529_s28 + $0x164] ss:$16 sps:$4 sm:$0xff]   ;;  %v4823_v52 = vld [vmem:[%s5529_s28 + $0x16c] ss:$16 sps:$4 sm:$0xff]  }
  0x27   : > { %v407_v53 = vld [vmem:[%s5524_s24] sm:$0xff]  ;;  %v4826_v56 = vld [vmem:[%s5529_s28 + $0x168] ss:$16 sps:$4 sm:$0xff]   ;;  %v4829_v58 = vld [vmem:[%s5529_s28 + $0x18c] ss:$16 sps:$4 sm:$0xff]   ;;  %vm2411_vm0 = vcmask (!%p4389_p6), 195584  }
  0x28   : > { %v5579_v50 = vsub.s32 %v414_v43, %v5571_v44  ;;  %v4825_v54 = vld [vmem:[%s5529_s28 + $0x160] ss:$16 sps:$4 sm:$0xff]   ;;  %v4827_v57 = vld [vmem:[%s5529_s28 + $0x184] ss:$16 sps:$4 sm:$0xff]   ;;  %v4832_v62 = vld [vmem:[%s5529_s28 + $0x188] ss:$16 sps:$4 sm:$0xff]   ;;  %v411_v5 = vcombine.high %v407_v53, %v407_v53 }
  0x29   : > { %2006 = vmatpush1.bf16.msra.mxu0 %v4783_v19  ;;  %2170 = vmatpush1.bf16.msra.mxu1 %v4784_v20  ;;  %v4831_v60 = vld [vmem:[%s5529_s28 + $0x180] ss:$16 sps:$4 sm:$0xff]   ;;  %v4833_v63 = vld [vmem:[%s5529_s28 + $0x1a4] ss:$16 sps:$4 sm:$0xff]   ;;  %v4835_v0 = vld [vmem:[%s5529_s28 + $0x1ac] ss:$16 sps:$4 sm:$0xff]  }
  0x2a   : > { %2007 = vmatprep.subr.bf16.mxu0 %v4785_v21  ;;  %2171 = vmatprep.subr.bf16.mxu1 %v4787_v22  ;;  %v418_v55 = vrot.slane %v407_v53, %v5579_v50  ;;  %v4837_v1 = vld [vmem:[%s5529_s28 + $0x1a0] ss:$16 sps:$4 sm:$0xff]   ;;  %v4838_v2 = vld [vmem:[%s5529_s28 + $0x1a8] ss:$16 sps:$4 sm:$0xff]   ;;  %v4839_v3 = vld [vmem:[%s5529_s28 + $0x1c4] ss:$16 sps:$4 sm:$0xff]   ;;  %v5602_v10 = vrot.slane %v411_v5, %v5579_v50 }
  0x2b   : > { %v4841_v4 = vld [vmem:[%s5529_s28 + $0x1cc] ss:$16 sps:$4 sm:$0xff]   ;;  %v4843_v6 = vld [vmem:[%s5529_s28 + $0x1c0] ss:$16 sps:$4 sm:$0xff]   ;;  %v4844_v7 = vld [vmem:[%s5529_s28 + $0x1c8] ss:$16 sps:$4 sm:$0xff]  }
  0x2c   : > { %v426_v59 = vcombine.high %v418_v55, %v418_v55  ;;  %v4845_v8 = vld [vmem:[%s5529_s28 + $0x1e4] ss:$16 sps:$4 sm:$0xff]   ;;  %v4847_v9 = vld [vmem:[%s5529_s28 + $0x1ec] ss:$16 sps:$4 sm:$0xff]   ;;  %v4849_v11 = vld [vmem:[%s5529_s28 + $0x1e0] ss:$16 sps:$4 sm:$0xff]   ;;  %v427_v15 = vcombine.high %v5602_v10, %v5602_v10  ;;  %v453_v17 = vpack.c.bf16 %v418_v55, %v418_v55 }
  0x2d   : > { %2008 = vmatpush1.bf16.msra.mxu0 %v4789_v23  ;;  %2172 = vmatpush1.bf16.msra.mxu1 %v4790_v24  ;;  %v4850_v12 = vld [vmem:[%s5529_s28 + $0x1e8] ss:$16 sps:$4 sm:$0xff]   ;;  %v4854_v13 = vld [vmem:[%s5529_s28 + $0x204] ss:$16 sps:$4 sm:$0xff]   ;;  %v4857_v14 = vld [vmem:[%s5529_s28 + $0x20c] ss:$16 sps:$4 sm:$0xff]  }
  0x2e   : > { %2009 = vmatprep.subr.bf16.mxu0 %v4791_v25  ;;  %2173 = vmatprep.subr.bf16.mxu1 %v4793_v26  ;;  %v454_v61 = vpack.c.bf16 %v426_v59, %v426_v59  ;;  %v4852_v16 = vld [vmem:[%s5529_s28 + $0x200] ss:$16 sps:$4 sm:$0xff]   ;;  %v4855_v18 = vld [vmem:[%s5529_s28 + $0x208] ss:$16 sps:$4 sm:$0xff]   ;;  %v4860_v19 = vld [vmem:[%s5529_s28 + $0x224] ss:$16 sps:$4 sm:$0xff]   ;;  %v456_v21 = vpack.c.bf16 %v427_v15, %v427_v15 }
  0x2f   : > { %v4863_v20 = vld [vmem:[%s5529_s28 + $0x22c] ss:$16 sps:$4 sm:$0xff]   ;;  %v4858_v22 = vld [vmem:[%s5529_s28 + $0x220] ss:$16 sps:$4 sm:$0xff]   ;;  %v4861_v23 = vld [vmem:[%s5529_s28 + $0x228] ss:$16 sps:$4 sm:$0xff]  }
  0x30   : > { %2029 = vmatprep.mubr.bf16.mxu0 %v454_v61  ;;  %2193 = vmatprep.mubr.bf16.mxu1 %v454_v61  ;;  %v4866_v24 = vld [vmem:[%s5529_s28 + $0x244] ss:$16 sps:$4 sm:$0xff]   ;;  %v4869_v25 = vld [vmem:[%s5529_s28 + $0x24c] ss:$16 sps:$4 sm:$0xff]   ;;  %v4864_v26 = vld [vmem:[%s5529_s28 + $0x240] ss:$16 sps:$4 sm:$0xff]  }
  0x31   : > { %2010 = vmatpush1.bf16.msra.mxu0 %v4795_v27  ;;  %2174 = vmatpush1.bf16.msra.mxu1 %v4796_v28  ;;  %v4867_v27 = vld [vmem:[%s5529_s28 + $0x248] ss:$16 sps:$4 sm:$0xff]   ;;  %v4872_v28 = vld [vmem:[%s5529_s28 + $0x264] ss:$16 sps:$4 sm:$0xff]   ;;  %v4887_v37 = vld [vmem:[%s5529_s28 + $0x2ac] ss:$16 sps:$4 sm:$0xff]  }
  0x32   : > { %2011 = vmatprep.subr.bf16.mxu0 %v4797_v29  ;;  %2175 = vmatprep.subr.bf16.mxu1 %v4799_v30  ;;  %v4875_v29 = vld [vmem:[%s5529_s28 + $0x26c] ss:$16 sps:$4 sm:$0xff]   ;;  %v4870_v30 = vld [vmem:[%s5529_s28 + $0x260] ss:$16 sps:$4 sm:$0xff]   ;;  %v4885_v39 = vld [vmem:[%s5529_s28 + $0x2a8] ss:$16 sps:$4 sm:$0xff]  }
  0x33   : > { %v4882_v38 = vld [vmem:[%s5529_s28 + $0x2a0] ss:$16 sps:$4 sm:$0xff]   ;;  %v4891_v43 = vld [vmem:[%s5529_s28 + $0x2c8] ss:$16 sps:$4 sm:$0xff]   ;;  %v4911_v55 = vld [vmem:[%s5529_s28 + $0x32c] ss:$16 sps:$4 sm:$0xff]  }
  0x34   : > { %v4903_v53 = vld [vmem:[%s5529_s28 + $0x308] ss:$16 sps:$4 sm:$0xff]   ;;  %v4917_v59 = vld [vmem:[%s5529_s28 + $0x34c] ss:$16 sps:$4 sm:$0xff]   ;;  %v4944_v15 = vld [vmem:[%s5529_s28 + $0x3e4] ss:$16 sps:$4 sm:$0xff]  }
  0x35   : > { %2012 = vmatpush1.bf16.msra.mxu0 %v4801_v31  ;;  %2176 = vmatpush1.bf16.msra.mxu1 %v4802_v32  ;;  %v4873_v31 = vld [vmem:[%s5529_s28 + $0x268] ss:$16 sps:$4 sm:$0xff]   ;;  %v4878_v32 = vld [vmem:[%s5529_s28 + $0x284] ss:$16 sps:$4 sm:$0xff]   ;;  %vm2932_vm1 = vcmask (!%p4389_p6), 523264  }
  0x36   : > { %2013 = vmatprep.subr.bf16.mxu0 %v4803_v33  ;;  %2177 = vmatprep.subr.bf16.mxu1 %v4805_v34  ;;  %v4881_v33 = vld [vmem:[%s5529_s28 + $0x28c] ss:$16 sps:$4 sm:$0xff]   ;;  %v4876_v34 = vld [vmem:[%s5529_s28 + $0x280] ss:$16 sps:$4 sm:$0xff]   ;;  %v4915_v61 = vld [vmem:[%s5529_s28 + $0x348] ss:$16 sps:$4 sm:$0xff]  }
  0x37   : > { %v4927_v5 = vld [vmem:[%s5529_s28 + $0x388] ss:$16 sps:$4 sm:$0xff]  }
  0x39   : > { %2014 = vmatpush1.bf16.msra.mxu0 %v4807_v35  ;;  %2178 = vmatpush1.bf16.msra.mxu1 %v4808_v36  ;;  %v4879_v35 = vld [vmem:[%s5529_s28 + $0x288] ss:$16 sps:$4 sm:$0xff]   ;;  %v4884_v36 = vld [vmem:[%s5529_s28 + $0x2a4] ss:$16 sps:$4 sm:$0xff]  }
  0x3a   : > { %2015 = vmatprep.subr.bf16.mxu0 %v4809_v40  ;;  %2179 = vmatprep.subr.bf16.mxu1 %v4811_v41  ;;  %v4890_v40 = vld [vmem:[%s5529_s28 + $0x2c4] ss:$16 sps:$4 sm:$0xff]   ;;  %v4893_v41 = vld [vmem:[%s5529_s28 + $0x2cc] ss:$16 sps:$4 sm:$0xff]  }
  0x3d   : > { %2016 = vmatpush1.bf16.msra.mxu0 %v4813_v42  ;;  %2180 = vmatpush1.bf16.msra.mxu1 %v4814_v45  ;;  %v4888_v42 = vld [vmem:[%s5529_s28 + $0x2c0] ss:$16 sps:$4 sm:$0xff]   ;;  %v4896_v45 = vld [vmem:[%s5529_s28 + $0x2e4] ss:$16 sps:$4 sm:$0xff]  }
  0x3e   : > { %2017 = vmatprep.subr.bf16.mxu0 %v4815_v46  ;;  %2181 = vmatprep.subr.bf16.mxu1 %v4817_v47  ;;  %v4899_v46 = vld [vmem:[%s5529_s28 + $0x2ec] ss:$16 sps:$4 sm:$0xff]   ;;  %v4894_v47 = vld [vmem:[%s5529_s28 + $0x2e0] ss:$16 sps:$4 sm:$0xff]  }
  0x41   : > { %2018 = vmatpush1.bf16.msra.mxu0 %v4819_v48  ;;  %2182 = vmatpush1.bf16.msra.mxu1 %v4820_v49  ;;  %v4897_v48 = vld [vmem:[%s5529_s28 + $0x2e8] ss:$16 sps:$4 sm:$0xff]   ;;  %v4902_v49 = vld [vmem:[%s5529_s28 + $0x304] ss:$16 sps:$4 sm:$0xff]  }
  0x42   : > { %2019 = vmatprep.subr.bf16.mxu0 %v4821_v51  ;;  %2183 = vmatprep.subr.bf16.mxu1 %v4823_v52  ;;  %v4905_v51 = vld [vmem:[%s5529_s28 + $0x30c] ss:$16 sps:$4 sm:$0xff]   ;;  %v4900_v52 = vld [vmem:[%s5529_s28 + $0x300] ss:$16 sps:$4 sm:$0xff]  }
  0x45   : > { %2020 = vmatpush1.bf16.msra.mxu0 %v4825_v54  ;;  %2184 = vmatpush1.bf16.msra.mxu1 %v4826_v56  ;;  %v4908_v54 = vld [vmem:[%s5529_s28 + $0x324] ss:$16 sps:$4 sm:$0xff]   ;;  %v4906_v56 = vld [vmem:[%s5529_s28 + $0x320] ss:$16 sps:$4 sm:$0xff]  }
  0x46   : > { %2021 = vmatprep.subr.bf16.mxu0 %v4827_v57  ;;  %2185 = vmatprep.subr.bf16.mxu1 %v4829_v58  ;;  %v4909_v57 = vld [vmem:[%s5529_s28 + $0x328] ss:$16 sps:$4 sm:$0xff]   ;;  %v4914_v58 = vld [vmem:[%s5529_s28 + $0x344] ss:$16 sps:$4 sm:$0xff]  }
  0x49   : > { %2022 = vmatpush1.bf16.msra.mxu0 %v4831_v60  ;;  %2186 = vmatpush1.bf16.msra.mxu1 %v4832_v62  ;;  %v4912_v60 = vld [vmem:[%s5529_s28 + $0x340] ss:$16 sps:$4 sm:$0xff]   ;;  %v4920_v62 = vld [vmem:[%s5529_s28 + $0x364] ss:$16 sps:$4 sm:$0xff]  }
  0x4a   : > { %2023 = vmatprep.subr.bf16.mxu0 %v4833_v63  ;;  %2187 = vmatprep.subr.bf16.mxu1 %v4835_v0  ;;  %v4923_v63 = vld [vmem:[%s5529_s28 + $0x36c] ss:$16 sps:$4 sm:$0xff]   ;;  %v4918_v0 = vld [vmem:[%s5529_s28 + $0x360] ss:$16 sps:$4 sm:$0xff]  }
  0x4d   : > { %2024 = vmatpush1.bf16.msra.mxu0 %v4837_v1  ;;  %2188 = vmatpush1.bf16.msra.mxu1 %v4838_v2  ;;  %v4921_v1 = vld [vmem:[%s5529_s28 + $0x368] ss:$16 sps:$4 sm:$0xff]   ;;  %v4926_v2 = vld [vmem:[%s5529_s28 + $0x384] ss:$16 sps:$4 sm:$0xff]  }
  0x4e   : > { %2025 = vmatprep.subr.bf16.mxu0 %v4839_v3  ;;  %2189 = vmatprep.subr.bf16.mxu1 %v4841_v4  ;;  %v4929_v3 = vld [vmem:[%s5529_s28 + $0x38c] ss:$16 sps:$4 sm:$0xff]   ;;  %v4924_v4 = vld [vmem:[%s5529_s28 + $0x380] ss:$16 sps:$4 sm:$0xff]  }
  0x51   : > { %2026 = vmatpush1.bf16.msra.mxu0 %v4843_v6  ;;  %2190 = vmatpush1.bf16.msra.mxu1 %v4844_v7  ;;  %v4932_v6 = vld [vmem:[%s5529_s28 + $0x3a4] ss:$16 sps:$4 sm:$0xff]   ;;  %v4935_v7 = vld [vmem:[%s5529_s28 + $0x3ac] ss:$16 sps:$4 sm:$0xff]  }
  0x52   : > { %2027 = vmatprep.subr.bf16.mxu0 %v4845_v8  ;;  %2191 = vmatprep.subr.bf16.mxu1 %v4847_v9  ;;  %v4930_v8 = vld [vmem:[%s5529_s28 + $0x3a0] ss:$16 sps:$4 sm:$0xff]   ;;  %v4933_v9 = vld [vmem:[%s5529_s28 + $0x3a8] ss:$16 sps:$4 sm:$0xff]  }
  0x55   : > { %2028 = vmatpush1.bf16.msra.mxu0 %v4849_v11  ;;  %2192 = vmatpush1.bf16.msra.mxu1 %v4850_v12  ;;  %v4938_v11 = vld [vmem:[%s5529_s28 + $0x3c4] ss:$16 sps:$4 sm:$0xff]   ;;  %v4941_v12 = vld [vmem:[%s5529_s28 + $0x3cc] ss:$16 sps:$4 sm:$0xff]  }
  0x56   : > { %2038 = vmatprep.subr.bf16.mxu0 %v4854_v13  ;;  %2202 = vmatprep.subr.bf16.mxu1 %v4857_v14  ;;  %v4936_v13 = vld [vmem:[%s5529_s28 + $0x3c0] ss:$16 sps:$4 sm:$0xff]   ;;  %v4939_v14 = vld [vmem:[%s5529_s28 + $0x3c8] ss:$16 sps:$4 sm:$0xff]  }
  0x58   : > { %2030 = vmatmul.mubr.bf16.vlgmr.msra.gmra.mrb[0].mxu0 %v453_v17  ;;  %2194 = vmatmul.mubr.bf16.vlgmr.msra.gmra.mrb[0].mxu1 %v453_v17  ;;  %v4942_v17 = vld [vmem:[%s5529_s28 + $0x3e0] ss:$16 sps:$4 sm:$0xff]  }
  0x59   : > { %2039 = vmatpush1.bf16.msra.mxu0 %v4852_v16  ;;  %2203 = vmatpush1.bf16.msra.mxu1 %v4855_v18  ;;  %v4947_v16 = vld [vmem:[%s5529_s28 + $0x3ec] ss:$16 sps:$4 sm:$0xff]   ;;  %v4945_v18 = vld [vmem:[%s5529_s28 + $0x3e8] ss:$16 sps:$4 sm:$0xff]  }
  0x5a   : > { %2040 = vmatprep.subr.bf16.mxu0 %v4860_v19  ;;  %2204 = vmatprep.subr.bf16.mxu1 %v4863_v20  ;;  %v4950_v19 = vld [vmem:[%s5529_s28 + $0x404] ss:$16 sps:$4 sm:$0xff]   ;;  %v4953_v20 = vld [vmem:[%s5529_s28 + $0x40c] ss:$16 sps:$4 sm:$0xff]  }
  0x5b   : > { %2070 = vmatprep.mubr.bf16.mxu0 %v456_v21  ;;  %2234 = vmatprep.mubr.bf16.mxu1 %v456_v21  ;;  %v4948_v21 = vld [vmem:[%s5529_s28 + $0x400] ss:$16 sps:$4 sm:$0xff]  }
  0x5d   : > { %2041 = vmatpush1.bf16.msra.mxu0 %v4858_v22  ;;  %2205 = vmatpush1.bf16.msra.mxu1 %v4861_v23  ;;  %v455_v22 = vpack.c.bf16 %v5602_v10, %v5602_v10  ;;  %v4951_v23 = vld [vmem:[%s5529_s28 + $0x408] ss:$16 sps:$4 sm:$0xff]  }
  0x5e   : > { %2042 = vmatprep.subr.bf16.mxu0 %v4866_v24  ;;  %2206 = vmatprep.subr.bf16.mxu1 %v4869_v25  ;;  %v5679_v24 = vld [vmem:[%s5524_s24 + $0x8] sm:$0xff]  ;;  %v4956_v25 = vld [vmem:[%s5529_s28 + $0x424] ss:$16 sps:$4 sm:$0xff]  }
  0x61   : > { %2043 = vmatpush1.bf16.msra.mxu0 %v4864_v26  ;;  %2207 = vmatpush1.bf16.msra.mxu1 %v4867_v27  ;;  %v4959_v26 = vld [vmem:[%s5529_s28 + $0x42c] ss:$16 sps:$4 sm:$0xff]   ;;  %v5685_v27 = vrot.slane %v5679_v24, %v5579_v50 }
  0x62   : > { %2044 = vmatprep.subr.bf16.mxu0 %v4872_v28  ;;  %2208 = vmatprep.subr.bf16.mxu1 %v4875_v29  ;;  %v4954_v28 = vld [vmem:[%s5529_s28 + $0x420] ss:$16 sps:$4 sm:$0xff]   ;;  %v4957_v29 = vld [vmem:[%s5529_s28 + $0x428] ss:$16 sps:$4 sm:$0xff]  }
  0x63   : > { %v443_v10 = vcombine.high %v5685_v27, %v5685_v27 }
  0x65   : > { %2045 = vmatpush1.bf16.msra.mxu0 %v4870_v30  ;;  %2209 = vmatpush1.bf16.msra.mxu1 %v4873_v31  ;;  %v4962_v30 = vld [vmem:[%s5529_s28 + $0x444] ss:$16 sps:$4 sm:$0xff]   ;;  %v4965_v31 = vld [vmem:[%s5529_s28 + $0x44c] ss:$16 sps:$4 sm:$0xff]  }
  0x66   : > { %2046 = vmatprep.subr.bf16.mxu0 %v4878_v32  ;;  %2210 = vmatprep.subr.bf16.mxu1 %v4881_v33  ;;  %v458_v32 = vpack.c.bf16 %v443_v10, %v443_v10  ;;  %v4960_v33 = vld [vmem:[%s5529_s28 + $0x440] ss:$16 sps:$4 sm:$0xff]   ;;  %v5041_v10 = vld [vmem:[%s5529_s28 + $0x5e8] ss:$16 sps:$4 sm:$0xff]  }
  0x69   : > { %2047 = vmatpush1.bf16.msra.mxu0 %v4876_v34  ;;  %2211 = vmatpush1.bf16.msra.mxu1 %v4879_v35  ;;  %v4963_v34 = vld [vmem:[%s5529_s28 + $0x448] ss:$16 sps:$4 sm:$0xff]   ;;  %v4968_v35 = vld [vmem:[%s5529_s28 + $0x464] ss:$16 sps:$4 sm:$0xff]  }
  0x6a   : > { %2048 = vmatprep.subr.bf16.mxu0 %v4884_v36  ;;  %2212 = vmatprep.subr.bf16.mxu1 %v4887_v37  ;;  %v4971_v36 = vld [vmem:[%s5529_s28 + $0x46c] ss:$16 sps:$4 sm:$0xff]   ;;  %v4966_v37 = vld [vmem:[%s5529_s28 + $0x460] ss:$16 sps:$4 sm:$0xff]  }
  0x6d   : > { %2049 = vmatpush1.bf16.msra.mxu0 %v4882_v38  ;;  %2213 = vmatpush1.bf16.msra.mxu1 %v4885_v39  ;;  %v4969_v38 = vld [vmem:[%s5529_s28 + $0x468] ss:$16 sps:$4 sm:$0xff]   ;;  %v4974_v39 = vld [vmem:[%s5529_s28 + $0x484] ss:$16 sps:$4 sm:$0xff]  }
  0x6e   : > { %2050 = vmatprep.subr.bf16.mxu0 %v4890_v40  ;;  %2214 = vmatprep.subr.bf16.mxu1 %v4893_v41  ;;  %v4977_v40 = vld [vmem:[%s5529_s28 + $0x48c] ss:$16 sps:$4 sm:$0xff]   ;;  %v4972_v41 = vld [vmem:[%s5529_s28 + $0x480] ss:$16 sps:$4 sm:$0xff]  }
  0x71   : > { %2051 = vmatpush1.bf16.msra.mxu0 %v4888_v42  ;;  %2215 = vmatpush1.bf16.msra.mxu1 %v4891_v43  ;;  %v4975_v42 = vld [vmem:[%s5529_s28 + $0x488] ss:$16 sps:$4 sm:$0xff]   ;;  %v4980_v43 = vld [vmem:[%s5529_s28 + $0x4a4] ss:$16 sps:$4 sm:$0xff]  }
  0x72   : > { %2052 = vmatprep.subr.bf16.mxu0 %v4896_v45  ;;  %2216 = vmatprep.subr.bf16.mxu1 %v4899_v46  ;;  %v4983_v45 = vld [vmem:[%s5529_s28 + $0x4ac] ss:$16 sps:$4 sm:$0xff]   ;;  %v4978_v46 = vld [vmem:[%s5529_s28 + $0x4a0] ss:$16 sps:$4 sm:$0xff]  }
  0x75   : > { %2053 = vmatpush1.bf16.msra.mxu0 %v4894_v47  ;;  %2217 = vmatpush1.bf16.msra.mxu1 %v4897_v48  ;;  %v4981_v47 = vld [vmem:[%s5529_s28 + $0x4a8] ss:$16 sps:$4 sm:$0xff]   ;;  %v4986_v48 = vld [vmem:[%s5529_s28 + $0x4c4] ss:$16 sps:$4 sm:$0xff]  }
  0x76   : > { %2054 = vmatprep.subr.bf16.mxu0 %v4902_v49  ;;  %2218 = vmatprep.subr.bf16.mxu1 %v4905_v51  ;;  %v4989_v49 = vld [vmem:[%s5529_s28 + $0x4cc] ss:$16 sps:$4 sm:$0xff]   ;;  %v4984_v51 = vld [vmem:[%s5529_s28 + $0x4c0] ss:$16 sps:$4 sm:$0xff]  }
  0x79   : > { %2055 = vmatpush1.bf16.msra.mxu0 %v4900_v52  ;;  %2219 = vmatpush1.bf16.msra.mxu1 %v4903_v53  ;;  %v4987_v52 = vld [vmem:[%s5529_s28 + $0x4c8] ss:$16 sps:$4 sm:$0xff]   ;;  %v4992_v53 = vld [vmem:[%s5529_s28 + $0x4e4] ss:$16 sps:$4 sm:$0xff]  }
  0x7a   : > { %2056 = vmatprep.subr.bf16.mxu0 %v4908_v54  ;;  %2220 = vmatprep.subr.bf16.mxu1 %v4911_v55  ;;  %v4995_v54 = vld [vmem:[%s5529_s28 + $0x4ec] ss:$16 sps:$4 sm:$0xff]   ;;  %v4990_v55 = vld [vmem:[%s5529_s28 + $0x4e0] ss:$16 sps:$4 sm:$0xff]  }
  0x7d   : > { %2057 = vmatpush1.bf16.msra.mxu0 %v4906_v56  ;;  %2221 = vmatpush1.bf16.msra.mxu1 %v4909_v57  ;;  %v4993_v56 = vld [vmem:[%s5529_s28 + $0x4e8] ss:$16 sps:$4 sm:$0xff]   ;;  %v4998_v57 = vld [vmem:[%s5529_s28 + $0x504] ss:$16 sps:$4 sm:$0xff]  }
  0x7e   : > { %2058 = vmatprep.subr.bf16.mxu0 %v4914_v58  ;;  %2222 = vmatprep.subr.bf16.mxu1 %v4917_v59  ;;  %v5001_v58 = vld [vmem:[%s5529_s28 + $0x50c] ss:$16 sps:$4 sm:$0xff]   ;;  %v4996_v59 = vld [vmem:[%s5529_s28 + $0x500] ss:$16 sps:$4 sm:$0xff]  }
  0x81   : > { %2059 = vmatpush1.bf16.msra.mxu0 %v4912_v60  ;;  %2223 = vmatpush1.bf16.msra.mxu1 %v4915_v61  ;;  %v4999_v60 = vld [vmem:[%s5529_s28 + $0x508] ss:$16 sps:$4 sm:$0xff]   ;;  %v5004_v61 = vld [vmem:[%s5529_s28 + $0x524] ss:$16 sps:$4 sm:$0xff]  }
  0x82   : > { %2060 = vmatprep.subr.bf16.mxu0 %v4920_v62  ;;  %2224 = vmatprep.subr.bf16.mxu1 %v4923_v63  ;;  %v5007_v62 = vld [vmem:[%s5529_s28 + $0x52c] ss:$16 sps:$4 sm:$0xff]   ;;  %v5002_v63 = vld [vmem:[%s5529_s28 + $0x520] ss:$16 sps:$4 sm:$0xff]  }
  0x85   : > { %2061 = vmatpush1.bf16.msra.mxu0 %v4918_v0  ;;  %2225 = vmatpush1.bf16.msra.mxu1 %v4921_v1  ;;  %v5005_v0 = vld [vmem:[%s5529_s28 + $0x528] ss:$16 sps:$4 sm:$0xff]   ;;  %v5010_v1 = vld [vmem:[%s5529_s28 + $0x544] ss:$16 sps:$4 sm:$0xff]  }
  0x86   : > { %2062 = vmatprep.subr.bf16.mxu0 %v4926_v2  ;;  %2226 = vmatprep.subr.bf16.mxu1 %v4929_v3  ;;  %v5013_v2 = vld [vmem:[%s5529_s28 + $0x54c] ss:$16 sps:$4 sm:$0xff]   ;;  %v5008_v3 = vld [vmem:[%s5529_s28 + $0x540] ss:$16 sps:$4 sm:$0xff]  }
  0x89   : > { %2063 = vmatpush1.bf16.msra.mxu0 %v4924_v4  ;;  %2227 = vmatpush1.bf16.msra.mxu1 %v4927_v5  ;;  %v5011_v4 = vld [vmem:[%s5529_s28 + $0x548] ss:$16 sps:$4 sm:$0xff]   ;;  %v5016_v5 = vld [vmem:[%s5529_s28 + $0x564] ss:$16 sps:$4 sm:$0xff]  }
  0x8a   : > { %2064 = vmatprep.subr.bf16.mxu0 %v4932_v6  ;;  %2228 = vmatprep.subr.bf16.mxu1 %v4935_v7  ;;  %v5019_v6 = vld [vmem:[%s5529_s28 + $0x56c] ss:$16 sps:$4 sm:$0xff]   ;;  %v5014_v7 = vld [vmem:[%s5529_s28 + $0x560] ss:$16 sps:$4 sm:$0xff]  }
  0x8d   : > { %2065 = vmatpush1.bf16.msra.mxu0 %v4930_v8  ;;  %2229 = vmatpush1.bf16.msra.mxu1 %v4933_v9  ;;  %v5017_v8 = vld [vmem:[%s5529_s28 + $0x568] ss:$16 sps:$4 sm:$0xff]   ;;  %v5022_v9 = vld [vmem:[%s5529_s28 + $0x584] ss:$16 sps:$4 sm:$0xff]  }
  0x8e   : > { %2066 = vmatprep.subr.bf16.mxu0 %v4938_v11  ;;  %2230 = vmatprep.subr.bf16.mxu1 %v4941_v12  ;;  %v5025_v11 = vld [vmem:[%s5529_s28 + $0x58c] ss:$16 sps:$4 sm:$0xff]   ;;  %v5020_v12 = vld [vmem:[%s5529_s28 + $0x580] ss:$16 sps:$4 sm:$0xff]  }
  0x91   : > { %2067 = vmatpush1.bf16.msra.mxu0 %v4936_v13  ;;  %2231 = vmatpush1.bf16.msra.mxu1 %v4939_v14  ;;  %v5023_v13 = vld [vmem:[%s5529_s28 + $0x588] ss:$16 sps:$4 sm:$0xff]   ;;  %v5028_v14 = vld [vmem:[%s5529_s28 + $0x5a4] ss:$16 sps:$4 sm:$0xff]  }
  0x92   : > { %2068 = vmatprep.subr.bf16.mxu0 %v4944_v15  ;;  %2232 = vmatprep.subr.bf16.mxu1 %v4947_v16  ;;  %v5031_v15 = vld [vmem:[%s5529_s28 + $0x5ac] ss:$16 sps:$4 sm:$0xff]   ;;  %v5026_v16 = vld [vmem:[%s5529_s28 + $0x5a0] ss:$16 sps:$4 sm:$0xff]  }
  0x95   : > { %2069 = vmatpush1.bf16.msra.mxu0 %v4942_v17  ;;  %2233 = vmatpush1.bf16.msra.mxu1 %v4945_v18  ;;  %v5029_v17 = vld [vmem:[%s5529_s28 + $0x5a8] ss:$16 sps:$4 sm:$0xff]   ;;  %v5034_v18 = vld [vmem:[%s5529_s28 + $0x5c4] ss:$16 sps:$4 sm:$0xff]  }
  0x96   : > { %2079 = vmatprep.subr.bf16.mxu0 %v4950_v19  ;;  %2243 = vmatprep.subr.bf16.mxu1 %v4953_v20  ;;  %v5037_v19 = vld [vmem:[%s5529_s28 + $0x5cc] ss:$16 sps:$4 sm:$0xff]   ;;  %v428_v20 = vcombine.high %v5679_v24, %v5679_v24  ;;  %v5038_v24 = vld [vmem:[%s5529_s28 + $0x5e0] ss:$16 sps:$4 sm:$0xff]  }
  0x98   : > { %2071 = vmatmul.mubr.bf16.vlgmr.msra.gmra.mrb[0].mxu0 %v455_v22  ;;  %2235 = vmatmul.mubr.bf16.vlgmr.msra.gmra.mrb[0].mxu1 %v455_v22  ;;  %v5035_v22 = vld [vmem:[%s5529_s28 + $0x5c8] ss:$16 sps:$4 sm:$0xff]  }
  0x99   : > { %2080 = vmatpush1.bf16.msra.mxu0 %v4948_v21  ;;  %2244 = vmatpush1.bf16.msra.mxu1 %v4951_v23  ;;  %v5032_v21 = vld [vmem:[%s5529_s28 + $0x5c0] ss:$16 sps:$4 sm:$0xff]   ;;  %v5040_v23 = vld [vmem:[%s5529_s28 + $0x5e4] ss:$16 sps:$4 sm:$0xff]  }
  0x9a   : > { %2081 = vmatprep.subr.bf16.mxu0 %v4956_v25  ;;  %2245 = vmatprep.subr.bf16.mxu1 %v4959_v26  ;;  %v5043_v25 = vld [vmem:[%s5529_s28 + $0x5ec] ss:$16 sps:$4 sm:$0xff]   ;;  %v5748_v26 = vrot.slane %v428_v20, %v5579_v50  ;;  %v5119_v20 = vld [vmem:[%s5529_s28 + $0x788] ss:$16 sps:$4 sm:$0xff]  }
  0x9b   : > { %2111 = vmatprep.mubr.bf16.mxu0 %v458_v32  ;;  %2275 = vmatprep.mubr.bf16.mxu1 %v458_v32  ;;  %v5044_v32 = vld [vmem:[%s5529_s28 + $0x600] ss:$16 sps:$4 sm:$0xff]  }
  0x9d   : > { %2082 = vmatpush1.bf16.msra.mxu0 %v4954_v28  ;;  %2246 = vmatpush1.bf16.msra.mxu1 %v4957_v29  ;;  %v5046_v28 = vld [vmem:[%s5529_s28 + $0x604] ss:$16 sps:$4 sm:$0xff]   ;;  %v5049_v29 = vld [vmem:[%s5529_s28 + $0x60c] ss:$16 sps:$4 sm:$0xff]  }
  0x9e   : > { %2083 = vmatprep.subr.bf16.mxu0 %v4962_v30  ;;  %2247 = vmatprep.subr.bf16.mxu1 %v4965_v31  ;;  %v444_v30 = vcombine.high %v5748_v26, %v5748_v26  ;;  %v457_v31 = vpack.c.bf16 %v5685_v27, %v5685_v27  ;;  %v5050_v27 = vld [vmem:[%s5529_s28 + $0x620] ss:$16 sps:$4 sm:$0xff]  }
  0xa1   : > { %2084 = vmatpush1.bf16.msra.mxu0 %v4960_v33  ;;  %2248 = vmatpush1.bf16.msra.mxu1 %v4963_v34  ;;  %v5047_v33 = vld [vmem:[%s5529_s28 + $0x608] ss:$16 sps:$4 sm:$0xff]   ;;  %v5052_v34 = vld [vmem:[%s5529_s28 + $0x624] ss:$16 sps:$4 sm:$0xff]  }
  0xa2   : > { %2085 = vmatprep.subr.bf16.mxu0 %v4968_v35  ;;  %2249 = vmatprep.subr.bf16.mxu1 %v4971_v36  ;;  %v5055_v35 = vld [vmem:[%s5529_s28 + $0x62c] ss:$16 sps:$4 sm:$0xff]   ;;  %v460_v36 = vpack.c.bf16 %v444_v30, %v444_v30  ;;  %v5136_v30 = vld [vmem:[%s5529_s28 + $0x7e4] ss:$16 sps:$4 sm:$0xff]  }
  0xa5   : > { %2086 = vmatpush1.bf16.msra.mxu0 %v4966_v37  ;;  %2250 = vmatpush1.bf16.msra.mxu1 %v4969_v38  ;;  %v5053_v37 = vld [vmem:[%s5529_s28 + $0x628] ss:$16 sps:$4 sm:$0xff]   ;;  %v5058_v38 = vld [vmem:[%s5529_s28 + $0x644] ss:$16 sps:$4 sm:$0xff]  }
  0xa6   : > { %2087 = vmatprep.subr.bf16.mxu0 %v4974_v39  ;;  %2251 = vmatprep.subr.bf16.mxu1 %v4977_v40  ;;  %v5061_v39 = vld [vmem:[%s5529_s28 + $0x64c] ss:$16 sps:$4 sm:$0xff]   ;;  %v5056_v40 = vld [vmem:[%s5529_s28 + $0x640] ss:$16 sps:$4 sm:$0xff]  }
  0xa9   : > { %2088 = vmatpush1.bf16.msra.mxu0 %v4972_v41  ;;  %2252 = vmatpush1.bf16.msra.mxu1 %v4975_v42  ;;  %v5059_v41 = vld [vmem:[%s5529_s28 + $0x648] ss:$16 sps:$4 sm:$0xff]   ;;  %v5064_v42 = vld [vmem:[%s5529_s28 + $0x664] ss:$16 sps:$4 sm:$0xff]  }
  0xaa   : > { %2089 = vmatprep.subr.bf16.mxu0 %v4980_v43  ;;  %2253 = vmatprep.subr.bf16.mxu1 %v4983_v45  ;;  %v5067_v43 = vld [vmem:[%s5529_s28 + $0x66c] ss:$16 sps:$4 sm:$0xff]   ;;  %v5062_v45 = vld [vmem:[%s5529_s28 + $0x660] ss:$16 sps:$4 sm:$0xff]  }
  0xad   : > { %2090 = vmatpush1.bf16.msra.mxu0 %v4978_v46  ;;  %2254 = vmatpush1.bf16.msra.mxu1 %v4981_v47  ;;  %v5065_v46 = vld [vmem:[%s5529_s28 + $0x668] ss:$16 sps:$4 sm:$0xff]   ;;  %v5070_v47 = vld [vmem:[%s5529_s28 + $0x684] ss:$16 sps:$4 sm:$0xff]  }
  0xae   : > { %2091 = vmatprep.subr.bf16.mxu0 %v4986_v48  ;;  %2255 = vmatprep.subr.bf16.mxu1 %v4989_v49  ;;  %v5073_v48 = vld [vmem:[%s5529_s28 + $0x68c] ss:$16 sps:$4 sm:$0xff]   ;;  %v5068_v49 = vld [vmem:[%s5529_s28 + $0x680] ss:$16 sps:$4 sm:$0xff]  }
  0xb1   : > { %2092 = vmatpush1.bf16.msra.mxu0 %v4984_v51  ;;  %2256 = vmatpush1.bf16.msra.mxu1 %v4987_v52  ;;  %v5071_v51 = vld [vmem:[%s5529_s28 + $0x688] ss:$16 sps:$4 sm:$0xff]   ;;  %v5076_v52 = vld [vmem:[%s5529_s28 + $0x6a4] ss:$16 sps:$4 sm:$0xff]  }
  0xb2   : > { %2093 = vmatprep.subr.bf16.mxu0 %v4992_v53  ;;  %2257 = vmatprep.subr.bf16.mxu1 %v4995_v54  ;;  %v5079_v53 = vld [vmem:[%s5529_s28 + $0x6ac] ss:$16 sps:$4 sm:$0xff]   ;;  %v5074_v54 = vld [vmem:[%s5529_s28 + $0x6a0] ss:$16 sps:$4 sm:$0xff]  }
  0xb5   : > { %2094 = vmatpush1.bf16.msra.mxu0 %v4990_v55  ;;  %2258 = vmatpush1.bf16.msra.mxu1 %v4993_v56  ;;  %v5077_v55 = vld [vmem:[%s5529_s28 + $0x6a8] ss:$16 sps:$4 sm:$0xff]   ;;  %v5082_v56 = vld [vmem:[%s5529_s28 + $0x6c4] ss:$16 sps:$4 sm:$0xff]  }
  0xb6   : > { %2095 = vmatprep.subr.bf16.mxu0 %v4998_v57  ;;  %2259 = vmatprep.subr.bf16.mxu1 %v5001_v58  ;;  %v5085_v57 = vld [vmem:[%s5529_s28 + $0x6cc] ss:$16 sps:$4 sm:$0xff]   ;;  %v5080_v58 = vld [vmem:[%s5529_s28 + $0x6c0] ss:$16 sps:$4 sm:$0xff]  }
  0xb9   : > { %2096 = vmatpush1.bf16.msra.mxu0 %v4996_v59  ;;  %2260 = vmatpush1.bf16.msra.mxu1 %v4999_v60  ;;  %v5083_v59 = vld [vmem:[%s5529_s28 + $0x6c8] ss:$16 sps:$4 sm:$0xff]   ;;  %v5088_v60 = vld [vmem:[%s5529_s28 + $0x6e4] ss:$16 sps:$4 sm:$0xff]  }
  0xba   : > { %2097 = vmatprep.subr.bf16.mxu0 %v5004_v61  ;;  %2261 = vmatprep.subr.bf16.mxu1 %v5007_v62  ;;  %v5091_v61 = vld [vmem:[%s5529_s28 + $0x6ec] ss:$16 sps:$4 sm:$0xff]   ;;  %v5086_v62 = vld [vmem:[%s5529_s28 + $0x6e0] ss:$16 sps:$4 sm:$0xff]  }
  0xbd   : > { %2098 = vmatpush1.bf16.msra.mxu0 %v5002_v63  ;;  %2262 = vmatpush1.bf16.msra.mxu1 %v5005_v0  ;;  %v5089_v63 = vld [vmem:[%s5529_s28 + $0x6e8] ss:$16 sps:$4 sm:$0xff]   ;;  %v5094_v0 = vld [vmem:[%s5529_s28 + $0x704] ss:$16 sps:$4 sm:$0xff]  }
  0xbe   : > { %2099 = vmatprep.subr.bf16.mxu0 %v5010_v1  ;;  %2263 = vmatprep.subr.bf16.mxu1 %v5013_v2  ;;  %v5097_v1 = vld [vmem:[%s5529_s28 + $0x70c] ss:$16 sps:$4 sm:$0xff]   ;;  %v5092_v2 = vld [vmem:[%s5529_s28 + $0x700] ss:$16 sps:$4 sm:$0xff]  }
  0xc1   : > { %2100 = vmatpush1.bf16.msra.mxu0 %v5008_v3  ;;  %2264 = vmatpush1.bf16.msra.mxu1 %v5011_v4  ;;  %v5095_v3 = vld [vmem:[%s5529_s28 + $0x708] ss:$16 sps:$4 sm:$0xff]   ;;  %v5100_v4 = vld [vmem:[%s5529_s28 + $0x724] ss:$16 sps:$4 sm:$0xff]  }
  0xc2   : > { %2101 = vmatprep.subr.bf16.mxu0 %v5016_v5  ;;  %2265 = vmatprep.subr.bf16.mxu1 %v5019_v6  ;;  %v5103_v5 = vld [vmem:[%s5529_s28 + $0x72c] ss:$16 sps:$4 sm:$0xff]   ;;  %v5098_v6 = vld [vmem:[%s5529_s28 + $0x720] ss:$16 sps:$4 sm:$0xff]  }
  0xc5   : > { %2102 = vmatpush1.bf16.msra.mxu0 %v5014_v7  ;;  %2266 = vmatpush1.bf16.msra.mxu1 %v5017_v8  ;;  %v5101_v7 = vld [vmem:[%s5529_s28 + $0x728] ss:$16 sps:$4 sm:$0xff]   ;;  %v5106_v8 = vld [vmem:[%s5529_s28 + $0x744] ss:$16 sps:$4 sm:$0xff]  }
  0xc6   : > { %2103 = vmatprep.subr.bf16.mxu0 %v5022_v9  ;;  %2267 = vmatprep.subr.bf16.mxu1 %v5025_v11  ;;  %v5109_v9 = vld [vmem:[%s5529_s28 + $0x74c] ss:$16 sps:$4 sm:$0xff]   ;;  %v5104_v11 = vld [vmem:[%s5529_s28 + $0x740] ss:$16 sps:$4 sm:$0xff]  }
  0xc9   : > { %2104 = vmatpush1.bf16.msra.mxu0 %v5020_v12  ;;  %2268 = vmatpush1.bf16.msra.mxu1 %v5023_v13  ;;  %v5107_v12 = vld [vmem:[%s5529_s28 + $0x748] ss:$16 sps:$4 sm:$0xff]   ;;  %v5112_v13 = vld [vmem:[%s5529_s28 + $0x764] ss:$16 sps:$4 sm:$0xff]  }
  0xca   : > { %2105 = vmatprep.subr.bf16.mxu0 %v5028_v14  ;;  %2269 = vmatprep.subr.bf16.mxu1 %v5031_v15  ;;  %v5115_v14 = vld [vmem:[%s5529_s28 + $0x76c] ss:$16 sps:$4 sm:$0xff]   ;;  %v5110_v15 = vld [vmem:[%s5529_s28 + $0x760] ss:$16 sps:$4 sm:$0xff]  }
  0xcd   : > { %2106 = vmatpush1.bf16.msra.mxu0 %v5026_v16  ;;  %2270 = vmatpush1.bf16.msra.mxu1 %v5029_v17  ;;  %v5113_v16 = vld [vmem:[%s5529_s28 + $0x768] ss:$16 sps:$4 sm:$0xff]   ;;  %v5118_v17 = vld [vmem:[%s5529_s28 + $0x784] ss:$16 sps:$4 sm:$0xff]  }
  0xce   : > { %2107 = vmatprep.subr.bf16.mxu0 %v5034_v18  ;;  %2271 = vmatprep.subr.bf16.mxu1 %v5037_v19  ;;  %v5121_v18 = vld [vmem:[%s5529_s28 + $0x78c] ss:$16 sps:$4 sm:$0xff]   ;;  %v5116_v19 = vld [vmem:[%s5529_s28 + $0x780] ss:$16 sps:$4 sm:$0xff]  }
  0xd1   : > { %2108 = vmatpush1.bf16.msra.mxu0 %v5032_v21  ;;  %2272 = vmatpush1.bf16.msra.mxu1 %v5035_v22  ;;  %v5124_v21 = vld [vmem:[%s5529_s28 + $0x7a4] ss:$16 sps:$4 sm:$0xff]   ;;  %v5127_v22 = vld [vmem:[%s5529_s28 + $0x7ac] ss:$16 sps:$4 sm:$0xff]  }
  0xd2   : > { %2109 = vmatprep.subr.bf16.mxu0 %v5040_v23  ;;  %2273 = vmatprep.subr.bf16.mxu1 %v5043_v25  ;;  %v5122_v23 = vld [vmem:[%s5529_s28 + $0x7a0] ss:$16 sps:$4 sm:$0xff]   ;;  %v5125_v25 = vld [vmem:[%s5529_s28 + $0x7a8] ss:$16 sps:$4 sm:$0xff]  }
  0xd5   : > { %2110 = vmatpush1.bf16.msra.mxu0 %v5038_v24  ;;  %2274 = vmatpush1.bf16.msra.mxu1 %v5041_v10  ;;  %v5130_v24 = vld [vmem:[%s5529_s28 + $0x7c4] ss:$16 sps:$4 sm:$0xff]   ;;  %v5133_v10 = vld [vmem:[%s5529_s28 + $0x7cc] ss:$16 sps:$4 sm:$0xff]  }
  0xd6   : > { %2120 = vmatprep.subr.bf16.mxu0 %v5046_v28  ;;  %2284 = vmatprep.subr.bf16.mxu1 %v5049_v29  ;;  %v5128_v28 = vld [vmem:[%s5529_s28 + $0x7c0] ss:$16 sps:$4 sm:$0xff]   ;;  %v5131_v29 = vld [vmem:[%s5529_s28 + $0x7c8] ss:$16 sps:$4 sm:$0xff]  }
  0xd8   : > { %2112 = vmatmul.mubr.bf16.vlgmr.msra.gmra.mrb[0].mxu0 %v457_v31  ;;  %2276 = vmatmul.mubr.bf16.vlgmr.msra.gmra.mrb[0].mxu1 %v457_v31  ;;  %v5139_v31 = vld [vmem:[%s5529_s28 + $0x7ec] ss:$16 sps:$4 sm:$0xff]  }
  0xd9   : > { %2121 = vmatpush1.bf16.msra.mxu0 %v5044_v32  ;;  %2285 = vmatpush1.bf16.msra.mxu1 %v5047_v33  ;;  %v5134_v32 = vld [vmem:[%s5529_s28 + $0x7e0] ss:$16 sps:$4 sm:$0xff]   ;;  %v5137_v33 = vld [vmem:[%s5529_s28 + $0x7e8] ss:$16 sps:$4 sm:$0xff]  }
  0xda   : > { %2122 = vmatprep.subr.bf16.mxu0 %v5052_v34  ;;  %2286 = vmatprep.subr.bf16.mxu1 %v5055_v35  ;;  %v459_v34 = vpack.c.bf16 %v5748_v26, %v5748_v26 }
  0xdb   : > { %2152 = vmatprep.mubr.bf16.mxu0 %v460_v36  ;;  %2316 = vmatprep.mubr.bf16.mxu1 %v460_v36 }
  0xdd   : > { %2123 = vmatpush1.bf16.msra.mxu0 %v5050_v27  ;;  %2287 = vmatpush1.bf16.msra.mxu1 %v5053_v37 }
  0xde   : > { %2124 = vmatprep.subr.bf16.mxu0 %v5058_v38  ;;  %2288 = vmatprep.subr.bf16.mxu1 %v5061_v39 }
  0xe1   : > { %2125 = vmatpush1.bf16.msra.mxu0 %v5056_v40  ;;  %2289 = vmatpush1.bf16.msra.mxu1 %v5059_v41 }
  0xe2   : > { %2126 = vmatprep.subr.bf16.mxu0 %v5064_v42  ;;  %2290 = vmatprep.subr.bf16.mxu1 %v5067_v43 }
  0xe5   : > { %2127 = vmatpush1.bf16.msra.mxu0 %v5062_v45  ;;  %2291 = vmatpush1.bf16.msra.mxu1 %v5065_v46 }
  0xe6   : > { %2128 = vmatprep.subr.bf16.mxu0 %v5070_v47  ;;  %2292 = vmatprep.subr.bf16.mxu1 %v5073_v48  ;;  %v406_v47 = vld [vmem:[#allocation2] sm:$0xff] }
  0xe9   : > { %2129 = vmatpush1.bf16.msra.mxu0 %v5068_v49  ;;  %2293 = vmatpush1.bf16.msra.mxu1 %v5071_v51  ;;  %v2394_v49 = vld [vmem:[%s6662_s4 + $0x8] sm:$0xff] (!%p4389_p6)  ;;  %v2396_v51 = vld [vmem:[%s6662_s4 + $0x18] sm:$0xff] (!%p4389_p6) }
  0xea   : > { %2130 = vmatprep.subr.bf16.mxu0 %v5076_v52  ;;  %2294 = vmatprep.subr.bf16.mxu1 %v5079_v53  ;;  %v2393_v52 = vld [vmem:[%s6662_s4] sm:$0xff] (!%p4389_p6)  ;;  %v4645_v53 = vpack.c.bf16 (!%p4389_p6), %v2396_v51, %v2394_v49  ;;  %v6002_v51 = vsub.s32 (!%p4389_p6), 0, %v5571_v44 }
  0xeb   : > { %v2354_v49 = vld [vmem:[%s6660_s2] sm:$0xf] (!%p4389_p6) }
  0xed   : > { %2131 = vmatpush1.bf16.msra.mxu0 %v5074_v54  ;;  %2295 = vmatpush1.bf16.msra.mxu1 %v5077_v55  ;;  %v2395_v54 = vld [vmem:[%s6662_s4 + $0x10] sm:$0xff] (!%p4389_p6)  ;;  %v5447_v55 = vmov (!%p4389_p6), 0.0  }
  0xee   : > { %2132 = vmatprep.subr.bf16.mxu0 %v5082_v56  ;;  %2296 = vmatprep.subr.bf16.mxu1 %v5085_v57  ;;  %v4647_v56 = vpack.c.bf16 (!%p4389_p6), %v2395_v54, %v2393_v52  ;;  %v2398_v57 = vld [vmem:[%s6662_s4 + $0x28] sm:$0xff] (!%p4389_p6)  ;;  %v6005_v52 = vsub.s32 (!%p4389_p6), 1, %v5571_v44 }
  0xf0   : > { %v2363_v54 = vrot.slane (!%p4389_p6), %v2354_v49, %v6005_v52 }
  0xf1   : > { %2133 = vmatpush1.bf16.msra.mxu0 %v5080_v58  ;;  %2297 = vmatpush1.bf16.msra.mxu1 %v5083_v59  ;;  %v2397_v58 = vld [vmem:[%s6662_s4 + $0x20] sm:$0xff] (!%p4389_p6) }
  0xf2   : > { %2134 = vmatprep.subr.bf16.mxu0 %v5088_v60  ;;  %2298 = vmatprep.subr.bf16.mxu1 %v5091_v61  ;;  %v5141_v59 = vld [vmem:[%s6665_s7 + $0x4] ss:$16 sps:$4 sm:$0xff] (!%p4389_p6)   ;;  %v2392_v60 = vld [vmem:[%s6661_s3] sm:$0x3] (!%p4389_p6)  ;;  %v5145_v61 = vld [vmem:[%s6665_s7 + $0xc] ss:$16 sps:$4 sm:$0xff] (!%p4389_p6)  }
  0xf5   : > { %2135 = vmatpush1.bf16.msra.mxu0 %v5086_v62  ;;  %2299 = vmatpush1.bf16.msra.mxu1 %v5089_v63  ;;  %v5146_v62 = vld [vmem:[%s6665_s7] ss:$16 sps:$4 sm:$0xff] (!%p4389_p6)   ;;  %v5147_v63 = vld [vmem:[%s6665_s7 + $0x24] ss:$16 sps:$4 sm:$0xff] (!%p4389_p6)  }
  0xf6   : > { %2136 = vmatprep.subr.bf16.mxu0 %v5094_v0  ;;  %2300 = vmatprep.subr.bf16.mxu1 %v5097_v1  ;;  %v5143_v0 = vld [vmem:[%s6665_s7 + $0x8] ss:$16 sps:$4 sm:$0xff] (!%p4389_p6)   ;;  %v5151_v1 = vld [vmem:[%s6665_s7 + $0x2c] ss:$16 sps:$4 sm:$0xff] (!%p4389_p6)  }
  0xf9   : > { %2137 = vmatpush1.bf16.msra.mxu0 %v5092_v2  ;;  %2301 = vmatpush1.bf16.msra.mxu1 %v5095_v3  ;;  %v5152_v2 = vld [vmem:[%s6665_s7 + $0x20] ss:$16 sps:$4 sm:$0xff] (!%p4389_p6)   ;;  %v5153_v3 = vld [vmem:[%s6665_s7 + $0x44] ss:$16 sps:$4 sm:$0xff] (!%p4389_p6)  }
  0xfa   : > { %2138 = vmatprep.subr.bf16.mxu0 %v5100_v4  ;;  %2302 = vmatprep.subr.bf16.mxu1 %v5103_v5  ;;  %v5149_v4 = vld [vmem:[%s6665_s7 + $0x28] ss:$16 sps:$4 sm:$0xff] (!%p4389_p6)   ;;  %v5157_v5 = vld [vmem:[%s6665_s7 + $0x4c] ss:$16 sps:$4 sm:$0xff] (!%p4389_p6)  }
  0xfd   : > { %2139 = vmatpush1.bf16.msra.mxu0 %v5098_v6  ;;  %2303 = vmatpush1.bf16.msra.mxu1 %v5101_v7  ;;  %v5158_v6 = vld [vmem:[%s6665_s7 + $0x40] ss:$16 sps:$4 sm:$0xff] (!%p4389_p6)   ;;  %v5159_v7 = vld [vmem:[%s6665_s7 + $0x64] ss:$16 sps:$4 sm:$0xff] (!%p4389_p6)  }
  0xfe   : > { %2140 = vmatprep.subr.bf16.mxu0 %v5106_v8  ;;  %2304 = vmatprep.subr.bf16.mxu1 %v5109_v9  ;;  %v5155_v8 = vld [vmem:[%s6665_s7 + $0x48] ss:$16 sps:$4 sm:$0xff] (!%p4389_p6)   ;;  %v5164_v9 = vld [vmem:[%s6665_s7 + $0x60] ss:$16 sps:$4 sm:$0xff] (!%p4389_p6)  }
 0x101   : > { %2141 = vmatpush1.bf16.msra.mxu0 %v5104_v11  ;;  %2305 = vmatpush1.bf16.msra.mxu1 %v5107_v12  ;;  %v5163_v11 = vld [vmem:[%s6665_s7 + $0x6c] ss:$16 sps:$4 sm:$0xff] (!%p4389_p6)   ;;  %v5165_v12 = vld [vmem:[%s6665_s7 + $0x84] ss:$16 sps:$4 sm:$0xff] (!%p4389_p6)  }
 0x102   : > { %2142 = vmatprep.subr.bf16.mxu0 %v5112_v13  ;;  %2306 = vmatprep.subr.bf16.mxu1 %v5115_v14  ;;  %v5161_v13 = vld [vmem:[%s6665_s7 + $0x68] ss:$16 sps:$4 sm:$0xff] (!%p4389_p6)   ;;  %v5169_v14 = vld [vmem:[%s6665_s7 + $0x8c] ss:$16 sps:$4 sm:$0xff] (!%p4389_p6)  }
 0x105   : > { %2143 = vmatpush1.bf16.msra.mxu0 %v5110_v15  ;;  %2307 = vmatpush1.bf16.msra.mxu1 %v5113_v16  ;;  %v5170_v15 = vld [vmem:[%s6665_s7 + $0x80] ss:$16 sps:$4 sm:$0xff] (!%p4389_p6)   ;;  %v5171_v16 = vld [vmem:[%s6665_s7 + $0xa4] ss:$16 sps:$4 sm:$0xff] (!%p4389_p6)  }
 0x106   : > { %2144 = vmatprep.subr.bf16.mxu0 %v5118_v17  ;;  %2308 = vmatprep.subr.bf16.mxu1 %v5121_v18  ;;  %v5167_v17 = vld [vmem:[%s6665_s7 + $0x88] ss:$16 sps:$4 sm:$0xff] (!%p4389_p6)   ;;  %v5176_v18 = vld [vmem:[%s6665_s7 + $0xa0] ss:$16 sps:$4 sm:$0xff] (!%p4389_p6)  }
 0x109   : > { %2145 = vmatpush1.bf16.msra.mxu0 %v5116_v19  ;;  %2309 = vmatpush1.bf16.msra.mxu1 %v5119_v20  ;;  %v5175_v19 = vld [vmem:[%s6665_s7 + $0xac] ss:$16 sps:$4 sm:$0xff] (!%p4389_p6)   ;;  %v5177_v20 = vld [vmem:[%s6665_s7 + $0xc4] ss:$16 sps:$4 sm:$0xff] (!%p4389_p6)  }
 0x10a   : > { %2146 = vmatprep.subr.bf16.mxu0 %v5124_v21  ;;  %2310 = vmatprep.subr.bf16.mxu1 %v5127_v22  ;;  %v5173_v21 = vld [vmem:[%s6665_s7 + $0xa8] ss:$16 sps:$4 sm:$0xff] (!%p4389_p6)   ;;  %v5181_v22 = vld [vmem:[%s6665_s7 + $0xcc] ss:$16 sps:$4 sm:$0xff] (!%p4389_p6)  }
 0x10d   : > { %2147 = vmatpush1.bf16.msra.mxu0 %v5122_v23  ;;  %2311 = vmatpush1.bf16.msra.mxu1 %v5125_v25  ;;  %v5182_v23 = vld [vmem:[%s6665_s7 + $0xc0] ss:$16 sps:$4 sm:$0xff] (!%p4389_p6)   ;;  %v5183_v25 = vld [vmem:[%s6665_s7 + $0xe4] ss:$16 sps:$4 sm:$0xff] (!%p4389_p6)  }
 0x10e   : > { %2148 = vmatprep.subr.bf16.mxu0 %v5130_v24  ;;  %2312 = vmatprep.subr.bf16.mxu1 %v5133_v10  ;;  %v5179_v24 = vld [vmem:[%s6665_s7 + $0xc8] ss:$16 sps:$4 sm:$0xff] (!%p4389_p6)   ;;  %v5187_v10 = vld [vmem:[%s6665_s7 + $0xec] ss:$16 sps:$4 sm:$0xff] (!%p4389_p6)  }
 0x111   : > { %2149 = vmatpush1.bf16.msra.mxu0 %v5128_v28  ;;  %2313 = vmatpush1.bf16.msra.mxu1 %v5131_v29  ;;  %v5188_v28 = vld [vmem:[%s6665_s7 + $0xe0] ss:$16 sps:$4 sm:$0xff] (!%p4389_p6)   ;;  %v5189_v29 = vld [vmem:[%s6665_s7 + $0x104] ss:$16 sps:$4 sm:$0xff] (!%p4389_p6)  }
 0x112   : > { %2150 = vmatprep.subr.bf16.mxu0 %v5136_v30  ;;  %2314 = vmatprep.subr.bf16.mxu1 %v5139_v31  ;;  %v5185_v30 = vld [vmem:[%s6665_s7 + $0xe8] ss:$16 sps:$4 sm:$0xff] (!%p4389_p6)   ;;  %v5194_v31 = vld [vmem:[%s6665_s7 + $0x100] ss:$16 sps:$4 sm:$0xff] (!%p4389_p6)  }
 0x115   : > { %2151 = vmatpush1.bf16.msra.mxu0 %v5134_v32  ;;  %2315 = vmatpush1.bf16.msra.mxu1 %v5137_v33  ;;  %v5193_v32 = vld [vmem:[%s6665_s7 + $0x10c] ss:$16 sps:$4 sm:$0xff] (!%p4389_p6)   ;;  %v5195_v33 = vld [vmem:[%s6665_s7 + $0x124] ss:$16 sps:$4 sm:$0xff] (!%p4389_p6)  }
 0x116   : > { %4646 = vmatprep.subr.bf16.mxu0 (!%p4389_p6), %v4645_v53  ;;  %2936 = vmatprep.subr.bf16.mxu1 (!%p4389_p6), %v5141_v59  ;;  %v2359_v53 = vrot.slane (!%p4389_p6), %v2354_v49, %v6002_v51 }
 0x118   : > { %2153 = vmatmul.mubr.bf16.vlgmr.msra.gmra.mrb[0].mxu0 %v459_v34  ;;  %2317 = vmatmul.mubr.bf16.vlgmr.msra.gmra.mrb[0].mxu1 %v459_v34  ;;  %v5191_v34 = vld [vmem:[%s6665_s7 + $0x108] ss:$16 sps:$4 sm:$0xff] (!%p4389_p6)  }
 0x119   : > { %2479 = vmatprep.mubr.f32.mxu0 (!%p4389_p6), %v5447_v55  ;;  %4648 = vmatpush1.bf16.msra.mxu0 (!%p4389_p6), %v4647_v56 }
 0x11a   : > { %2419 = vmatprep.subr.mxu0 (!%p4389_p6), %v2398_v57  ;;  %2937 = vmatpush1.bf16.msra.mxu1 (!%p4389_p6), %v5146_v62  ;;  %v2372_v57 = vcombine.low (!%p4389_p6), %v2359_v53, %v2363_v54  ;;  %v5258_v53 = vld [vmem:[%s6664_s6 + $0x2e0] ss:$16 sps:$4 sm:$0xff] (!%p4389_p6)   ;;  %v5263_v54 = vld [vmem:[%s6664_s6 + $0x104] ss:$16 sps:$4 sm:$0xff] (!%p4389_p6)  }
 0x11b   : > { %2938 = vmatprep.subr.bf16.mxu1 (!%p4389_p6), %v5147_v63 }
 0x11c   : > { %v2380_v59 = vrot.slane (!%p4389_p6), %v2372_v57, %v5579_v50  ;;  %v5264_v57 = vld [vmem:[%s6664_s6 + $0x300] ss:$16 sps:$4 sm:$0xff] (!%p4389_p6)  }
 0x11d   : > { %2420 = vmatpush1.msra.mxu0 (!%p4389_p6), %v2397_v58 }
 0x11e   : > { %2977 = vmatprep.subr.bf16.mxu0 (!%p4389_p6), %v5145_v61  ;;  %2939 = vmatpush1.bf16.msra.mxu1 (!%p4389_p6), %v5152_v2 }
 0x11f   : > { %2940 = vmatprep.subr.bf16.mxu1 (!%p4389_p6), %v5153_v3 }
 0x122   : > { %2941 = vmatpush1.bf16.msra.mxu1 (!%p4389_p6), %v5158_v6 }
 0x123   : > { %2942 = vmatprep.subr.bf16.mxu1 (!%p4389_p6), %v5159_v7 }
 0x126   : > { %2943 = vmatpush1.bf16.msra.mxu1 (!%p4389_p6), %v5164_v9 }
 0x127   : > { %2944 = vmatprep.subr.bf16.mxu1 (!%p4389_p6), %v5165_v12 }
 0x12a   : > { %2945 = vmatpush1.bf16.msra.mxu1 (!%p4389_p6), %v5170_v15 }
 0x12b   : > { %2946 = vmatprep.subr.bf16.mxu1 (!%p4389_p6), %v5171_v16 }
 0x12e   : > { %2947 = vmatpush1.bf16.msra.mxu1 (!%p4389_p6), %v5176_v18 }
 0x12f   : > { %2948 = vmatprep.subr.bf16.mxu1 (!%p4389_p6), %v5177_v20  ;;  %v5224_v20 = vld [vmem:[%s6664_s6 + $0x224] ss:$16 sps:$4 sm:$0xff] (!%p4389_p6)  }
 0x132   : > { %2949 = vmatpush1.bf16.msra.mxu1 (!%p4389_p6), %v5182_v23  ;;  %v5219_v23 = vld [vmem:[%s6664_s6 + $0x20] ss:$16 sps:$4 sm:$0xff] (!%p4389_p6)  }
 0x133   : > { %2950 = vmatprep.subr.bf16.mxu1 (!%p4389_p6), %v5183_v25  ;;  %v5222_v25 = vld [vmem:[%s6664_s6 + $0x220] ss:$16 sps:$4 sm:$0xff] (!%p4389_p6)  }
 0x136   : > { %2951 = vmatpush1.bf16.msra.mxu1 (!%p4389_p6), %v5188_v28  ;;  %v5225_v28 = vld [vmem:[%s6664_s6 + $0x40] ss:$16 sps:$4 sm:$0xff] (!%p4389_p6)  }
 0x137   : > { %2952 = vmatprep.subr.bf16.mxu1 (!%p4389_p6), %v5189_v29  ;;  %v5228_v29 = vld [vmem:[%s6664_s6 + $0x240] ss:$16 sps:$4 sm:$0xff] (!%p4389_p6)  }
 0x13a   : > { %2953 = vmatpush1.bf16.msra.mxu1 (!%p4389_p6), %v5194_v31  ;;  %v5236_v31 = vld [vmem:[%s6664_s6 + $0x264] ss:$16 sps:$4 sm:$0xff] (!%p4389_p6)  }
 0x13b   : > { %2954 = vmatprep.subr.bf16.mxu1 (!%p4389_p6), %v5195_v33  ;;  %v5234_v33 = vld [vmem:[%s6664_s6 + $0x260] ss:$16 sps:$4 sm:$0xff] (!%p4389_p6)  }
 0x1eb   : > { %v2154_v35 = vpop.f32.mrb[0].mxu0  ;;  %v2318_v36 = vpop.f32.mrb[0].mxu1 }
 0x1ec   : > { %v2156_v27 = vpop.f32.mrb[1].mxu0  ;;  %v2320_v37 = vpop.f32.mrb[1].mxu1  ;;  %4390 = vmatmul.mubr.msk.f32.vlgmr.msra.gmra.mrb[0].mxu0 (!%p4389_p6), %vm2411_vm0, %v2392_v60 }
 0x1ed   : > { %v2329_v38 = vcombine.low %v2154_v35, %v2156_v27  ;;  %v2330_v39 = vcombine.low %v2318_v36, %v2320_v37  ;;  %v2158_v40 = vpop.f32.mrb[2].mxu0  ;;  %v2322_v41 = vpop.f32.mrb[2].mxu1  ;;  %2978 = vmatpush1.bf16.msra.mxu0 (!%p4389_p6), %v5143_v0  ;;  %v5200_v35 = vld [vmem:[%s6665_s7 + $0x120] ss:$16 sps:$4 sm:$0xff] (!%p4389_p6)   ;;  %v5199_v36 = vld [vmem:[%s6665_s7 + $0x12c] ss:$16 sps:$4 sm:$0xff] (!%p4389_p6)  }
 0x1ee   : > { %v2159_v42 = vpop.f32.mrb[3].mxu0  ;;  %v2323_v43 = vpop.f32.mrb[3].mxu1  ;;  %2979 = vmatprep.subr.bf16.mxu0 (!%p4389_p6), %v5151_v1  ;;  %v5197_v27 = vld [vmem:[%s6665_s7 + $0x128] ss:$16 sps:$4 sm:$0xff] (!%p4389_p6)   ;;  %2955 = vmatpush1.bf16.msra.mxu1 (!%p4389_p6), %v5200_v35  ;;  %v5201_v37 = vld [vmem:[%s6665_s7 + $0x144] ss:$16 sps:$4 sm:$0xff] (!%p4389_p6)  }
 0x1ef   : > { %v2337_v45 = vrot.slane %v2329_v38, %v5579_v50  ;;  %v2344_v46 = vrot.slane %v2330_v39, %v5579_v50  ;;  %2352 = sbr.rel (%p4389_p6) target bundleno = 1291 (0x50b), region = 72  ;;  %v5205_v38 = vld [vmem:[%s6665_s7 + $0x14c] ss:$16 sps:$4 sm:$0xff] (!%p4389_p6)   ;;  %v5203_v39 = vld [vmem:[%s6665_s7 + $0x148] ss:$16 sps:$4 sm:$0xff] (!%p4389_p6)   ;;  %2956 = vmatprep.subr.bf16.mxu1 (!%p4389_p6), %v5201_v37 }
 0x1f0   : > { %v5206_v40 = vld [vmem:[%s6665_s7 + $0x140] ss:$16 sps:$4 sm:$0xff] (!%p4389_p6)   ;;  %v5207_v41 = vld [vmem:[%s6665_s7 + $0x164] ss:$16 sps:$4 sm:$0xff] (!%p4389_p6)   ;;  %v5211_v42 = vld [vmem:[%s6665_s7 + $0x16c] ss:$16 sps:$4 sm:$0xff] (!%p4389_p6)  }
 0x1f1   : > { %v2345_v26 = vcombine.low %v2337_v45, %v2344_v46  ;;  %2980 = vmatpush1.bf16.msra.mxu0 (!%p4389_p6), %v5149_v4  ;;  %v5209_v43 = vld [vmem:[%s6665_s7 + $0x168] ss:$16 sps:$4 sm:$0xff] (!%p4389_p6)   ;;  %v5212_v45 = vld [vmem:[%s6665_s7 + $0x160] ss:$16 sps:$4 sm:$0xff] (!%p4389_p6)   ;;  %v5215_v46 = vld [vmem:[%s6664_s6 + $0x4] ss:$16 sps:$4 sm:$0xff] (!%p4389_p6)  }
 0x1f2   : > { %2981 = vmatprep.subr.bf16.mxu0 (!%p4389_p6), %v5157_v5  ;;  %2957 = vmatpush1.bf16.msra.mxu1 (!%p4389_p6), %v5206_v40  ;;  %v2399_v1 = vld [vmem:[%s6663_s5] sm:$0x3] (!%p4389_p6)  ;;  %v5242_v35 = vld [vmem:[%s6664_s6 + $0x284] ss:$16 sps:$4 sm:$0xff] (!%p4389_p6)  }
 0x1f3   : > { %v2347_v48 = vadd.f32 %v2345_v26, %v406_v47  ;;  %2958 = vmatprep.subr.bf16.mxu1 (!%p4389_p6), %v5207_v41  ;;  %v5218_v47 = vld [vmem:[%s6664_s6 + $0x204] ss:$16 sps:$4 sm:$0xff] (!%p4389_p6)   ;;  %v2366_v26 = vsub.s32 (!%p4389_p6), 2, %v5571_v44  ;;  %v2404_v3 = vrot.slane (!%p4389_p6), %v2399_v1, %v6002_v51  ;;  %v2408_v4 = vrot.slane (!%p4389_p6), %v2399_v1, %v6005_v52  ;;  %v5246_v40 = vld [vmem:[%s6664_s6 + $0x2a0] ss:$16 sps:$4 sm:$0xff] (!%p4389_p6)  }
 0x1f4   : > { %v5245_v37 = vld [vmem:[%s6664_s6 + $0xa4] ss:$16 sps:$4 sm:$0xff] (!%p4389_p6)   ;;  %v5276_v1 = vld [vmem:[%s6664_s6 + $0x340] ss:$16 sps:$4 sm:$0xff] (!%p4389_p6)  }
 0x1f5   : > { %2348 = vst [vmem:[#allocation2] sm:$0xff] %v2347_v48  ;;  %2982 = vmatpush1.bf16.msra.mxu0 (!%p4389_p6), %v5155_v8  ;;  %v2370_v48 = vsub.s32 (!%p4389_p6), 3, %v5571_v44  ;;  %v2367_v55 = vrot.slane (!%p4389_p6), %v2354_v49, %v2366_v26  ;;  %v5251_v41 = vld [vmem:[%s6664_s6 + $0xc4] ss:$16 sps:$4 sm:$0xff] (!%p4389_p6)   ;;  %v4569_v44 = vld [vmem:[%s6668_s10] ss:$0 sm:$0xff] (!%p4389_p6) }
 0x1f6   : > { %2983 = vmatprep.subr.bf16.mxu0 %v5163_v11  ;;  %2959 = vmatpush1.bf16.msra.mxu1 %v5212_v45  ;;  %v5252_v45 = vld [vmem:[%s6664_s6 + $0x2c0] ss:$16 sps:$4 sm:$0xff]  }
 0x1f7   : > { %3658 = vmatprep.subr.bf16.mxu1 %v5215_v46  ;;  %v2371_v56 = vrot.slane %v2354_v49, %v2370_v48  ;;  %v5257_v46 = vld [vmem:[%s6664_s6 + $0xe4] ss:$16 sps:$4 sm:$0xff]   ;;  %v5255_v49 = vld [vmem:[%s6664_s6 + $0xe0] ss:$16 sps:$4 sm:$0xff]  }
 0x1f9   : > { %2984 = vmatpush1.bf16.msra.mxu0 %v5161_v13  ;;  %v2373_v58 = vcombine.low %v2367_v55, %v2371_v56  ;;  %v5266_v55 = vld [vmem:[%s6664_s6 + $0x304] ss:$16 sps:$4 sm:$0xff]   ;;  %v5261_v56 = vld [vmem:[%s6664_s6 + $0x100] ss:$16 sps:$4 sm:$0xff]  }
 0x1fa   : > { %2985 = vmatprep.subr.bf16.mxu0 %v5169_v14 }
 0x1fb   : > { %v2387_v60 = vrot.slane %v2373_v58, %v5579_v50  ;;  %v5269_v58 = vld [vmem:[%s6664_s6 + $0x124] ss:$16 sps:$4 sm:$0xff]  }
 0x1fc   : > { %v2353_v62 = vld [vmem:[#allocation2] sm:$0xff] }
 0x1fd   : > { %2986 = vmatpush1.bf16.msra.mxu0 %v5167_v17  ;;  %v2388_v61 = vcombine.low %v2380_v59, %v2387_v60  ;;  %v5213_v17 = vld [vmem:[%s6664_s6] ss:$16 sps:$4 sm:$0xff]   ;;  %v5272_v59 = vld [vmem:[%s6664_s6 + $0x324] ss:$16 sps:$4 sm:$0xff]  }
 0x1fe   : > { %2987 = vmatprep.subr.bf16.mxu0 %v5175_v19  ;;  %v5221_v19 = vld [vmem:[%s6664_s6 + $0x24] ss:$16 sps:$4 sm:$0xff]   ;;  %v5267_v60 = vld [vmem:[%s6664_s6 + $0x120] ss:$16 sps:$4 sm:$0xff]  }
 0x1ff   : > { %v2390_v63 = vadd.f32 %v2388_v61, %v2353_v62  ;;  %v5270_v61 = vld [vmem:[%s6664_s6 + $0x320] ss:$16 sps:$4 sm:$0xff]   ;;  %v5275_v62 = vld [vmem:[%s6664_s6 + $0x144] ss:$16 sps:$4 sm:$0xff]  }
 0x201   : > { %2988 = vmatpush1.bf16.msra.mxu0 %v5173_v21  ;;  %v2391_v0 = vmax.f32 %v2390_v63, 0.0  ;;  %v5278_v63 = vld [vmem:[%s6664_s6 + $0x344] ss:$16 sps:$4 sm:$0xff]  }
 0x202   : > { %2989 = vmatprep.subr.bf16.mxu0 %v5181_v22 }
 0x203   : > { %v2489_v2 = vcombine.high %v2391_v0, %v2391_v0  ;;  %v6021_v6 = vrot.slane %v2391_v0, %v5579_v50  ;;  %v5273_v0 = vld [vmem:[%s6664_s6 + $0x140] ss:$16 sps:$4 sm:$0xff]  }
 0x205   : > { %2990 = vmatpush1.bf16.msra.mxu0 %v5179_v24  ;;  %v6024_v7 = vrot.slane %v2489_v2, %v5579_v50  ;;  %v2504_v14 = vcombine.high %v6021_v6, %v6021_v6  ;;  %v5216_v50 = vld [vmem:[%s6664_s6 + $0x200] ss:$16 sps:$4 sm:$0xff]   ;;  %v5227_v24 = vld [vmem:[%s6664_s6 + $0x44] ss:$16 sps:$4 sm:$0xff]  }
 0x206   : > { %2991 = vmatprep.subr.bf16.mxu0 %v5187_v10  ;;  %v5230_v10 = vld [vmem:[%s6664_s6 + $0x244] ss:$16 sps:$4 sm:$0xff]  }
 0x207   : > { %v2505_v15 = vcombine.high %v6024_v7, %v6024_v7  ;;  %v6042_v21 = vpack.c.bf16 %v2504_v14, %v2504_v14  ;;  %v5281_v2 = vld [vmem:[%s6664_s6 + $0x164] ss:$16 sps:$4 sm:$0xff]  }
 0x208   : > { %v5296_v14 = vld [vmem:[%s6664_s6 + $0x3a4] ss:$16 sps:$4 sm:$0xff]  }
 0x209   : > { %2992 = vmatpush1.bf16.msra.mxu0 %v5185_v30  ;;  %v6044_v22 = vpack.c.bf16 %v2505_v15, %v2505_v15  ;;  %v5233_v30 = vld [vmem:[%s6664_s6 + $0x64] ss:$16 sps:$4 sm:$0xff]   ;;  %v5291_v15 = vld [vmem:[%s6664_s6 + $0x1a0] ss:$16 sps:$4 sm:$0xff]  }
 0x20a   : > { %2993 = vmatprep.subr.bf16.mxu0 %v5193_v32  ;;  %v5231_v32 = vld [vmem:[%s6664_s6 + $0x60] ss:$16 sps:$4 sm:$0xff]  }
 0x20d   : > { %2994 = vmatpush1.bf16.msra.mxu0 %v5191_v34  ;;  %v5239_v34 = vld [vmem:[%s6664_s6 + $0x84] ss:$16 sps:$4 sm:$0xff]  }
 0x20e   : > { %2995 = vmatprep.subr.bf16.mxu0 %v5199_v36  ;;  %v5237_v36 = vld [vmem:[%s6664_s6 + $0x80] ss:$16 sps:$4 sm:$0xff]  }
 0x211   : > { %2996 = vmatpush1.bf16.msra.mxu0 %v5197_v27  ;;  %v5240_v27 = vld [vmem:[%s6664_s6 + $0x280] ss:$16 sps:$4 sm:$0xff]  }
 0x212   : > { %2997 = vmatprep.subr.bf16.mxu0 %v5205_v38  ;;  %v5248_v38 = vld [vmem:[%s6664_s6 + $0x2a4] ss:$16 sps:$4 sm:$0xff]  }
 0x215   : > { %2998 = vmatpush1.bf16.msra.mxu0 %v5203_v39  ;;  %v5243_v39 = vld [vmem:[%s6664_s6 + $0xa0] ss:$16 sps:$4 sm:$0xff]  }
 0x216   : > { %2999 = vmatprep.subr.bf16.mxu0 %v5211_v42  ;;  %v5254_v42 = vld [vmem:[%s6664_s6 + $0x2c4] ss:$16 sps:$4 sm:$0xff]  }
 0x219   : > { %3000 = vmatpush1.bf16.msra.mxu0 %v5209_v43  ;;  %v5249_v43 = vld [vmem:[%s6664_s6 + $0xc0] ss:$16 sps:$4 sm:$0xff]  }
 0x21a   : > { %3699 = vmatprep.subr.bf16.mxu0 %v5218_v47  ;;  %v5260_v47 = vld [vmem:[%s6664_s6 + $0x2e4] ss:$16 sps:$4 sm:$0xff]  }
 0x2bf   : > { %v2481_v5 = vpop.f32.mrb[0].mxu0 }
 0x2c0   : > { %v2482_v8 = vadd.f32 %v2481_v5, %v2404_v3  ;;  %v2483_v9 = vpop.f32.mrb[1].mxu0  ;;  %v5284_v3 = vld [vmem:[%s6664_s6 + $0x364] ss:$16 sps:$4 sm:$0xff]   ;;  %v5282_v5 = vld [vmem:[%s6664_s6 + $0x360] ss:$16 sps:$4 sm:$0xff]  }
 0x2c1   : > { %v2484_v11 = vadd.f32 %v2483_v9, %v2408_v4  ;;  %v5279_v4 = vld [vmem:[%s6664_s6 + $0x160] ss:$16 sps:$4 sm:$0xff]   ;;  %v5290_v9 = vld [vmem:[%s6664_s6 + $0x384] ss:$16 sps:$4 sm:$0xff]  }
 0x2c2   : > { %v2486_v12 = vmax.f32 %v2482_v8, 0.0  ;;  %v5287_v8 = vld [vmem:[%s6664_s6 + $0x184] ss:$16 sps:$4 sm:$0xff]  }
 0x2c3   : > { %v2487_v13 = vmax.f32 %v2484_v11, 0.0  ;;  %v5285_v11 = vld [vmem:[%s6664_s6 + $0x180] ss:$16 sps:$4 sm:$0xff]  }
 0x2c4   : > { %v2642_v18 = vpack.c.bf16 %v2486_v12, %v2486_v12  ;;  %v5288_v12 = vld [vmem:[%s6664_s6 + $0x380] ss:$16 sps:$4 sm:$0xff]  }
 0x2c5   : > { %v2643_v16 = vpack.c.bf16 %v2487_v13, %v2487_v13  ;;  %v5293_v13 = vld [vmem:[%s6664_s6 + $0x1a4] ss:$16 sps:$4 sm:$0xff]  }
 0x2c7   : > { %4439 = vmatprep.mubr.msk.bf16.mxu1 %vm2932_vm1, %v2643_v16  ;;  %4440 = vmatprep.mubr.msk.bf16.mxu0 %vm2932_vm1, %v2643_v16  ;;  %v5294_v16 = vld [vmem:[%s6664_s6 + $0x3a0] ss:$16 sps:$4 sm:$0xff]  }
 0x2c8   : > { %2969 = vmatmul.mubr.bf16.vlgmr.msra.gmra.mrb[0].mxu1 %v2642_v18  ;;  %3010 = vmatmul.mubr.bf16.vlgmr.msra.gmra.mrb[4].mxu0 %v2642_v18  ;;  %v5297_v18 = vld [vmem:[%s6664_s6 + $0x1c0] ss:$16 sps:$4 sm:$0xff]  }
 0x2c9   : > { %3659 = vmatpush1.bf16.msra.mxu1 %v5213_v17  ;;  %3700 = vmatpush1.bf16.msra.mxu0 %v5216_v50  ;;  %v5299_v17 = vld [vmem:[%s6664_s6 + $0x1c4] ss:$16 sps:$4 sm:$0xff]  }
 0x2ca   : > { %3660 = vmatprep.subr.bf16.mxu1 %v5221_v19  ;;  %3701 = vmatprep.subr.bf16.mxu0 %v5224_v20  ;;  %v5302_v50 = vld [vmem:[%s6664_s6 + $0x3c4] ss:$16 sps:$4 sm:$0xff]   ;;  %v5300_v19 = vld [vmem:[%s6664_s6 + $0x3c0] ss:$16 sps:$4 sm:$0xff]  }
 0x2cb   : > { %3690 = vmatprep.mubr.bf16.mxu1 %v6042_v21  ;;  %3731 = vmatprep.mubr.bf16.mxu0 %v6044_v22  ;;  %v5305_v20 = vld [vmem:[%s6664_s6 + $0x1e4] ss:$16 sps:$4 sm:$0xff]  }
 0x2cd   : > { %3661 = vmatpush1.bf16.msra.mxu1 %v5219_v23  ;;  %3702 = vmatpush1.bf16.msra.mxu0 %v5222_v25  ;;  %v5308_v23 = vld [vmem:[%s6664_s6 + $0x3e4] ss:$16 sps:$4 sm:$0xff]   ;;  %v5303_v25 = vld [vmem:[%s6664_s6 + $0x1e0] ss:$16 sps:$4 sm:$0xff]  }
 0x2ce   : > { %3662 = vmatprep.subr.bf16.mxu1 %v5227_v24  ;;  %3703 = vmatprep.subr.bf16.mxu0 %v5230_v10  ;;  %v5306_v24 = vld [vmem:[%s6664_s6 + $0x3e0] ss:$16 sps:$4 sm:$0xff]   ;;  %v5311_v10 = vld [vmem:[%s6664_s6 + $0xc] ss:$16 sps:$4 sm:$0xff]  }
 0x2d1   : > { %3663 = vmatpush1.bf16.msra.mxu1 %v5225_v28  ;;  %3704 = vmatpush1.bf16.msra.mxu0 %v5228_v29  ;;  %v5314_v28 = vld [vmem:[%s6664_s6 + $0x20c] ss:$16 sps:$4 sm:$0xff]   ;;  %v6230_v29 = vpack.c.bf16 %v6021_v6, %v6021_v6 }
 0x2d2   : > { %3664 = vmatprep.subr.bf16.mxu1 %v5233_v30  ;;  %3705 = vmatprep.subr.bf16.mxu0 %v5236_v31  ;;  %v6234_v30 = vpack.c.bf16 %v6024_v7, %v6024_v7  ;;  %v5309_v31 = vld [vmem:[%s6664_s6 + $0x8] ss:$16 sps:$4 sm:$0xff]   ;;  %v5317_v6 = vld [vmem:[%s6664_s6 + $0x2c] ss:$16 sps:$4 sm:$0xff]  }
 0x2d3   : > { %v5320_v7 = vld [vmem:[%s6664_s6 + $0x22c] ss:$16 sps:$4 sm:$0xff]  }
 0x2d5   : > { %3665 = vmatpush1.bf16.msra.mxu1 %v5231_v32  ;;  %3706 = vmatpush1.bf16.msra.mxu0 %v5234_v33  ;;  %v5312_v32 = vld [vmem:[%s6664_s6 + $0x208] ss:$16 sps:$4 sm:$0xff]  }
 0x2d6   : > { %3666 = vmatprep.subr.bf16.mxu1 %v5239_v34  ;;  %3707 = vmatprep.subr.bf16.mxu0 %v5242_v35  ;;  %v5315_v33 = vld [vmem:[%s6664_s6 + $0x28] ss:$16 sps:$4 sm:$0xff]   ;;  %v5323_v35 = vld [vmem:[%s6664_s6 + $0x4c] ss:$16 sps:$4 sm:$0xff]  }
 0x2d7   : > { %v5318_v34 = vld [vmem:[%s6664_s6 + $0x228] ss:$16 sps:$4 sm:$0xff]  }
 0x2d9   : > { %3667 = vmatpush1.bf16.msra.mxu1 %v5237_v36  ;;  %3708 = vmatpush1.bf16.msra.mxu0 %v5240_v27  ;;  %v5326_v36 = vld [vmem:[%s6664_s6 + $0x24c] ss:$16 sps:$4 sm:$0xff]   ;;  %v5321_v27 = vld [vmem:[%s6664_s6 + $0x48] ss:$16 sps:$4 sm:$0xff]  }
 0x2da   : > { %3668 = vmatprep.subr.bf16.mxu1 %v5245_v37  ;;  %3709 = vmatprep.subr.bf16.mxu0 %v5248_v38  ;;  %v5324_v37 = vld [vmem:[%s6664_s6 + $0x248] ss:$16 sps:$4 sm:$0xff]   ;;  %v5329_v38 = vld [vmem:[%s6664_s6 + $0x6c] ss:$16 sps:$4 sm:$0xff]  }
 0x2dd   : > { %3669 = vmatpush1.bf16.msra.mxu1 %v5243_v39  ;;  %3710 = vmatpush1.bf16.msra.mxu0 %v5246_v40  ;;  %v5330_v39 = vld [vmem:[%s6664_s6 + $0x268] ss:$16 sps:$4 sm:$0xff]   ;;  %v5335_v40 = vld [vmem:[%s6664_s6 + $0x8c] ss:$16 sps:$4 sm:$0xff]  }
 0x2de   : > { %3670 = vmatprep.subr.bf16.mxu1 %v5251_v41  ;;  %3711 = vmatprep.subr.bf16.mxu0 %v5254_v42  ;;  %v5338_v41 = vld [vmem:[%s6664_s6 + $0x28c] ss:$16 sps:$4 sm:$0xff]   ;;  %v5333_v42 = vld [vmem:[%s6664_s6 + $0x88] ss:$16 sps:$4 sm:$0xff]  }
 0x2e1   : > { %3671 = vmatpush1.bf16.msra.mxu1 %v5249_v43  ;;  %3712 = vmatpush1.bf16.msra.mxu0 %v5252_v45  ;;  %v5336_v43 = vld [vmem:[%s6664_s6 + $0x288] ss:$16 sps:$4 sm:$0xff]   ;;  %v5341_v45 = vld [vmem:[%s6664_s6 + $0xac] ss:$16 sps:$4 sm:$0xff]  }
 0x2e2   : > { %3672 = vmatprep.subr.bf16.mxu1 %v5257_v46  ;;  %3713 = vmatprep.subr.bf16.mxu0 %v5260_v47  ;;  %v5344_v46 = vld [vmem:[%s6664_s6 + $0x2ac] ss:$16 sps:$4 sm:$0xff]   ;;  %v5339_v47 = vld [vmem:[%s6664_s6 + $0xa8] ss:$16 sps:$4 sm:$0xff]  }
 0x2e5   : > { %3673 = vmatpush1.bf16.msra.mxu1 %v5255_v49  ;;  %3714 = vmatpush1.bf16.msra.mxu0 %v5258_v53  ;;  %v5342_v49 = vld [vmem:[%s6664_s6 + $0x2a8] ss:$16 sps:$4 sm:$0xff]   ;;  %v5347_v53 = vld [vmem:[%s6664_s6 + $0xcc] ss:$16 sps:$4 sm:$0xff]  }
 0x2e6   : > { %3674 = vmatprep.subr.bf16.mxu1 %v5263_v54  ;;  %3715 = vmatprep.subr.bf16.mxu0 %v5266_v55  ;;  %v5350_v54 = vld [vmem:[%s6664_s6 + $0x2cc] ss:$16 sps:$4 sm:$0xff]   ;;  %v5345_v55 = vld [vmem:[%s6664_s6 + $0xc8] ss:$16 sps:$4 sm:$0xff]  }
 0x2e9   : > { %3675 = vmatpush1.bf16.msra.mxu1 %v5261_v56  ;;  %3716 = vmatpush1.bf16.msra.mxu0 %v5264_v57  ;;  %v5348_v56 = vld [vmem:[%s6664_s6 + $0x2c8] ss:$16 sps:$4 sm:$0xff]   ;;  %v5353_v57 = vld [vmem:[%s6664_s6 + $0xec] ss:$16 sps:$4 sm:$0xff]  }
 0x2ea   : > { %3676 = vmatprep.subr.bf16.mxu1 %v5269_v58  ;;  %3717 = vmatprep.subr.bf16.mxu0 %v5272_v59  ;;  %v5356_v58 = vld [vmem:[%s6664_s6 + $0x2ec] ss:$16 sps:$4 sm:$0xff]   ;;  %v5351_v59 = vld [vmem:[%s6664_s6 + $0xe8] ss:$16 sps:$4 sm:$0xff]  }
 0x2ed   : > { %3677 = vmatpush1.bf16.msra.mxu1 %v5267_v60  ;;  %3718 = vmatpush1.bf16.msra.mxu0 %v5270_v61  ;;  %v5354_v60 = vld [vmem:[%s6664_s6 + $0x2e8] ss:$16 sps:$4 sm:$0xff]   ;;  %v5359_v61 = vld [vmem:[%s6664_s6 + $0x10c] ss:$16 sps:$4 sm:$0xff]  }
 0x2ee   : > { %3678 = vmatprep.subr.bf16.mxu1 %v5275_v62  ;;  %3719 = vmatprep.subr.bf16.mxu0 %v5278_v63  ;;  %v5362_v62 = vld [vmem:[%s6664_s6 + $0x30c] ss:$16 sps:$4 sm:$0xff]   ;;  %v5357_v63 = vld [vmem:[%s6664_s6 + $0x108] ss:$16 sps:$4 sm:$0xff]  }
 0x2f1   : > { %3679 = vmatpush1.bf16.msra.mxu1 %v5273_v0  ;;  %3720 = vmatpush1.bf16.msra.mxu0 %v5276_v1  ;;  %v5360_v0 = vld [vmem:[%s6664_s6 + $0x308] ss:$16 sps:$4 sm:$0xff]   ;;  %v5365_v1 = vld [vmem:[%s6664_s6 + $0x12c] ss:$16 sps:$4 sm:$0xff]  }
 0x2f2   : > { %3680 = vmatprep.subr.bf16.mxu1 %v5281_v2  ;;  %3721 = vmatprep.subr.bf16.mxu0 %v5284_v3  ;;  %v5368_v2 = vld [vmem:[%s6664_s6 + $0x32c] ss:$16 sps:$4 sm:$0xff]   ;;  %v5363_v3 = vld [vmem:[%s6664_s6 + $0x128] ss:$16 sps:$4 sm:$0xff]  }
 0x2f5   : > { %3681 = vmatpush1.bf16.msra.mxu1 %v5279_v4  ;;  %3722 = vmatpush1.bf16.msra.mxu0 %v5282_v5  ;;  %v5366_v4 = vld [vmem:[%s6664_s6 + $0x328] ss:$16 sps:$4 sm:$0xff]   ;;  %v5371_v5 = vld [vmem:[%s6664_s6 + $0x14c] ss:$16 sps:$4 sm:$0xff]  }
 0x2f6   : > { %3682 = vmatprep.subr.bf16.mxu1 %v5287_v8  ;;  %3723 = vmatprep.subr.bf16.mxu0 %v5290_v9  ;;  %v5374_v8 = vld [vmem:[%s6664_s6 + $0x34c] ss:$16 sps:$4 sm:$0xff]   ;;  %v5369_v9 = vld [vmem:[%s6664_s6 + $0x148] ss:$16 sps:$4 sm:$0xff]  }
 0x2f9   : > { %3683 = vmatpush1.bf16.msra.mxu1 %v5285_v11  ;;  %3724 = vmatpush1.bf16.msra.mxu0 %v5288_v12  ;;  %v5372_v11 = vld [vmem:[%s6664_s6 + $0x348] ss:$16 sps:$4 sm:$0xff]   ;;  %v5377_v12 = vld [vmem:[%s6664_s6 + $0x16c] ss:$16 sps:$4 sm:$0xff]  }
 0x2fa   : > { %3684 = vmatprep.subr.bf16.mxu1 %v5293_v13  ;;  %3725 = vmatprep.subr.bf16.mxu0 %v5296_v14  ;;  %v5380_v13 = vld [vmem:[%s6664_s6 + $0x36c] ss:$16 sps:$4 sm:$0xff]   ;;  %v5375_v14 = vld [vmem:[%s6664_s6 + $0x168] ss:$16 sps:$4 sm:$0xff]  }
 0x2fd   : > { %3685 = vmatpush1.bf16.msra.mxu1 %v5291_v15  ;;  %3726 = vmatpush1.bf16.msra.mxu0 %v5294_v16  ;;  %v5378_v15 = vld [vmem:[%s6664_s6 + $0x368] ss:$16 sps:$4 sm:$0xff]   ;;  %v5383_v16 = vld [vmem:[%s6664_s6 + $0x18c] ss:$16 sps:$4 sm:$0xff]  }
 0x2fe   : > { %3686 = vmatprep.subr.bf16.mxu1 %v5299_v17  ;;  %3727 = vmatprep.subr.bf16.mxu0 %v5302_v50  ;;  %v5386_v17 = vld [vmem:[%s6664_s6 + $0x38c] ss:$16 sps:$4 sm:$0xff]   ;;  %v5381_v50 = vld [vmem:[%s6664_s6 + $0x188] ss:$16 sps:$4 sm:$0xff]  }
 0x301   : > { %3687 = vmatpush1.bf16.msra.mxu1 %v5297_v18  ;;  %3728 = vmatpush1.bf16.msra.mxu0 %v5300_v19  ;;  %v5384_v18 = vld [vmem:[%s6664_s6 + $0x388] ss:$16 sps:$4 sm:$0xff]   ;;  %v5389_v19 = vld [vmem:[%s6664_s6 + $0x1ac] ss:$16 sps:$4 sm:$0xff]  }
 0x302   : > { %3688 = vmatprep.subr.bf16.mxu1 %v5305_v20  ;;  %3729 = vmatprep.subr.bf16.mxu0 %v5308_v23  ;;  %v5392_v20 = vld [vmem:[%s6664_s6 + $0x3ac] ss:$16 sps:$4 sm:$0xff]   ;;  %v5387_v23 = vld [vmem:[%s6664_s6 + $0x1a8] ss:$16 sps:$4 sm:$0xff]  }
 0x305   : > { %3689 = vmatpush1.bf16.msra.mxu1 %v5303_v25  ;;  %3730 = vmatpush1.bf16.msra.mxu0 %v5306_v24  ;;  %v5390_v25 = vld [vmem:[%s6664_s6 + $0x3a8] ss:$16 sps:$4 sm:$0xff]   ;;  %v5395_v24 = vld [vmem:[%s6664_s6 + $0x1cc] ss:$16 sps:$4 sm:$0xff]  }
 0x306   : > { %3740 = vmatprep.subr.bf16.mxu1 %v5311_v10  ;;  %3781 = vmatprep.subr.bf16.mxu0 %v5314_v28  ;;  %v5398_v10 = vld [vmem:[%s6664_s6 + $0x3cc] ss:$16 sps:$4 sm:$0xff]   ;;  %v5393_v28 = vld [vmem:[%s6664_s6 + $0x1c8] ss:$16 sps:$4 sm:$0xff]  }
 0x308   : > { %3691 = vmatmul.mubr.bf16.vlgmr.msra.gmra.mrb[4].mxu1 %v6230_v29  ;;  %3732 = vmatmul.mubr.bf16.vlgmr.msra.gmra.mrb[8].mxu0 %v6234_v30 }
 0x309   : > { %3741 = vmatpush1.bf16.msra.mxu1 %v5309_v31  ;;  %3782 = vmatpush1.bf16.msra.mxu0 %v5312_v32  ;;  %v5396_v31 = vld [vmem:[%s6664_s6 + $0x3c8] ss:$16 sps:$4 sm:$0xff]   ;;  %v5401_v32 = vld [vmem:[%s6664_s6 + $0x1ec] ss:$16 sps:$4 sm:$0xff]  }
 0x30a   : > { %3742 = vmatprep.subr.bf16.mxu1 %v5317_v6  ;;  %3783 = vmatprep.subr.bf16.mxu0 %v5320_v7  ;;  %v5404_v6 = vld [vmem:[%s6664_s6 + $0x3ec] ss:$16 sps:$4 sm:$0xff]   ;;  %v3868_v7 = vld [vmem:[%s6667_s9 + $0x80] sm:$0xff] }
 0x30b   : > { %3772 = vmatprep.mubr.bf16.mxu1 %v6042_v21  ;;  %3813 = vmatprep.mubr.bf16.mxu0 %v6044_v22  ;;  %v5332_v21 = vld [vmem:[%s6664_s6 + $0x26c] ss:$16 sps:$4 sm:$0xff]   ;;  %v5327_v22 = vld [vmem:[%s6664_s6 + $0x68] ss:$16 sps:$4 sm:$0xff]  }
 0x30d   : > { %3743 = vmatpush1.bf16.msra.mxu1 %v5315_v33  ;;  %3784 = vmatpush1.bf16.msra.mxu0 %v5318_v34  ;;  %v3869_v33 = vld [vmem:[%s6667_s9 + $0x88] sm:$0xff] }
 0x30e   : > { %3744 = vmatprep.subr.bf16.mxu1 %v5323_v35  ;;  %3785 = vmatprep.subr.bf16.mxu0 %v5326_v36  ;;  %v5399_v34 = vld [vmem:[%s6664_s6 + $0x1e8] ss:$16 sps:$4 sm:$0xff]   ;;  %v4649_v36 = vpack.c.bf16 %v3869_v33, %v3868_v7  ;;  %v3886_v7 = vld [vmem:[%s6667_s9 + $0x110] sm:$0xff] }
 0x30f   : > { %v5402_v35 = vld [vmem:[%s6664_s6 + $0x3e8] ss:$16 sps:$4 sm:$0xff]  }
 0x310   : > { %v3887_v33 = vld [vmem:[%s6667_s9 + $0x118] sm:$0xff] }
 0x311   : > { %3745 = vmatpush1.bf16.msra.mxu1 %v5321_v27  ;;  %3786 = vmatpush1.bf16.msra.mxu0 %v5324_v37  ;;  %v3852_v27 = vld [vmem:[%s6667_s9] sm:$0xff]  ;;  %v3853_v37 = vld [vmem:[%s6667_s9 + $0x8] sm:$0xff] }
 0x312   : > { %3746 = vmatprep.subr.bf16.mxu1 %v5329_v38  ;;  %3787 = vmatprep.subr.bf16.mxu0 %v5332_v21  ;;  %v3870_v38 = vld [vmem:[%s6667_s9 + $0x90] sm:$0xff]  ;;  %v3871_v21 = vld [vmem:[%s6667_s9 + $0x98] sm:$0xff] }
 0x315   : > { %3747 = vmatpush1.bf16.msra.mxu1 %v5327_v22  ;;  %3788 = vmatpush1.bf16.msra.mxu0 %v5330_v39  ;;  %v4651_v22 = vpack.c.bf16 %v3853_v37, %v3852_v27  ;;  %v4653_v39 = vpack.c.bf16 %v3871_v21, %v3870_v38  ;;  %v3888_v37 = vld [vmem:[%s6667_s9 + $0x120] sm:$0xff]  ;;  %v3889_v38 = vld [vmem:[%s6667_s9 + $0x128] sm:$0xff]  ;;  %v3906_v21 = vld [vmem:[%s6667_s9 + $0x1b0] sm:$0xff] }
 0x316   : > { %3748 = vmatprep.subr.bf16.mxu1 %v5335_v40  ;;  %3789 = vmatprep.subr.bf16.mxu0 %v5338_v41  ;;  %v3854_v40 = vld [vmem:[%s6667_s9 + $0x10] sm:$0xff]  ;;  %v3855_v41 = vld [vmem:[%s6667_s9 + $0x18] sm:$0xff] }
 0x319   : > { %3749 = vmatpush1.bf16.msra.mxu1 %v5333_v42  ;;  %3790 = vmatpush1.bf16.msra.mxu0 %v5336_v43  ;;  %v3872_v42 = vld [vmem:[%s6667_s9 + $0xa0] sm:$0xff]  ;;  %v3873_v43 = vld [vmem:[%s6667_s9 + $0xa8] sm:$0xff] }
 0x31a   : > { %3750 = vmatprep.subr.bf16.mxu1 %v5341_v45  ;;  %3791 = vmatprep.subr.bf16.mxu0 %v5344_v46  ;;  %v4655_v45 = vpack.c.bf16 %v3855_v41, %v3854_v40  ;;  %v4657_v46 = vpack.c.bf16 %v3873_v43, %v3872_v42  ;;  %v3890_v41 = vld [vmem:[%s6667_s9 + $0x130] sm:$0xff]  ;;  %v3891_v42 = vld [vmem:[%s6667_s9 + $0x138] sm:$0xff]  ;;  %v3908_v43 = vld [vmem:[%s6667_s9 + $0x1c0] sm:$0xff] }
 0x31d   : > { %3751 = vmatpush1.bf16.msra.mxu1 %v5339_v47  ;;  %3792 = vmatpush1.bf16.msra.mxu0 %v5342_v49  ;;  %v3856_v47 = vld [vmem:[%s6667_s9 + $0x20] sm:$0xff]  ;;  %v3857_v49 = vld [vmem:[%s6667_s9 + $0x28] sm:$0xff] }
 0x31e   : > { %3752 = vmatprep.subr.bf16.mxu1 %v5347_v53  ;;  %3793 = vmatprep.subr.bf16.mxu0 %v5350_v54  ;;  %v3874_v53 = vld [vmem:[%s6667_s9 + $0xb0] sm:$0xff] }
 0x321   : > { %3753 = vmatpush1.bf16.msra.mxu1 %v5345_v55  ;;  %3794 = vmatpush1.bf16.msra.mxu0 %v5348_v56  ;;  %v3858_v55 = vld [vmem:[%s6667_s9 + $0x30] sm:$0xff]  ;;  %v3859_v56 = vld [vmem:[%s6667_s9 + $0x38] sm:$0xff] }
 0x322   : > { %3754 = vmatprep.subr.bf16.mxu1 %v5353_v57  ;;  %3795 = vmatprep.subr.bf16.mxu0 %v5356_v58  ;;  %v3876_v57 = vld [vmem:[%s6667_s9 + $0xc0] sm:$0xff]  ;;  %v3877_v58 = vld [vmem:[%s6667_s9 + $0xc8] sm:$0xff] }
 0x325   : > { %3755 = vmatpush1.bf16.msra.mxu1 %v5351_v59  ;;  %3796 = vmatpush1.bf16.msra.mxu0 %v5354_v60  ;;  %v4663_v59 = vpack.c.bf16 %v3859_v56, %v3858_v55  ;;  %v4665_v60 = vpack.c.bf16 %v3877_v58, %v3876_v57  ;;  %v3894_v56 = vld [vmem:[%s6667_s9 + $0x150] sm:$0xff]  ;;  %v3895_v57 = vld [vmem:[%s6667_s9 + $0x158] sm:$0xff] }
 0x326   : > { %3756 = vmatprep.subr.bf16.mxu1 %v5359_v61  ;;  %3797 = vmatprep.subr.bf16.mxu0 %v5362_v62  ;;  %v3860_v61 = vld [vmem:[%s6667_s9 + $0x40] sm:$0xff]  ;;  %v3861_v62 = vld [vmem:[%s6667_s9 + $0x48] sm:$0xff]  ;;  %v4703_v58 = vpack.c.bf16 %v3895_v57, %v3894_v56 }
 0x329   : > { %3757 = vmatpush1.bf16.msra.mxu1 %v5357_v63  ;;  %3798 = vmatpush1.bf16.msra.mxu0 %v5360_v0  ;;  %v3878_v63 = vld [vmem:[%s6667_s9 + $0xd0] sm:$0xff]  ;;  %v3879_v0 = vld [vmem:[%s6667_s9 + $0xd8] sm:$0xff] }
 0x32a   : > { %3758 = vmatprep.subr.bf16.mxu1 %v5365_v1  ;;  %3799 = vmatprep.subr.bf16.mxu0 %v5368_v2  ;;  %v4667_v1 = vpack.c.bf16 %v3861_v62, %v3860_v61  ;;  %v4669_v2 = vpack.c.bf16 %v3879_v0, %v3878_v63  ;;  %v3912_v61 = vld [vmem:[%s6667_s9 + $0x1e0] sm:$0xff]  ;;  %v3913_v62 = vld [vmem:[%s6667_s9 + $0x1e8] sm:$0xff] }
 0x32d   : > { %3759 = vmatpush1.bf16.msra.mxu1 %v5363_v3  ;;  %3800 = vmatpush1.bf16.msra.mxu0 %v5366_v4  ;;  %v3862_v3 = vld [vmem:[%s6667_s9 + $0x50] sm:$0xff]  ;;  %v3863_v4 = vld [vmem:[%s6667_s9 + $0x58] sm:$0xff] }
 0x32e   : > { %3760 = vmatprep.subr.bf16.mxu1 %v5371_v5  ;;  %3801 = vmatprep.subr.bf16.mxu0 %v5374_v8  ;;  %v4671_v5 = vpack.c.bf16 %v3863_v4, %v3862_v3  ;;  %v3880_v8 = vld [vmem:[%s6667_s9 + $0xe0] sm:$0xff]  ;;  %v3897_v3 = vld [vmem:[%s6667_s9 + $0x168] sm:$0xff] }
 0x331   : > { %3761 = vmatpush1.bf16.msra.mxu1 %v5369_v9  ;;  %3802 = vmatpush1.bf16.msra.mxu0 %v5372_v11  ;;  %v3881_v9 = vld [vmem:[%s6667_s9 + $0xe8] sm:$0xff] }
 0x332   : > { %3762 = vmatprep.subr.bf16.mxu1 %v5377_v12  ;;  %3803 = vmatprep.subr.bf16.mxu0 %v5380_v13  ;;  %v4673_v11 = vpack.c.bf16 %v3881_v9, %v3880_v8  ;;  %v3864_v12 = vld [vmem:[%s6667_s9 + $0x60] sm:$0xff]  ;;  %v3865_v13 = vld [vmem:[%s6667_s9 + $0x68] sm:$0xff] }
 0x335   : > { %3763 = vmatpush1.bf16.msra.mxu1 %v5375_v14  ;;  %3804 = vmatpush1.bf16.msra.mxu0 %v5378_v15  ;;  %v4675_v14 = vpack.c.bf16 %v3865_v13, %v3864_v12  ;;  %v3882_v15 = vld [vmem:[%s6667_s9 + $0xf0] sm:$0xff]  ;;  %v3915_v13 = vld [vmem:[%s6667_s9 + $0x1f8] sm:$0xff] }
 0x336   : > { %3764 = vmatprep.subr.bf16.mxu1 %v5383_v16  ;;  %3805 = vmatprep.subr.bf16.mxu0 %v5386_v17  ;;  %v3883_v16 = vld [vmem:[%s6667_s9 + $0xf8] sm:$0xff]  ;;  %v3914_v12 = vld [vmem:[%s6667_s9 + $0x1f0] sm:$0xff] }
 0x337   : > { %v4677_v17 = vpack.c.bf16 %v3883_v16, %v3882_v15  ;;  %v3898_v15 = vld [vmem:[%s6667_s9 + $0x170] sm:$0xff]  ;;  %v3899_v16 = vld [vmem:[%s6667_s9 + $0x178] sm:$0xff] }
 0x339   : > { %3765 = vmatpush1.bf16.msra.mxu1 %v5381_v50  ;;  %3806 = vmatpush1.bf16.msra.mxu0 %v5384_v18  ;;  %v3866_v50 = vld [vmem:[%s6667_s9 + $0x70] sm:$0xff]  ;;  %v3867_v18 = vld [vmem:[%s6667_s9 + $0x78] sm:$0xff] }
 0x33a   : > { %3766 = vmatprep.subr.bf16.mxu1 %v5389_v19  ;;  %3807 = vmatprep.subr.bf16.mxu0 %v5392_v20  ;;  %v4679_v19 = vpack.c.bf16 %v3867_v18, %v3866_v50  ;;  %v3900_v20 = vld [vmem:[%s6667_s9 + $0x180] sm:$0xff] }
 0x33b   : > { %v3822_v50 = vld [vmem:[%s6666_s8] sm:$0xf] }
 0x33d   : > { %3767 = vmatpush1.bf16.msra.mxu1 %v5387_v23  ;;  %3808 = vmatpush1.bf16.msra.mxu0 %v5390_v25  ;;  %v3901_v23 = vld [vmem:[%s6667_s9 + $0x188] sm:$0xff]  ;;  %v3884_v25 = vld [vmem:[%s6667_s9 + $0x100] sm:$0xff] }
 0x33e   : > { %3768 = vmatprep.subr.bf16.mxu1 %v5395_v24  ;;  %3809 = vmatprep.subr.bf16.mxu0 %v5398_v10  ;;  %v4681_v24 = vpack.c.bf16 %v3901_v23, %v3900_v20  ;;  %v3885_v10 = vld [vmem:[%s6667_s9 + $0x108] sm:$0xff]  ;;  %v3827_v23 = vrot.slane %v3822_v50, %v6002_v51 }
 0x341   : > { %3769 = vmatpush1.bf16.msra.mxu1 %v5393_v28  ;;  %3810 = vmatpush1.bf16.msra.mxu0 %v5396_v31  ;;  %v3902_v28 = vld [vmem:[%s6667_s9 + $0x190] sm:$0xff]  ;;  %v3903_v31 = vld [vmem:[%s6667_s9 + $0x198] sm:$0xff] }
 0x342   : > { %3770 = vmatprep.subr.bf16.mxu1 %v5401_v32  ;;  %3811 = vmatprep.subr.bf16.mxu0 %v5404_v6  ;;  %v4683_v32 = vpack.c.bf16 %v3885_v10, %v3884_v25  ;;  %v4685_v6 = vpack.c.bf16 %v3903_v31, %v3902_v28  ;;  %v3831_v28 = vrot.slane %v3822_v50, %v6005_v52 }
 0x345   : > { %3771 = vmatpush1.bf16.msra.mxu1 %v5399_v34  ;;  %3812 = vmatpush1.bf16.msra.mxu0 %v5402_v35  ;;  %v3904_v34 = vld [vmem:[%s6667_s9 + $0x1a0] sm:$0xff]  ;;  %v3905_v35 = vld [vmem:[%s6667_s9 + $0x1a8] sm:$0xff] }
 0x346   : > { %4650 = vmatprep.subr.bf16.mxu1 %v4649_v36  ;;  %4682 = vmatprep.subr.bf16.mxu0 %v4681_v24  ;;  %v4687_v36 = vpack.c.bf16 %v3887_v33, %v3886_v7  ;;  %v4689_v27 = vpack.c.bf16 %v3905_v35, %v3904_v34 }
 0x348   : > { %3773 = vmatmul.mubr.bf16.vlgmr.msra.gmra.mrb[8].mxu1 %v6230_v29  ;;  %3814 = vmatmul.mubr.bf16.vlgmr.msra.gmra.mrb[12].mxu0 %v6234_v30  ;;  %v3875_v29 = vld [vmem:[%s6667_s9 + $0xb8] sm:$0xff]  ;;  %v4659_v30 = vpack.c.bf16 %v3857_v49, %v3856_v47  ;;  %v3892_v49 = vld [vmem:[%s6667_s9 + $0x140] sm:$0xff] }
 0x349   : > { %4652 = vmatpush3.bf16.msra.mxu1 %v4651_v22  ;;  %v4661_v54 = vpack.c.bf16 %v3875_v29, %v3874_v53  ;;  %4684 = vmatpush3.bf16.msra.mxu0 %v4683_v32  ;;  %v3907_v22 = vld [vmem:[%s6667_s9 + $0x1b8] sm:$0xff]  ;;  %v3893_v53 = vld [vmem:[%s6667_s9 + $0x148] sm:$0xff]  ;;  %v3910_v29 = vld [vmem:[%s6667_s9 + $0x1d0] sm:$0xff] }
 0x34a   : > { %4654 = vmatprep.subr.bf16.mxu1 %v4653_v39  ;;  %4686 = vmatprep.subr.bf16.mxu0 %v4685_v6  ;;  %v4691_v39 = vpack.c.bf16 %v3889_v38, %v3888_v37  ;;  %v4693_v40 = vpack.c.bf16 %v3907_v22, %v3906_v21  ;;  %v3835_v22 = vrot.slane %v3822_v50, %v2366_v26 }
 0x34d   : > { %4656 = vmatpush3.bf16.msra.mxu1 %v4655_v45  ;;  %4688 = vmatpush3.bf16.msra.mxu0 %v4687_v36  ;;  %v3909_v45 = vld [vmem:[%s6667_s9 + $0x1c8] sm:$0xff] }
 0x34e   : > { %4658 = vmatprep.subr.bf16.mxu1 %v4657_v46  ;;  %4690 = vmatprep.subr.bf16.mxu0 %v4689_v27  ;;  %v4695_v46 = vpack.c.bf16 %v3891_v42, %v3890_v41  ;;  %v4697_v47 = vpack.c.bf16 %v3909_v45, %v3908_v43  ;;  %v3839_v41 = vrot.slane %v3822_v50, %v2370_v48 }
 0x351   : > { %4660 = vmatpush3.bf16.msra.mxu1 %v4659_v30  ;;  %4692 = vmatpush3.bf16.msra.mxu0 %v4691_v39  ;;  %v3911_v30 = vld [vmem:[%s6667_s9 + $0x1d8] sm:$0xff] }
 0x352   : > { %4662 = vmatprep.subr.bf16.mxu1 %v4661_v54  ;;  %4694 = vmatprep.subr.bf16.mxu0 %v4693_v40  ;;  %v4699_v54 = vpack.c.bf16 %v3893_v53, %v3892_v49  ;;  %v4701_v55 = vpack.c.bf16 %v3911_v30, %v3910_v29 }
 0x355   : > { %4664 = vmatpush3.bf16.msra.mxu1 %v4663_v59  ;;  %4696 = vmatpush3.bf16.msra.mxu0 %v4695_v46 }
 0x356   : > { %4666 = vmatprep.subr.bf16.mxu1 %v4665_v60  ;;  %4698 = vmatprep.subr.bf16.mxu0 %v4697_v47 }
 0x359   : > { %4668 = vmatpush3.bf16.msra.mxu1 %v4667_v1  ;;  %4700 = vmatpush3.bf16.msra.mxu0 %v4699_v54  ;;  %v4705_v1 = vpack.c.bf16 %v3913_v62, %v3912_v61 }
 0x35a   : > { %4670 = vmatprep.subr.bf16.mxu1 %v4669_v2  ;;  %4702 = vmatprep.subr.bf16.mxu0 %v4701_v55  ;;  %v3896_v2 = vld [vmem:[%s6667_s9 + $0x160] sm:$0xff] }
 0x35b   : > { %v4707_v8 = vpack.c.bf16 %v3897_v3, %v3896_v2 }
 0x35d   : > { %4672 = vmatpush3.bf16.msra.mxu1 %v4671_v5  ;;  %4704 = vmatpush3.bf16.msra.mxu0 %v4703_v58 }
 0x35e   : > { %4674 = vmatprep.subr.bf16.mxu1 %v4673_v11  ;;  %4706 = vmatprep.subr.bf16.mxu0 %v4705_v1 }
 0x361   : > { %4676 = vmatpush3.bf16.msra.mxu1 %v4675_v14  ;;  %4708 = vmatpush3.bf16.msra.mxu0 %v4707_v8  ;;  %v4709_v14 = vpack.c.bf16 %v3915_v13, %v3914_v12 }
 0x362   : > { %4678 = vmatprep.subr.bf16.mxu1 %v4677_v17  ;;  %v4711_v17 = vpack.c.bf16 %v3899_v16, %v3898_v15 }
 0x363   : > { %4710 = vmatprep.subr.bf16.mxu0 %v4709_v14 }
 0x365   : > { %4680 = vmatpush3.bf16.msra.mxu1 %v4679_v19  ;;  %4712 = vmatpush3.bf16.msra.mxu0 %v4711_v17 }
 0x39b   : > { %v2970_v59 = vpop.f32.mrb[0].mxu1  ;;  %v3011_v60 = vpop.f32.mrb[4].mxu0 }
 0x39c   : > { %v2972_v63 = vpop.f32.mrb[1].mxu1  ;;  %v3013_v0 = vpop.f32.mrb[5].mxu0 }
 0x39d   : > { %v2974_v4 = vpop.f32.mrb[2].mxu1  ;;  %v3015_v5 = vpop.f32.mrb[6].mxu0 }
 0x39e   : > { %v2975_v9 = vpop.f32.mrb[3].mxu1  ;;  %v3016_v11 = vpop.f32.mrb[7].mxu0 }
 0x3db   : > { %v3692_v18 = vpop.f32.mrb[4].mxu1  ;;  %v3733_v19 = vpop.f32.mrb[8].mxu0 }
 0x3dc   : > { %v3693_v20 = vadd.f32 %v3692_v18, %v2970_v59  ;;  %v3694_v25 = vpop.f32.mrb[5].mxu1  ;;  %v3735_v24 = vpop.f32.mrb[9].mxu0 }
 0x3dd   : > { %v3695_v10 = vadd.f32 %v3694_v25, %v2972_v63  ;;  %v3696_v31 = vpop.f32.mrb[6].mxu1  ;;  %v3737_v32 = vpop.f32.mrb[10].mxu0 }
 0x3de   : > { %v3734_v6 = vadd.f32 %v3733_v19, %v3693_v20  ;;  %v3697_v7 = vpop.f32.mrb[7].mxu1  ;;  %v3738_v33 = vpop.f32.mrb[11].mxu0 }
 0x3df   : > { %v3736_v34 = vadd.f32 %v3735_v24, %v3695_v10 }
 0x3e0   : > { %v3844_v35 = vadd.f32 %v3827_v23, %v3734_v6 }
 0x3e1   : > { %v3845_v36 = vadd.f32 %v3831_v28, %v3736_v34 }
 0x3e2   : > { %v3848_v37 = vmax.f32 %v3844_v35, 0.0 }
 0x3e3   : > { %v3849_v27 = vmax.f32 %v3845_v36, 0.0 }
 0x3e5   : > { %3987 = vmatprep.mubr.f32.mxu1 %v3849_v27 }
 0x3e6   : > { %3988 = vmatmul.mubr.f32.vlgmr.msra.gmra.mrb[12].mxu1 %v3848_v37 }
 0x41b   : > { %v3774_v38 = vpop.f32.mrb[8].mxu1  ;;  %v3815_v21 = vpop.f32.mrb[12].mxu0 }
 0x41c   : > { %v3775_v51 = vadd.f32 %v3774_v38, %v3011_v60  ;;  %v3776_v39 = vpop.f32.mrb[9].mxu1  ;;  %v3817_v52 = vpop.f32.mrb[13].mxu0 }
 0x41d   : > { %v3777_v40 = vadd.f32 %v3776_v39, %v3013_v0  ;;  %v3778_v42 = vpop.f32.mrb[10].mxu1  ;;  %v3819_v43 = vpop.f32.mrb[14].mxu0 }
 0x41e   : > { %v3816_v45 = vadd.f32 %v3815_v21, %v3775_v51  ;;  %v3779_v46 = vpop.f32.mrb[11].mxu1  ;;  %v3820_v47 = vpop.f32.mrb[15].mxu0 }
 0x41f   : > { %v3818_v49 = vadd.f32 %v3817_v52, %v3777_v40 }
 0x420   : > { %v3846_v53 = vadd.f32 %v3835_v22, %v3816_v45 }
 0x421   : > { %v3847_v29 = vadd.f32 %v3839_v41, %v3818_v49 }
 0x422   : > { %v3850_v54 = vmax.f32 %v3846_v53, 0.0 }
 0x423   : > { %v3851_v30 = vmax.f32 %v3847_v29, 0.0 }
 0x425   : > { %4057 = vmatprep.mubr.f32.mxu0 %v3851_v30 }
 0x426   : > { %4058 = vmatmul.mubr.f32.vlgmr.msra.gmra.mrb[2].mxu0 %v3850_v54 }
 0x4b9   : > { %v4607_v55 = vpop.f32.mrb[12].mxu1 }
 0x4ba   : > { %v4608_v26 = vpop.f32.mrb[13].mxu1 }
 0x4bb   : > { %v4609_v56 = vadd.f32 %v4608_v26, %v4607_v55 }
 0x4bd   : > { %v3990_v58 = vadd.f32 %v4609_v56, %v4569_v44 }
 0x4f9   : > { %v4642_v48 = vpop.f32.mrb[2].mxu0 }
 0x4fa   : > { %v4643_v57 = vpop.f32.mrb[3].mxu0 }
 0x4fb   : > { %v4644_v59 = vadd.f32 %v4643_v57, %v4642_v48 }
 0x4fd   : > { %v4060_v60 = vadd.f32 %v4644_v59, %v3990_v58 }
 0x4ff   : > { %5405 = vtanh.f32 %v4060_v60 }
 0x509   : > { %v5406_v61 = vpop.eup %5405 }
 0x50a   : > { %4064 = vst [vmem:[#allocation3] sm:$0x3] %v5406_v61 }
 0x50b PF: > { %p4741_p7 = scmp.eq.s32.totalorder %s5515_s18, 4  ;;  %s5448_s21 = smov [#allocation3]  }
 0x50c   : > { %s4072_s22 = sshll.u32 %s5448_s21, 4  ;;  %s4073_s22 = int_to_ptr.vmem [resolvable:$true] %s4072_s22 }
 0x50d   : > { %s5407_s23 = scalar_lea.vmem %s4073_s22, 32  ;;  %p5414_p11 = scmp.lt.s32.totalorder %s4073_s22, %s4073_s22 }
 0x50e   : > { %p5408_p8 = scmp.ne.s32.totalorder %s4073_s22, %s5407_s23  ;;  %p5415_p12 = scmp.lt.s32.totalorder %s5407_s23, %s5407_s23 }
 0x510   : > { %p5409_p9 = pnand %p5408_p8, %p4741_p7  ;;  %p5416_p13 = por %p5415_p12, %p5414_p11 }
 0x512   : > { %p5410_p10 = pneg %p5409_p9 }
 0x514   : > { %p5417_p0 = pnand %p5416_p13, %p5410_p10 }
 0x516   : > { %5420 = shalt.err (!%p5417_p0)
}
 0x517   : > { %s5421_s26 = scalar_lea.hbm %s6669_s11, 32 }
 0x518   : > { %p5422_p1 = scmp.ne.s32.totalorder %s6669_s11, %s5421_s26  ;;  %p5427_p4 = scmp.lt.u32.totalorder %s5421_s26, %s6669_s11 }
 0x51a   : > { %p5423_p2 = pnand %p5422_p1, %p4741_p7 }
 0x51c   : > { %p5424_p3 = pneg %p5423_p2 }
 0x51e   : > { %p5429_p5 = pnand %p5427_p4, %p5424_p3 }
 0x520   : > { %5432 = shalt.err (!%p5429_p5)
}
 0x521   : > { %4738 = dma.vmem_to_hbm [thread:$0]  (%p4741_p7), %s4073_s22, 32, %s6669_s11, [#allocation4]  }
 0x522   : > { %5438 = dma.done.wait (%p4741_p7), [#allocation4], 32  }
 0x523   : > { %5440 = vsyncadd (%p4741_p7), [#allocation4], 4294967264 }
 0x524 PF: > { %s22_s17 = sadd.s32 1, %s5443_s17  }
 0x525   : > { %p19_p6 = scmp.ge.s32.totalorder %s22_s17, 7  }
 0x527   :  { %21 = sbr.rel (!%p19_p6) target bundleno = 1 (0x1), region = 102 }
 0x52e   :  { %4085 = vsyncpa [#allocation4], 1 }
 0x52f   :  { %4087 = vsyncpa [#allocation4 + $0x1], 1 }

</bundles_post_ra>
